<compile_context>
chip_gen: v7x
topology: tpu7x:2x2x1
jax: 0.10.0
libtpu: 0.0.40
codegen_flags: <defaults>
</compile_context>

<pallas_src>
import functools

import jax
import jax.numpy as jnp
from jax.experimental import pallas as pl
from jax.experimental.pallas import tpu as pltpu


# Row layout of the merged per-layer bias/gamma slab (padded to max(3H, F)).
_ROW_BQKV, _ROW_BO, _ROW_G1, _ROW_BE1, _ROW_B1, _ROW_B2, _ROW_G2, _ROW_BE2 = range(8)
_NUM_VEC_ROWS = 8


# ----------------------------- Pallas kernel -------------------------------

def _mixer_kernel(x_ref, pos_ref, wa_ref, wpq_ref, w2_ref, vec_ref, out_ref, *,
                  num_layer, num_head, norm_eps, ffn_activation):
    bb, L, H = x_ref.shape            # batch block, seqlen, dim_hidden
    P = pos_ref.shape[-1]
    F = w2_ref.shape[1]               # ffn hidden
    hd = H // num_head
    NL = bb * L
    scale = 1.0 / (hd ** 0.5)

    # Activation / position loaded, cast and reshaped ONCE (not per layer).
    x2 = x_ref[...].astype(jnp.float32).reshape(NL, H)
    pos2 = pos_ref[...].astype(jnp.float32).reshape(NL, P)

    def layer_body(l, x_in):
        # Full stacked slabs are VMEM-resident; pick this layer's slice.
        wa = wa_ref[l]            # (H, 4H+F) = [wq | wk | wv | wo | w1]
        wpq = wpq_ref[l]          # (P, 2H)   = [wpos@wq | wpos@wk]
        w2 = w2_ref[l]            # (F, H)
        vec = vec_ref[l]          # (8, max(3H, F)) bias / gamma rows

        wqkv = wa[:, :3 * H]
        wo = wa[:, 3 * H:4 * H]
        w1 = wa[:, 4 * H:]

        bqkv = vec[_ROW_BQKV:_ROW_BQKV + 1, :3 * H]   # [bpos@wq+bq | bpos@wk+bk | bv]
        bo = vec[_ROW_BO:_ROW_BO + 1, :H]
        g1 = vec[_ROW_G1:_ROW_G1 + 1, :H]
        be1 = vec[_ROW_BE1:_ROW_BE1 + 1, :H]
        b1 = vec[_ROW_B1:_ROW_B1 + 1, :F]
        b2 = vec[_ROW_B2:_ROW_B2 + 1, :H]
        g2 = vec[_ROW_G2:_ROW_G2 + 1, :H]
        be2 = vec[_ROW_BE2:_ROW_BE2 + 1, :H]

        # Fused projections (wide MXU pushes instead of 4 narrow ones):
        #   q = x@wq + pos@(wpos@wq) + (bpos@wq + bq)   (same for k); v = x@wv + bv
        qkv = jnp.dot(x_in, wqkv, preferred_element_type=jnp.float32) + bqkv   # (NL, 3H)
        pqk = jnp.dot(pos2, wpq, preferred_element_type=jnp.float32)           # (NL, 2H)
        q = qkv[:, :H] + pqk[:, :H]
        k = qkv[:, H:2 * H] + pqk[:, H:]
        v = qkv[:, 2 * H:]

        q3 = q.reshape(bb, L, H)
        k3 = k.reshape(bb, L, H)
        v3 = v.reshape(bb, L, H)

        # Multi-head attention, batched over the batch dim; heads unrolled
        # statically with the per-head output projection accumulated directly
        # (no concatenate, no post-concat (H,H) matmul).
        attn = jnp.zeros((NL, H), jnp.float32)
        for h in range(num_head):
            sl = slice(h * hd, (h + 1) * hd)
            s = jnp.einsum('nqd,nkd->nqk', q3[:, :, sl], k3[:, :, sl],
                           preferred_element_type=jnp.float32) * scale
            s = s - jnp.max(s, axis=-1, keepdims=True)
            p = jnp.exp(s)
            p = p / jnp.sum(p, axis=-1, keepdims=True)   # exact softmax norm
            ctx = jnp.einsum('nqk,nkd->nqd', p, v3[:, :, sl],
                             preferred_element_type=jnp.float32)   # (bb, L, hd)
            attn = attn + jnp.dot(ctx.reshape(NL, hd), wo[sl, :],
                                  preferred_element_type=jnp.float32)
        attn = attn + bo

        # Residual + LayerNorm 1 (post-LN).
        h1 = x_in + attn
        mu = jnp.mean(h1, axis=-1, keepdims=True)
        var = jnp.mean((h1 - mu) ** 2, axis=-1, keepdims=True)
        h1 = (h1 - mu) * jax.lax.rsqrt(var + norm_eps)
        h1 = h1 * g1 + be1

        # Feed-forward network.
        f = jnp.dot(h1, w1, preferred_element_type=jnp.float32) + b1
        if ffn_activation == "gelu":
            f = jax.nn.gelu(f)
        else:
            f = jnp.maximum(f, 0.0)
        f = jnp.dot(f, w2, preferred_element_type=jnp.float32) + b2

        # Residual + LayerNorm 2.
        h2 = h1 + f
        mu2 = jnp.mean(h2, axis=-1, keepdims=True)
        var2 = jnp.mean((h2 - mu2) ** 2, axis=-1, keepdims=True)
        h2 = (h2 - mu2) * jax.lax.rsqrt(var2 + norm_eps)
        h2 = h2 * g2 + be2
        return h2

    x_out = jax.lax.fori_loop(0, num_layer, layer_body, x2, unroll=True)

    out_ref[...] = x_out.reshape(bb, L, H).astype(out_ref.dtype)


# ------------------------- parameter packing --------------------------------

def _pad_row(row, width):
    row = jnp.asarray(row, jnp.float32).reshape(1, -1)
    return jnp.pad(row, ((0, 0), (0, width - row.shape[1])))


def _pack_layer_params(layer_params):
    H = layer_params[0]["wq"].shape[0]
    F = layer_params[0]["w1"].shape[1]
    wpad = max(3 * H, F)
    wa_l, wpq_l, w2_l, vec_l = [], [], [], []
    for p in layer_params:
        wa_l.append(jnp.concatenate(
            [p["wq"], p["wk"], p["wv"], p["wo"], p["w1"]], axis=1))        # (H,4H+F)
        wpq_l.append(jnp.concatenate(
            [p["wpos"] @ p["wq"], p["wpos"] @ p["wk"]], axis=1))           # (P,2H)
        bq = p["bpos"].reshape(1, H) @ p["wq"] + p["bq"].reshape(1, H)
        bk = p["bpos"].reshape(1, H) @ p["wk"] + p["bk"].reshape(1, H)
        bqkv = jnp.concatenate([bq, bk, p["bv"].reshape(1, H)], axis=1)    # (1,3H)
        vec_l.append(jnp.concatenate([
            _pad_row(bqkv, wpad), _pad_row(p["bo"], wpad), _pad_row(p["g1"], wpad),
            _pad_row(p["be1"], wpad), _pad_row(p["b1"], wpad), _pad_row(p["b2"], wpad),
            _pad_row(p["g2"], wpad), _pad_row(p["be2"], wpad)], axis=0))   # (8,wpad)
        w2_l.append(p["w2"])                                               # (F,H)
    return jnp.stack(wa_l), jnp.stack(wpq_l), jnp.stack(w2_l), jnp.stack(vec_l)


def _default_batch_block(N):
    """On a 2-TensorCore chip (v7x) split the batch across the cores."""
    try:
        kind = jax.devices()[0].device_kind.lower()
    except Exception:
        kind = ""
    if N >= 2 and N % 2 == 0 and "v7" in kind:
        return N // 2
    return N


# ------------------------------ mixer wrapper --------------------------------

def sp_encoder_mixer(X, position, layer_params, *, num_head, norm_eps,
                     ffn_activation, batch_block=None):
    """X: [N, r, r, H], position: [N, r, r, P] -> [N, r, r, H]."""
    N, r1, r2, H = X.shape
    P = position.shape[-1]
    L = r1 * r2
    num_layer = len(layer_params)
    F = layer_params[0]["w1"].shape[-1]
    assert H % num_head == 0
    bb = _default_batch_block(N) if batch_block is None else batch_block
    assert N % bb == 0

    wa, wpq, w2, vec = _pack_layer_params(layer_params)
    wpad = vec.shape[-1]

    # Layer axis is an in-kernel loop => stacked weights must be VMEM-resident.
    # Guard against blowing the VMEM budget if the mixer is reused at larger
    # configs (v7x has only 64 MiB per core).
    wt_bytes = sum(int(a.size) * a.dtype.itemsize for a in (wa, wpq, w2, vec))
    io_bytes = 4 * bb * L * (2 * H + P)
    assert wt_bytes + io_bytes < 48 * 1024 * 1024, (
        "stacked per-layer weights too large for the fused single-launch "
        "kernel; re-introduce a layer grid axis / weight streaming")

    X3 = X.reshape(N, L, H)
    pos3 = position.reshape(N, L, P)

    kernel = functools.partial(_mixer_kernel, num_layer=num_layer,
                               num_head=num_head, norm_eps=norm_eps,
                               ffn_activation=ffn_activation)

    compiler_kwargs = dict(dimension_semantics=("parallel",))
    est_vmem = 2 * (wt_bytes + io_bytes) + (2 << 20)
    if est_vmem > 24 * 1024 * 1024:
        # Only override the scoped-VMEM default when the footprint needs it.
        compiler_kwargs["vmem_limit_bytes"] = min(2 * est_vmem, 64 * 1024 * 1024)

    batch_map = lambda b: (b, 0, 0)     # activations: indexed by batch block
    whole_map = lambda b: (0, 0, 0)     # weights: full-extent, grid-invariant

    out = pl.pallas_call(
        kernel,
        out_shape=jax.ShapeDtypeStruct((N, L, H), X.dtype),
        grid=(N // bb,),
        in_specs=[
            pl.BlockSpec((bb, L, H), batch_map),
            pl.BlockSpec((bb, L, P), batch_map),
            pl.BlockSpec((num_layer, H, 4 * H + F), whole_map),
            pl.BlockSpec((num_layer, P, 2 * H), whole_map),
            pl.BlockSpec((num_layer, F, H), whole_map),
            pl.BlockSpec((num_layer, _NUM_VEC_ROWS, wpad), whole_map),
        ],
        out_specs=pl.BlockSpec((bb, L, H), batch_map),
        compiler_params=pltpu.CompilerParams(**compiler_kwargs),
    )(X3, pos3, wa, wpq, w2, vec)
    return out.reshape(N, r1, r2, H)


# ------------------------- parameter construction ----------------------------

def init_layer_params(key, dim_hidden, dim_position, ffn_dim_hidden):
    ks = jax.random.split(key, 8)

    def glorot(k, shape):
        fan_in, fan_out = shape
        lim = (6.0 / (fan_in + fan_out)) ** 0.5
        return jax.random.uniform(k, shape, jnp.float32, -lim, lim)

    H, P, F = dim_hidden, dim_position, ffn_dim_hidden
    return {
        "wpos": glorot(ks[0], (P, H)), "bpos": jnp.zeros((1, H), jnp.float32),
        "wq": glorot(ks[1], (H, H)),   "bq": jnp.zeros((1, H), jnp.float32),
        "wk": glorot(ks[2], (H, H)),   "bk": jnp.zeros((1, H), jnp.float32),
        "wv": glorot(ks[3], (H, H)),   "bv": jnp.zeros((1, H), jnp.float32),
        "wo": glorot(ks[4], (H, H)),   "bo": jnp.zeros((1, H), jnp.float32),
        "g1": jnp.ones((1, H), jnp.float32), "be1": jnp.zeros((1, H), jnp.float32),
        "w1": glorot(ks[5], (H, F)),   "b1": jnp.zeros((1, F), jnp.float32),
        "w2": glorot(ks[6], (F, H)),   "b2": jnp.zeros((1, H), jnp.float32),
        "g2": jnp.ones((1, H), jnp.float32), "be2": jnp.zeros((1, H), jnp.float32),
    }


# --------------------------- pure-JAX reference ------------------------------

def _layer_ref(X, pos, p, *, num_head, norm_eps, ffn_activation):
    H = X.shape[-1]
    hd = H // num_head
    pos_emb = pos @ p["wpos"] + p["bpos"]
    xp = X + pos_emb
    q = xp @ p["wq"] + p["bq"]
    k = xp @ p["wk"] + p["bk"]
    v = X @ p["wv"] + p["bv"]

    def split(t):  # (N, L, H) -> (N, nh, L, hd)
        N, L, _ = t.shape
        return t.reshape(N, L, num_head, hd).transpose(0, 2, 1, 3)

    qh, kh, vh = split(q), split(k), split(v)
    s = jnp.einsum("nhqd,nhkd->nhqk", qh, kh) / (hd ** 0.5)
    pr = jax.nn.softmax(s, axis=-1)
    o = jnp.einsum("nhqk,nhkd->nhqd", pr, vh)
    o = o.transpose(0, 2, 1, 3).reshape(X.shape)
    attn = o @ p["wo"] + p["bo"]

    h1 = X + attn
    mu = h1.mean(-1, keepdims=True)
    var = ((h1 - mu) ** 2).mean(-1, keepdims=True)
    h1 = (h1 - mu) / jnp.sqrt(var + norm_eps) * p["g1"] + p["be1"]

    f = h1 @ p["w1"] + p["b1"]
    f = jax.nn.gelu(f) if ffn_activation == "gelu" else jnp.maximum(f, 0.0)
    f = f @ p["w2"] + p["b2"]

    h2 = h1 + f
    mu2 = h2.mean(-1, keepdims=True)
    var2 = ((h2 - mu2) ** 2).mean(-1, keepdims=True)
    return (h2 - mu2) / jnp.sqrt(var2 + norm_eps) * p["g2"] + p["be2"]


def sp_encoder_mixer_ref(X, position, layer_params, *, num_head, norm_eps,
                         ffn_activation):
    N, r1, r2, H = X.shape
    Xf = X.reshape(N, r1 * r2, H)
    posf = position.reshape(N, r1 * r2, position.shape[-1])
    for p in layer_params:
        Xf = _layer_ref(Xf, posf, p, num_head=num_head, norm_eps=norm_eps,
                        ffn_activation=ffn_activation)
    return Xf.reshape(N, r1, r2, H)


# ----------------------------------- main ------------------------------------

if __name__ == "__main__":
    num_layer = 2
    dim_hidden = 32
    num_head = 4
    dim_position = 8
    norm_eps = 1e-5
    ffn_dim_hidden = 64
    ffn_activation = "relu"
    N, r_attn = 2, 4                      # seqlen = r_attn * r_attn = 16

    key = jax.random.PRNGKey(0)
    kx, kp, kw = jax.random.split(key, 3)
    X = jax.random.normal(kx, (N, r_attn, r_attn, dim_hidden), jnp.float32)
    position = jax.random.normal(kp, (N, r_attn, r_attn, dim_position),
                                 jnp.float32)

    layer_keys = jax.random.split(kw, num_layer)
    layer_params = [init_layer_params(k, dim_hidden, dim_position,
                                      ffn_dim_hidden) for k in layer_keys]

    out = sp_encoder_mixer(X, position, layer_params, num_head=num_head,
                           norm_eps=norm_eps, ffn_activation=ffn_activation)
    out = jax.block_until_ready(out)

    ref = sp_encoder_mixer_ref(X, position, layer_params, num_head=num_head,
                               norm_eps=norm_eps,
                               ffn_activation=ffn_activation)
    assert out.shape == (N, r_attn, r_attn, dim_hidden)
    # Softmax normalization is now exact; residual error comes only from f32
    # associativity differences of the host-side pre-multiplied pos weights.
    err = float(jnp.max(jnp.abs(out - ref)))
    assert jnp.allclose(out, ref, atol=1e-3, rtol=1e-3), \
        f"mismatch vs JAX ref (max abs err {err})"
    print("KERNEL_OK")
</pallas_src>

<mosaic_0001>
module attributes {stable_mosaic.version = 11 : i64} {
  func.func @_mixer_kernel(%arg0: i32, %arg1: memref<2x16x32xf32, #tpu.memory_space<vmem>>, %arg2: memref<2x16x8xf32, #tpu.memory_space<vmem>>, %arg3: memref<2x32x192xf32, #tpu.memory_space<vmem>>, %arg4: memref<2x8x64xf32, #tpu.memory_space<vmem>>, %arg5: memref<2x64x32xf32, #tpu.memory_space<vmem>>, %arg6: memref<2x8x96xf32, #tpu.memory_space<vmem>>, %arg7: memref<2x16x32xf32, #tpu.memory_space<vmem>>) attributes {dimension_semantics = [#tpu.dimension_semantics<parallel>], iteration_bounds = array<i64: 1>, scalar_prefetch = 0 : i64, scratch_operands = 0 : i64, tpu.core_type = #tpu.core_type<tc>, window_params = [{transform_indices = @transform_0, window_bounds = array<i64: 2, 16, 32>}, {transform_indices = @transform_1, window_bounds = array<i64: 2, 16, 8>}, {pipeline_mode = #tpu.pipeline_mode<synchronous>, transform_indices = @transform_2, window_bounds = array<i64: 2, 32, 192>}, {pipeline_mode = #tpu.pipeline_mode<synchronous>, transform_indices = @transform_3, window_bounds = array<i64: 2, 8, 64>}, {pipeline_mode = #tpu.pipeline_mode<synchronous>, transform_indices = @transform_4, window_bounds = array<i64: 2, 64, 32>}, {pipeline_mode = #tpu.pipeline_mode<synchronous>, transform_indices = @transform_5, window_bounds = array<i64: 2, 8, 96>}, {transform_indices = @transform_6, window_bounds = array<i64: 2, 16, 32>}]} {
    %c0 = arith.constant 0 : index
    %c0_0 = arith.constant 0 : index
    %c0_1 = arith.constant 0 : index
    %0 = vector.load %arg1[%c0, %c0_0, %c0_1] : memref<2x16x32xf32, #tpu.memory_space<vmem>>, vector<2x16x32xf32>
    %1 = vector.shape_cast %0 : vector<2x16x32xf32> to vector<32x32xf32>
    %c0_2 = arith.constant 0 : index
    %c0_3 = arith.constant 0 : index
    %c0_4 = arith.constant 0 : index
    %2 = vector.load %arg2[%c0_2, %c0_3, %c0_4] : memref<2x16x8xf32, #tpu.memory_space<vmem>>, vector<2x16x8xf32>
    %3 = vector.shape_cast %2 : vector<2x16x8xf32> to vector<32x8xf32>
    %c0_i32 = arith.constant 0 : i32
    %4 = arith.index_cast %c0_i32 : i32 to index
    %c0_5 = arith.constant 0 : index
    %c0_6 = arith.constant 0 : index
    %5 = vector.load %arg3[%4, %c0_5, %c0_6] : memref<2x32x192xf32, #tpu.memory_space<vmem>>, vector<1x32x192xf32>
    %6 = vector.shape_cast %5 : vector<1x32x192xf32> to vector<32x192xf32>
    %7 = arith.index_cast %c0_i32 : i32 to index
    %c0_7 = arith.constant 0 : index
    %c0_8 = arith.constant 0 : index
    %8 = vector.load %arg4[%7, %c0_7, %c0_8] : memref<2x8x64xf32, #tpu.memory_space<vmem>>, vector<1x8x64xf32>
    %9 = vector.shape_cast %8 : vector<1x8x64xf32> to vector<8x64xf32>
    %10 = arith.index_cast %c0_i32 : i32 to index
    %c0_9 = arith.constant 0 : index
    %c0_10 = arith.constant 0 : index
    %11 = vector.load %arg5[%10, %c0_9, %c0_10] : memref<2x64x32xf32, #tpu.memory_space<vmem>>, vector<1x64x32xf32>
    %12 = vector.shape_cast %11 : vector<1x64x32xf32> to vector<64x32xf32>
    %13 = arith.index_cast %c0_i32 : i32 to index
    %c0_11 = arith.constant 0 : index
    %c0_12 = arith.constant 0 : index
    %14 = vector.load %arg6[%13, %c0_11, %c0_12] : memref<2x8x96xf32, #tpu.memory_space<vmem>>, vector<1x8x96xf32>
    %15 = vector.shape_cast %14 : vector<1x8x96xf32> to vector<8x96xf32>
    %16 = vector.extract_strided_slice %6 {offsets = [0, 0], sizes = [32, 96], strides = [1, 1]} : vector<32x192xf32> to vector<32x96xf32>
    %17 = vector.extract_strided_slice %6 {offsets = [0, 96], sizes = [32, 32], strides = [1, 1]} : vector<32x192xf32> to vector<32x32xf32>
    %18 = vector.extract_strided_slice %6 {offsets = [0, 128], sizes = [32, 64], strides = [1, 1]} : vector<32x192xf32> to vector<32x64xf32>
    %19 = vector.extract_strided_slice %15 {offsets = [0, 0], sizes = [1, 96], strides = [1, 1]} : vector<8x96xf32> to vector<1x96xf32>
    %20 = vector.extract_strided_slice %15 {offsets = [1, 0], sizes = [1, 32], strides = [1, 1]} : vector<8x96xf32> to vector<1x32xf32>
    %21 = vector.extract_strided_slice %15 {offsets = [2, 0], sizes = [1, 32], strides = [1, 1]} : vector<8x96xf32> to vector<1x32xf32>
    %22 = vector.extract_strided_slice %15 {offsets = [3, 0], sizes = [1, 32], strides = [1, 1]} : vector<8x96xf32> to vector<1x32xf32>
    %23 = vector.extract_strided_slice %15 {offsets = [4, 0], sizes = [1, 64], strides = [1, 1]} : vector<8x96xf32> to vector<1x64xf32>
    %24 = vector.extract_strided_slice %15 {offsets = [5, 0], sizes = [1, 32], strides = [1, 1]} : vector<8x96xf32> to vector<1x32xf32>
    %25 = vector.extract_strided_slice %15 {offsets = [6, 0], sizes = [1, 32], strides = [1, 1]} : vector<8x96xf32> to vector<1x32xf32>
    %26 = vector.extract_strided_slice %15 {offsets = [7, 0], sizes = [1, 32], strides = [1, 1]} : vector<8x96xf32> to vector<1x32xf32>
    %cst = arith.constant dense<0.000000e+00> : vector<32x96xf32>
    %27 = tpu.matmul %1, %16, %cst {dimension_numbers = #tpu.dot_dimension_numbers<[1], [0], [0], [1], [0, 0, 1, 1], [], []>} : vector<32x32xf32>, vector<32x96xf32>, vector<32x96xf32> -> vector<32x96xf32>
    %28 = vector.broadcast %19 : vector<1x96xf32> to vector<32x96xf32>
    %29 = arith.addf %27, %28 : vector<32x96xf32>
    %cst_13 = arith.constant dense<0.000000e+00> : vector<32x64xf32>
    %30 = tpu.matmul %3, %9, %cst_13 {dimension_numbers = #tpu.dot_dimension_numbers<[1], [0], [0], [1], [0, 0, 1, 1], [], []>} : vector<32x8xf32>, vector<8x64xf32>, vector<32x64xf32> -> vector<32x64xf32>
    %31 = vector.extract_strided_slice %29 {offsets = [0, 0], sizes = [32, 32], strides = [1, 1]} : vector<32x96xf32> to vector<32x32xf32>
    %32 = vector.extract_strided_slice %30 {offsets = [0, 0], sizes = [32, 32], strides = [1, 1]} : vector<32x64xf32> to vector<32x32xf32>
    %33 = arith.addf %31, %32 : vector<32x32xf32>
    %34 = vector.extract_strided_slice %29 {offsets = [0, 32], sizes = [32, 32], strides = [1, 1]} : vector<32x96xf32> to vector<32x32xf32>
    %35 = vector.extract_strided_slice %30 {offsets = [0, 32], sizes = [32, 32], strides = [1, 1]} : vector<32x64xf32> to vector<32x32xf32>
    %36 = arith.addf %34, %35 : vector<32x32xf32>
    %37 = vector.extract_strided_slice %29 {offsets = [0, 64], sizes = [32, 32], strides = [1, 1]} : vector<32x96xf32> to vector<32x32xf32>
    %38 = vector.shape_cast %33 : vector<32x32xf32> to vector<2x16x32xf32>
    %39 = vector.shape_cast %36 : vector<32x32xf32> to vector<2x16x32xf32>
    %40 = vector.shape_cast %37 : vector<32x32xf32> to vector<2x16x32xf32>
    %cst_14 = arith.constant 0.000000e+00 : f32
    %41 = vector.broadcast %cst_14 : f32 to vector<32x32xf32>
    %42 = vector.extract_strided_slice %38 {offsets = [0, 0, 0], sizes = [2, 16, 8], strides = [1, 1, 1]} : vector<2x16x32xf32> to vector<2x16x8xf32>
    %43 = vector.extract_strided_slice %39 {offsets = [0, 0, 0], sizes = [2, 16, 8], strides = [1, 1, 1]} : vector<2x16x32xf32> to vector<2x16x8xf32>
    "tpu.trace_start"() <{level = 10 : i32, message = "nqd,nkd->nqk"}> : () -> ()
    %cst_15 = arith.constant dense<0.000000e+00> : vector<2x16x16xf32>
    %44 = tpu.matmul %42, %43, %cst_15 {dimension_numbers = #tpu.dot_dimension_numbers<[2], [2], [1], [1], [0, 0, 0, 1, 1, 1], [0], [0]>} : vector<2x16x8xf32>, vector<2x16x8xf32>, vector<2x16x16xf32> -> vector<2x16x16xf32>
    "tpu.trace_stop"() : () -> ()
    %cst_16 = arith.constant 0.353553385 : f32
    %45 = vector.broadcast %cst_16 : f32 to vector<2x16x16xf32>
    %46 = arith.mulf %44, %45 : vector<2x16x16xf32>
    %cst_17 = arith.constant dense<0xFF800000> : vector<2x16xf32>
    %47 = vector.multi_reduction <maximumf>, %46, %cst_17 [2] : vector<2x16x16xf32> to vector<2x16xf32>
    %48 = vector.shape_cast %47 : vector<2x16xf32> to vector<2x16x1xf32>
    %49 = vector.broadcast %48 : vector<2x16x1xf32> to vector<2x16x16xf32>
    %50 = arith.subf %46, %49 : vector<2x16x16xf32>
    %51 = math.exp %50 : vector<2x16x16xf32>
    %cst_18 = arith.constant dense<0.000000e+00> : vector<2x16xf32>
    %52 = vector.multi_reduction <add>, %51, %cst_18 [2] : vector<2x16x16xf32> to vector<2x16xf32>
    %53 = vector.shape_cast %52 : vector<2x16xf32> to vector<2x16x1xf32>
    %54 = vector.broadcast %53 : vector<2x16x1xf32> to vector<2x16x16xf32>
    %55 = arith.divf %51, %54 : vector<2x16x16xf32>
    %56 = vector.extract_strided_slice %40 {offsets = [0, 0, 0], sizes = [2, 16, 8], strides = [1, 1, 1]} : vector<2x16x32xf32> to vector<2x16x8xf32>
    "tpu.trace_start"() <{level = 10 : i32, message = "nqk,nkd->nqd"}> : () -> ()
    %cst_19 = arith.constant dense<0.000000e+00> : vector<2x16x8xf32>
    %57 = tpu.matmul %55, %56, %cst_19 {dimension_numbers = #tpu.dot_dimension_numbers<[2], [1], [1], [2], [0, 0, 0, 1, 1, 2], [0], [0]>} : vector<2x16x16xf32>, vector<2x16x8xf32>, vector<2x16x8xf32> -> vector<2x16x8xf32>
    "tpu.trace_stop"() : () -> ()
    %58 = vector.shape_cast %57 : vector<2x16x8xf32> to vector<32x8xf32>
    %59 = vector.extract_strided_slice %17 {offsets = [0, 0], sizes = [8, 32], strides = [1, 1]} : vector<32x32xf32> to vector<8x32xf32>
    %cst_20 = arith.constant dense<0.000000e+00> : vector<32x32xf32>
    %60 = tpu.matmul %58, %59, %cst_20 {dimension_numbers = #tpu.dot_dimension_numbers<[1], [0], [0], [1], [0, 0, 1, 1], [], []>} : vector<32x8xf32>, vector<8x32xf32>, vector<32x32xf32> -> vector<32x32xf32>
    %61 = arith.addf %41, %60 : vector<32x32xf32>
    %62 = vector.extract_strided_slice %38 {offsets = [0, 0, 8], sizes = [2, 16, 8], strides = [1, 1, 1]} : vector<2x16x32xf32> to vector<2x16x8xf32>
    %63 = vector.extract_strided_slice %39 {offsets = [0, 0, 8], sizes = [2, 16, 8], strides = [1, 1, 1]} : vector<2x16x32xf32> to vector<2x16x8xf32>
    "tpu.trace_start"() <{level = 10 : i32, message = "nqd,nkd->nqk"}> : () -> ()
    %cst_21 = arith.constant dense<0.000000e+00> : vector<2x16x16xf32>
    %64 = tpu.matmul %62, %63, %cst_21 {dimension_numbers = #tpu.dot_dimension_numbers<[2], [2], [1], [1], [0, 0, 0, 1, 1, 1], [0], [0]>} : vector<2x16x8xf32>, vector<2x16x8xf32>, vector<2x16x16xf32> -> vector<2x16x16xf32>
    "tpu.trace_stop"() : () -> ()
    %cst_22 = arith.constant 0.353553385 : f32
    %65 = vector.broadcast %cst_22 : f32 to vector<2x16x16xf32>
    %66 = arith.mulf %64, %65 : vector<2x16x16xf32>
    %cst_23 = arith.constant dense<0xFF800000> : vector<2x16xf32>
    %67 = vector.multi_reduction <maximumf>, %66, %cst_23 [2] : vector<2x16x16xf32> to vector<2x16xf32>
    %68 = vector.shape_cast %67 : vector<2x16xf32> to vector<2x16x1xf32>
    %69 = vector.broadcast %68 : vector<2x16x1xf32> to vector<2x16x16xf32>
    %70 = arith.subf %66, %69 : vector<2x16x16xf32>
    %71 = math.exp %70 : vector<2x16x16xf32>
    %cst_24 = arith.constant dense<0.000000e+00> : vector<2x16xf32>
    %72 = vector.multi_reduction <add>, %71, %cst_24 [2] : vector<2x16x16xf32> to vector<2x16xf32>
    %73 = vector.shape_cast %72 : vector<2x16xf32> to vector<2x16x1xf32>
    %74 = vector.broadcast %73 : vector<2x16x1xf32> to vector<2x16x16xf32>
    %75 = arith.divf %71, %74 : vector<2x16x16xf32>
    %76 = vector.extract_strided_slice %40 {offsets = [0, 0, 8], sizes = [2, 16, 8], strides = [1, 1, 1]} : vector<2x16x32xf32> to vector<2x16x8xf32>
    "tpu.trace_start"() <{level = 10 : i32, message = "nqk,nkd->nqd"}> : () -> ()
    %cst_25 = arith.constant dense<0.000000e+00> : vector<2x16x8xf32>
    %77 = tpu.matmul %75, %76, %cst_25 {dimension_numbers = #tpu.dot_dimension_numbers<[2], [1], [1], [2], [0, 0, 0, 1, 1, 2], [0], [0]>} : vector<2x16x16xf32>, vector<2x16x8xf32>, vector<2x16x8xf32> -> vector<2x16x8xf32>
    "tpu.trace_stop"() : () -> ()
    %78 = vector.shape_cast %77 : vector<2x16x8xf32> to vector<32x8xf32>
    %79 = vector.extract_strided_slice %17 {offsets = [8, 0], sizes = [8, 32], strides = [1, 1]} : vector<32x32xf32> to vector<8x32xf32>
    %cst_26 = arith.constant dense<0.000000e+00> : vector<32x32xf32>
    %80 = tpu.matmul %78, %79, %cst_26 {dimension_numbers = #tpu.dot_dimension_numbers<[1], [0], [0], [1], [0, 0, 1, 1], [], []>} : vector<32x8xf32>, vector<8x32xf32>, vector<32x32xf32> -> vector<32x32xf32>
    %81 = arith.addf %61, %80 : vector<32x32xf32>
    %82 = vector.extract_strided_slice %38 {offsets = [0, 0, 16], sizes = [2, 16, 8], strides = [1, 1, 1]} : vector<2x16x32xf32> to vector<2x16x8xf32>
    %83 = vector.extract_strided_slice %39 {offsets = [0, 0, 16], sizes = [2, 16, 8], strides = [1, 1, 1]} : vector<2x16x32xf32> to vector<2x16x8xf32>
    "tpu.trace_start"() <{level = 10 : i32, message = "nqd,nkd->nqk"}> : () -> ()
    %cst_27 = arith.constant dense<0.000000e+00> : vector<2x16x16xf32>
    %84 = tpu.matmul %82, %83, %cst_27 {dimension_numbers = #tpu.dot_dimension_numbers<[2], [2], [1], [1], [0, 0, 0, 1, 1, 1], [0], [0]>} : vector<2x16x8xf32>, vector<2x16x8xf32>, vector<2x16x16xf32> -> vector<2x16x16xf32>
    "tpu.trace_stop"() : () -> ()
    %cst_28 = arith.constant 0.353553385 : f32
    %85 = vector.broadcast %cst_28 : f32 to vector<2x16x16xf32>
    %86 = arith.mulf %84, %85 : vector<2x16x16xf32>
    %cst_29 = arith.constant dense<0xFF800000> : vector<2x16xf32>
    %87 = vector.multi_reduction <maximumf>, %86, %cst_29 [2] : vector<2x16x16xf32> to vector<2x16xf32>
    %88 = vector.shape_cast %87 : vector<2x16xf32> to vector<2x16x1xf32>
    %89 = vector.broadcast %88 : vector<2x16x1xf32> to vector<2x16x16xf32>
    %90 = arith.subf %86, %89 : vector<2x16x16xf32>
    %91 = math.exp %90 : vector<2x16x16xf32>
    %cst_30 = arith.constant dense<0.000000e+00> : vector<2x16xf32>
    %92 = vector.multi_reduction <add>, %91, %cst_30 [2] : vector<2x16x16xf32> to vector<2x16xf32>
    %93 = vector.shape_cast %92 : vector<2x16xf32> to vector<2x16x1xf32>
    %94 = vector.broadcast %93 : vector<2x16x1xf32> to vector<2x16x16xf32>
    %95 = arith.divf %91, %94 : vector<2x16x16xf32>
    %96 = vector.extract_strided_slice %40 {offsets = [0, 0, 16], sizes = [2, 16, 8], strides = [1, 1, 1]} : vector<2x16x32xf32> to vector<2x16x8xf32>
    "tpu.trace_start"() <{level = 10 : i32, message = "nqk,nkd->nqd"}> : () -> ()
    %cst_31 = arith.constant dense<0.000000e+00> : vector<2x16x8xf32>
    %97 = tpu.matmul %95, %96, %cst_31 {dimension_numbers = #tpu.dot_dimension_numbers<[2], [1], [1], [2], [0, 0, 0, 1, 1, 2], [0], [0]>} : vector<2x16x16xf32>, vector<2x16x8xf32>, vector<2x16x8xf32> -> vector<2x16x8xf32>
    "tpu.trace_stop"() : () -> ()
    %98 = vector.shape_cast %97 : vector<2x16x8xf32> to vector<32x8xf32>
    %99 = vector.extract_strided_slice %17 {offsets = [16, 0], sizes = [8, 32], strides = [1, 1]} : vector<32x32xf32> to vector<8x32xf32>
    %cst_32 = arith.constant dense<0.000000e+00> : vector<32x32xf32>
    %100 = tpu.matmul %98, %99, %cst_32 {dimension_numbers = #tpu.dot_dimension_numbers<[1], [0], [0], [1], [0, 0, 1, 1], [], []>} : vector<32x8xf32>, vector<8x32xf32>, vector<32x32xf32> -> vector<32x32xf32>
    %101 = arith.addf %81, %100 : vector<32x32xf32>
    %102 = vector.extract_strided_slice %38 {offsets = [0, 0, 24], sizes = [2, 16, 8], strides = [1, 1, 1]} : vector<2x16x32xf32> to vector<2x16x8xf32>
    %103 = vector.extract_strided_slice %39 {offsets = [0, 0, 24], sizes = [2, 16, 8], strides = [1, 1, 1]} : vector<2x16x32xf32> to vector<2x16x8xf32>
    "tpu.trace_start"() <{level = 10 : i32, message = "nqd,nkd->nqk"}> : () -> ()
    %cst_33 = arith.constant dense<0.000000e+00> : vector<2x16x16xf32>
    %104 = tpu.matmul %102, %103, %cst_33 {dimension_numbers = #tpu.dot_dimension_numbers<[2], [2], [1], [1], [0, 0, 0, 1, 1, 1], [0], [0]>} : vector<2x16x8xf32>, vector<2x16x8xf32>, vector<2x16x16xf32> -> vector<2x16x16xf32>
    "tpu.trace_stop"() : () -> ()
    %cst_34 = arith.constant 0.353553385 : f32
    %105 = vector.broadcast %cst_34 : f32 to vector<2x16x16xf32>
    %106 = arith.mulf %104, %105 : vector<2x16x16xf32>
    %cst_35 = arith.constant dense<0xFF800000> : vector<2x16xf32>
    %107 = vector.multi_reduction <maximumf>, %106, %cst_35 [2] : vector<2x16x16xf32> to vector<2x16xf32>
    %108 = vector.shape_cast %107 : vector<2x16xf32> to vector<2x16x1xf32>
    %109 = vector.broadcast %108 : vector<2x16x1xf32> to vector<2x16x16xf32>
    %110 = arith.subf %106, %109 : vector<2x16x16xf32>
    %111 = math.exp %110 : vector<2x16x16xf32>
    %cst_36 = arith.constant dense<0.000000e+00> : vector<2x16xf32>
    %112 = vector.multi_reduction <add>, %111, %cst_36 [2] : vector<2x16x16xf32> to vector<2x16xf32>
    %113 = vector.shape_cast %112 : vector<2x16xf32> to vector<2x16x1xf32>
    %114 = vector.broadcast %113 : vector<2x16x1xf32> to vector<2x16x16xf32>
    %115 = arith.divf %111, %114 : vector<2x16x16xf32>
    %116 = vector.extract_strided_slice %40 {offsets = [0, 0, 24], sizes = [2, 16, 8], strides = [1, 1, 1]} : vector<2x16x32xf32> to vector<2x16x8xf32>
    "tpu.trace_start"() <{level = 10 : i32, message = "nqk,nkd->nqd"}> : () -> ()
    %cst_37 = arith.constant dense<0.000000e+00> : vector<2x16x8xf32>
    %117 = tpu.matmul %115, %116, %cst_37 {dimension_numbers = #tpu.dot_dimension_numbers<[2], [1], [1], [2], [0, 0, 0, 1, 1, 2], [0], [0]>} : vector<2x16x16xf32>, vector<2x16x8xf32>, vector<2x16x8xf32> -> vector<2x16x8xf32>
    "tpu.trace_stop"() : () -> ()
    %118 = vector.shape_cast %117 : vector<2x16x8xf32> to vector<32x8xf32>
    %119 = vector.extract_strided_slice %17 {offsets = [24, 0], sizes = [8, 32], strides = [1, 1]} : vector<32x32xf32> to vector<8x32xf32>
    %cst_38 = arith.constant dense<0.000000e+00> : vector<32x32xf32>
    %120 = tpu.matmul %118, %119, %cst_38 {dimension_numbers = #tpu.dot_dimension_numbers<[1], [0], [0], [1], [0, 0, 1, 1], [], []>} : vector<32x8xf32>, vector<8x32xf32>, vector<32x32xf32> -> vector<32x32xf32>
    %121 = arith.addf %101, %120 : vector<32x32xf32>
    %122 = vector.broadcast %20 : vector<1x32xf32> to vector<32x32xf32>
    %123 = arith.addf %121, %122 : vector<32x32xf32>
    %124 = arith.addf %1, %123 : vector<32x32xf32>
    %cst_39 = arith.constant dense<0.000000e+00> : vector<32xf32>
    %125 = vector.multi_reduction <add>, %124, %cst_39 [1] : vector<32x32xf32> to vector<32xf32>
    %126 = vector.shape_cast %125 : vector<32xf32> to vector<32x1xf32>
    %cst_40 = arith.constant 3.200000e+01 : f32
    %127 = vector.broadcast %cst_40 : f32 to vector<32x1xf32>
    %128 = arith.divf %126, %127 : vector<32x1xf32>
    %129 = vector.broadcast %128 : vector<32x1xf32> to vector<32x32xf32>
    %130 = arith.subf %124, %129 : vector<32x32xf32>
    %131 = arith.mulf %130, %130 : vector<32x32xf32>
    %cst_41 = arith.constant dense<0.000000e+00> : vector<32xf32>
    %132 = vector.multi_reduction <add>, %131, %cst_41 [1] : vector<32x32xf32> to vector<32xf32>
    %133 = vector.shape_cast %132 : vector<32xf32> to vector<32x1xf32>
    %cst_42 = arith.constant 3.200000e+01 : f32
    %134 = vector.broadcast %cst_42 : f32 to vector<32x1xf32>
    %135 = arith.divf %133, %134 : vector<32x1xf32>
    %136 = vector.broadcast %128 : vector<32x1xf32> to vector<32x32xf32>
    %137 = arith.subf %124, %136 : vector<32x32xf32>
    %cst_43 = arith.constant 9.99999974E-6 : f32
    %138 = vector.broadcast %cst_43 : f32 to vector<32x1xf32>
    %139 = arith.addf %135, %138 : vector<32x1xf32>
    %140 = math.rsqrt %139 : vector<32x1xf32>
    %141 = vector.broadcast %140 : vector<32x1xf32> to vector<32x32xf32>
    %142 = arith.mulf %137, %141 : vector<32x32xf32>
    %143 = vector.broadcast %21 : vector<1x32xf32> to vector<32x32xf32>
    %144 = arith.mulf %142, %143 : vector<32x32xf32>
    %145 = vector.broadcast %22 : vector<1x32xf32> to vector<32x32xf32>
    %146 = arith.addf %144, %145 : vector<32x32xf32>
    %cst_44 = arith.constant dense<0.000000e+00> : vector<32x64xf32>
    %147 = tpu.matmul %146, %18, %cst_44 {dimension_numbers = #tpu.dot_dimension_numbers<[1], [0], [0], [1], [0, 0, 1, 1], [], []>} : vector<32x32xf32>, vector<32x64xf32>, vector<32x64xf32> -> vector<32x64xf32>
    %148 = vector.broadcast %23 : vector<1x64xf32> to vector<32x64xf32>
    %149 = arith.addf %147, %148 : vector<32x64xf32>
    %cst_45 = arith.constant 0.000000e+00 : f32
    %150 = vector.broadcast %cst_45 : f32 to vector<32x64xf32>
    %151 = arith.maximumf %149, %150 : vector<32x64xf32>
    %cst_46 = arith.constant dense<0.000000e+00> : vector<32x32xf32>
    %152 = tpu.matmul %151, %12, %cst_46 {dimension_numbers = #tpu.dot_dimension_numbers<[1], [0], [0], [1], [0, 0, 1, 1], [], []>} : vector<32x64xf32>, vector<64x32xf32>, vector<32x32xf32> -> vector<32x32xf32>
    %153 = vector.broadcast %24 : vector<1x32xf32> to vector<32x32xf32>
    %154 = arith.addf %152, %153 : vector<32x32xf32>
    %155 = arith.addf %146, %154 : vector<32x32xf32>
    %cst_47 = arith.constant dense<0.000000e+00> : vector<32xf32>
    %156 = vector.multi_reduction <add>, %155, %cst_47 [1] : vector<32x32xf32> to vector<32xf32>
    %157 = vector.shape_cast %156 : vector<32xf32> to vector<32x1xf32>
    %cst_48 = arith.constant 3.200000e+01 : f32
    %158 = vector.broadcast %cst_48 : f32 to vector<32x1xf32>
    %159 = arith.divf %157, %158 : vector<32x1xf32>
    %160 = vector.broadcast %159 : vector<32x1xf32> to vector<32x32xf32>
    %161 = arith.subf %155, %160 : vector<32x32xf32>
    %162 = arith.mulf %161, %161 : vector<32x32xf32>
    %cst_49 = arith.constant dense<0.000000e+00> : vector<32xf32>
    %163 = vector.multi_reduction <add>, %162, %cst_49 [1] : vector<32x32xf32> to vector<32xf32>
    %164 = vector.shape_cast %163 : vector<32xf32> to vector<32x1xf32>
    %cst_50 = arith.constant 3.200000e+01 : f32
    %165 = vector.broadcast %cst_50 : f32 to vector<32x1xf32>
    %166 = arith.divf %164, %165 : vector<32x1xf32>
    %167 = vector.broadcast %159 : vector<32x1xf32> to vector<32x32xf32>
    %168 = arith.subf %155, %167 : vector<32x32xf32>
    %cst_51 = arith.constant 9.99999974E-6 : f32
    %169 = vector.broadcast %cst_51 : f32 to vector<32x1xf32>
    %170 = arith.addf %166, %169 : vector<32x1xf32>
    %171 = math.rsqrt %170 : vector<32x1xf32>
    %172 = vector.broadcast %171 : vector<32x1xf32> to vector<32x32xf32>
    %173 = arith.mulf %168, %172 : vector<32x32xf32>
    %174 = vector.broadcast %25 : vector<1x32xf32> to vector<32x32xf32>
    %175 = arith.mulf %173, %174 : vector<32x32xf32>
    %176 = vector.broadcast %26 : vector<1x32xf32> to vector<32x32xf32>
    %177 = arith.addf %175, %176 : vector<32x32xf32>
    %c1_i32 = arith.constant 1 : i32
    %178 = arith.index_cast %c1_i32 : i32 to index
    %c0_52 = arith.constant 0 : index
    %c0_53 = arith.constant 0 : index
    %179 = vector.load %arg3[%178, %c0_52, %c0_53] : memref<2x32x192xf32, #tpu.memory_space<vmem>>, vector<1x32x192xf32>
    %180 = vector.shape_cast %179 : vector<1x32x192xf32> to vector<32x192xf32>
    %181 = arith.index_cast %c1_i32 : i32 to index
    %c0_54 = arith.constant 0 : index
    %c0_55 = arith.constant 0 : index
    %182 = vector.load %arg4[%181, %c0_54, %c0_55] : memref<2x8x64xf32, #tpu.memory_space<vmem>>, vector<1x8x64xf32>
    %183 = vector.shape_cast %182 : vector<1x8x64xf32> to vector<8x64xf32>
    %184 = arith.index_cast %c1_i32 : i32 to index
    %c0_56 = arith.constant 0 : index
    %c0_57 = arith.constant 0 : index
    %185 = vector.load %arg5[%184, %c0_56, %c0_57] : memref<2x64x32xf32, #tpu.memory_space<vmem>>, vector<1x64x32xf32>
    %186 = vector.shape_cast %185 : vector<1x64x32xf32> to vector<64x32xf32>
    %187 = arith.index_cast %c1_i32 : i32 to index
    %c0_58 = arith.constant 0 : index
    %c0_59 = arith.constant 0 : index
    %188 = vector.load %arg6[%187, %c0_58, %c0_59] : memref<2x8x96xf32, #tpu.memory_space<vmem>>, vector<1x8x96xf32>
    %189 = vector.shape_cast %188 : vector<1x8x96xf32> to vector<8x96xf32>
    %190 = vector.extract_strided_slice %180 {offsets = [0, 0], sizes = [32, 96], strides = [1, 1]} : vector<32x192xf32> to vector<32x96xf32>
    %191 = vector.extract_strided_slice %180 {offsets = [0, 96], sizes = [32, 32], strides = [1, 1]} : vector<32x192xf32> to vector<32x32xf32>
    %192 = vector.extract_strided_slice %180 {offsets = [0, 128], sizes = [32, 64], strides = [1, 1]} : vector<32x192xf32> to vector<32x64xf32>
    %193 = vector.extract_strided_slice %189 {offsets = [0, 0], sizes = [1, 96], strides = [1, 1]} : vector<8x96xf32> to vector<1x96xf32>
    %194 = vector.extract_strided_slice %189 {offsets = [1, 0], sizes = [1, 32], strides = [1, 1]} : vector<8x96xf32> to vector<1x32xf32>
    %195 = vector.extract_strided_slice %189 {offsets = [2, 0], sizes = [1, 32], strides = [1, 1]} : vector<8x96xf32> to vector<1x32xf32>
    %196 = vector.extract_strided_slice %189 {offsets = [3, 0], sizes = [1, 32], strides = [1, 1]} : vector<8x96xf32> to vector<1x32xf32>
    %197 = vector.extract_strided_slice %189 {offsets = [4, 0], sizes = [1, 64], strides = [1, 1]} : vector<8x96xf32> to vector<1x64xf32>
    %198 = vector.extract_strided_slice %189 {offsets = [5, 0], sizes = [1, 32], strides = [1, 1]} : vector<8x96xf32> to vector<1x32xf32>
    %199 = vector.extract_strided_slice %189 {offsets = [6, 0], sizes = [1, 32], strides = [1, 1]} : vector<8x96xf32> to vector<1x32xf32>
    %200 = vector.extract_strided_slice %189 {offsets = [7, 0], sizes = [1, 32], strides = [1, 1]} : vector<8x96xf32> to vector<1x32xf32>
    %cst_60 = arith.constant dense<0.000000e+00> : vector<32x96xf32>
    %201 = tpu.matmul %177, %190, %cst_60 {dimension_numbers = #tpu.dot_dimension_numbers<[1], [0], [0], [1], [0, 0, 1, 1], [], []>} : vector<32x32xf32>, vector<32x96xf32>, vector<32x96xf32> -> vector<32x96xf32>
    %202 = vector.broadcast %193 : vector<1x96xf32> to vector<32x96xf32>
    %203 = arith.addf %201, %202 : vector<32x96xf32>
    %cst_61 = arith.constant dense<0.000000e+00> : vector<32x64xf32>
    %204 = tpu.matmul %3, %183, %cst_61 {dimension_numbers = #tpu.dot_dimension_numbers<[1], [0], [0], [1], [0, 0, 1, 1], [], []>} : vector<32x8xf32>, vector<8x64xf32>, vector<32x64xf32> -> vector<32x64xf32>
    %205 = vector.extract_strided_slice %203 {offsets = [0, 0], sizes = [32, 32], strides = [1, 1]} : vector<32x96xf32> to vector<32x32xf32>
    %206 = vector.extract_strided_slice %204 {offsets = [0, 0], sizes = [32, 32], strides = [1, 1]} : vector<32x64xf32> to vector<32x32xf32>
    %207 = arith.addf %205, %206 : vector<32x32xf32>
    %208 = vector.extract_strided_slice %203 {offsets = [0, 32], sizes = [32, 32], strides = [1, 1]} : vector<32x96xf32> to vector<32x32xf32>
    %209 = vector.extract_strided_slice %204 {offsets = [0, 32], sizes = [32, 32], strides = [1, 1]} : vector<32x64xf32> to vector<32x32xf32>
    %210 = arith.addf %208, %209 : vector<32x32xf32>
    %211 = vector.extract_strided_slice %203 {offsets = [0, 64], sizes = [32, 32], strides = [1, 1]} : vector<32x96xf32> to vector<32x32xf32>
    %212 = vector.shape_cast %207 : vector<32x32xf32> to vector<2x16x32xf32>
    %213 = vector.shape_cast %210 : vector<32x32xf32> to vector<2x16x32xf32>
    %214 = vector.shape_cast %211 : vector<32x32xf32> to vector<2x16x32xf32>
    %cst_62 = arith.constant 0.000000e+00 : f32
    %215 = vector.broadcast %cst_62 : f32 to vector<32x32xf32>
    %216 = vector.extract_strided_slice %212 {offsets = [0, 0, 0], sizes = [2, 16, 8], strides = [1, 1, 1]} : vector<2x16x32xf32> to vector<2x16x8xf32>
    %217 = vector.extract_strided_slice %213 {offsets = [0, 0, 0], sizes = [2, 16, 8], strides = [1, 1, 1]} : vector<2x16x32xf32> to vector<2x16x8xf32>
    "tpu.trace_start"() <{level = 10 : i32, message = "nqd,nkd->nqk"}> : () -> ()
    %cst_63 = arith.constant dense<0.000000e+00> : vector<2x16x16xf32>
    %218 = tpu.matmul %216, %217, %cst_63 {dimension_numbers = #tpu.dot_dimension_numbers<[2], [2], [1], [1], [0, 0, 0, 1, 1, 1], [0], [0]>} : vector<2x16x8xf32>, vector<2x16x8xf32>, vector<2x16x16xf32> -> vector<2x16x16xf32>
    "tpu.trace_stop"() : () -> ()
    %cst_64 = arith.constant 0.353553385 : f32
    %219 = vector.broadcast %cst_64 : f32 to vector<2x16x16xf32>
    %220 = arith.mulf %218, %219 : vector<2x16x16xf32>
    %cst_65 = arith.constant dense<0xFF800000> : vector<2x16xf32>
    %221 = vector.multi_reduction <maximumf>, %220, %cst_65 [2] : vector<2x16x16xf32> to vector<2x16xf32>
    %222 = vector.shape_cast %221 : vector<2x16xf32> to vector<2x16x1xf32>
    %223 = vector.broadcast %222 : vector<2x16x1xf32> to vector<2x16x16xf32>
    %224 = arith.subf %220, %223 : vector<2x16x16xf32>
    %225 = math.exp %224 : vector<2x16x16xf32>
    %cst_66 = arith.constant dense<0.000000e+00> : vector<2x16xf32>
    %226 = vector.multi_reduction <add>, %225, %cst_66 [2] : vector<2x16x16xf32> to vector<2x16xf32>
    %227 = vector.shape_cast %226 : vector<2x16xf32> to vector<2x16x1xf32>
    %228 = vector.broadcast %227 : vector<2x16x1xf32> to vector<2x16x16xf32>
    %229 = arith.divf %225, %228 : vector<2x16x16xf32>
    %230 = vector.extract_strided_slice %214 {offsets = [0, 0, 0], sizes = [2, 16, 8], strides = [1, 1, 1]} : vector<2x16x32xf32> to vector<2x16x8xf32>
    "tpu.trace_start"() <{level = 10 : i32, message = "nqk,nkd->nqd"}> : () -> ()
    %cst_67 = arith.constant dense<0.000000e+00> : vector<2x16x8xf32>
    %231 = tpu.matmul %229, %230, %cst_67 {dimension_numbers = #tpu.dot_dimension_numbers<[2], [1], [1], [2], [0, 0, 0, 1, 1, 2], [0], [0]>} : vector<2x16x16xf32>, vector<2x16x8xf32>, vector<2x16x8xf32> -> vector<2x16x8xf32>
    "tpu.trace_stop"() : () -> ()
    %232 = vector.shape_cast %231 : vector<2x16x8xf32> to vector<32x8xf32>
    %233 = vector.extract_strided_slice %191 {offsets = [0, 0], sizes = [8, 32], strides = [1, 1]} : vector<32x32xf32> to vector<8x32xf32>
    %cst_68 = arith.constant dense<0.000000e+00> : vector<32x32xf32>
    %234 = tpu.matmul %232, %233, %cst_68 {dimension_numbers = #tpu.dot_dimension_numbers<[1], [0], [0], [1], [0, 0, 1, 1], [], []>} : vector<32x8xf32>, vector<8x32xf32>, vector<32x32xf32> -> vector<32x32xf32>
    %235 = arith.addf %215, %234 : vector<32x32xf32>
    %236 = vector.extract_strided_slice %212 {offsets = [0, 0, 8], sizes = [2, 16, 8], strides = [1, 1, 1]} : vector<2x16x32xf32> to vector<2x16x8xf32>
    %237 = vector.extract_strided_slice %213 {offsets = [0, 0, 8], sizes = [2, 16, 8], strides = [1, 1, 1]} : vector<2x16x32xf32> to vector<2x16x8xf32>
    "tpu.trace_start"() <{level = 10 : i32, message = "nqd,nkd->nqk"}> : () -> ()
    %cst_69 = arith.constant dense<0.000000e+00> : vector<2x16x16xf32>
    %238 = tpu.matmul %236, %237, %cst_69 {dimension_numbers = #tpu.dot_dimension_numbers<[2], [2], [1], [1], [0, 0, 0, 1, 1, 1], [0], [0]>} : vector<2x16x8xf32>, vector<2x16x8xf32>, vector<2x16x16xf32> -> vector<2x16x16xf32>
    "tpu.trace_stop"() : () -> ()
    %cst_70 = arith.constant 0.353553385 : f32
    %239 = vector.broadcast %cst_70 : f32 to vector<2x16x16xf32>
    %240 = arith.mulf %238, %239 : vector<2x16x16xf32>
    %cst_71 = arith.constant dense<0xFF800000> : vector<2x16xf32>
    %241 = vector.multi_reduction <maximumf>, %240, %cst_71 [2] : vector<2x16x16xf32> to vector<2x16xf32>
    %242 = vector.shape_cast %241 : vector<2x16xf32> to vector<2x16x1xf32>
    %243 = vector.broadcast %242 : vector<2x16x1xf32> to vector<2x16x16xf32>
    %244 = arith.subf %240, %243 : vector<2x16x16xf32>
    %245 = math.exp %244 : vector<2x16x16xf32>
    %cst_72 = arith.constant dense<0.000000e+00> : vector<2x16xf32>
    %246 = vector.multi_reduction <add>, %245, %cst_72 [2] : vector<2x16x16xf32> to vector<2x16xf32>
    %247 = vector.shape_cast %246 : vector<2x16xf32> to vector<2x16x1xf32>
    %248 = vector.broadcast %247 : vector<2x16x1xf32> to vector<2x16x16xf32>
    %249 = arith.divf %245, %248 : vector<2x16x16xf32>
    %250 = vector.extract_strided_slice %214 {offsets = [0, 0, 8], sizes = [2, 16, 8], strides = [1, 1, 1]} : vector<2x16x32xf32> to vector<2x16x8xf32>
    "tpu.trace_start"() <{level = 10 : i32, message = "nqk,nkd->nqd"}> : () -> ()
    %cst_73 = arith.constant dense<0.000000e+00> : vector<2x16x8xf32>
    %251 = tpu.matmul %249, %250, %cst_73 {dimension_numbers = #tpu.dot_dimension_numbers<[2], [1], [1], [2], [0, 0, 0, 1, 1, 2], [0], [0]>} : vector<2x16x16xf32>, vector<2x16x8xf32>, vector<2x16x8xf32> -> vector<2x16x8xf32>
    "tpu.trace_stop"() : () -> ()
    %252 = vector.shape_cast %251 : vector<2x16x8xf32> to vector<32x8xf32>
    %253 = vector.extract_strided_slice %191 {offsets = [8, 0], sizes = [8, 32], strides = [1, 1]} : vector<32x32xf32> to vector<8x32xf32>
    %cst_74 = arith.constant dense<0.000000e+00> : vector<32x32xf32>
    %254 = tpu.matmul %252, %253, %cst_74 {dimension_numbers = #tpu.dot_dimension_numbers<[1], [0], [0], [1], [0, 0, 1, 1], [], []>} : vector<32x8xf32>, vector<8x32xf32>, vector<32x32xf32> -> vector<32x32xf32>
    %255 = arith.addf %235, %254 : vector<32x32xf32>
    %256 = vector.extract_strided_slice %212 {offsets = [0, 0, 16], sizes = [2, 16, 8], strides = [1, 1, 1]} : vector<2x16x32xf32> to vector<2x16x8xf32>
    %257 = vector.extract_strided_slice %213 {offsets = [0, 0, 16], sizes = [2, 16, 8], strides = [1, 1, 1]} : vector<2x16x32xf32> to vector<2x16x8xf32>
    "tpu.trace_start"() <{level = 10 : i32, message = "nqd,nkd->nqk"}> : () -> ()
    %cst_75 = arith.constant dense<0.000000e+00> : vector<2x16x16xf32>
    %258 = tpu.matmul %256, %257, %cst_75 {dimension_numbers = #tpu.dot_dimension_numbers<[2], [2], [1], [1], [0, 0, 0, 1, 1, 1], [0], [0]>} : vector<2x16x8xf32>, vector<2x16x8xf32>, vector<2x16x16xf32> -> vector<2x16x16xf32>
    "tpu.trace_stop"() : () -> ()
    %cst_76 = arith.constant 0.353553385 : f32
    %259 = vector.broadcast %cst_76 : f32 to vector<2x16x16xf32>
    %260 = arith.mulf %258, %259 : vector<2x16x16xf32>
    %cst_77 = arith.constant dense<0xFF800000> : vector<2x16xf32>
    %261 = vector.multi_reduction <maximumf>, %260, %cst_77 [2] : vector<2x16x16xf32> to vector<2x16xf32>
    %262 = vector.shape_cast %261 : vector<2x16xf32> to vector<2x16x1xf32>
    %263 = vector.broadcast %262 : vector<2x16x1xf32> to vector<2x16x16xf32>
    %264 = arith.subf %260, %263 : vector<2x16x16xf32>
    %265 = math.exp %264 : vector<2x16x16xf32>
    %cst_78 = arith.constant dense<0.000000e+00> : vector<2x16xf32>
    %266 = vector.multi_reduction <add>, %265, %cst_78 [2] : vector<2x16x16xf32> to vector<2x16xf32>
    %267 = vector.shape_cast %266 : vector<2x16xf32> to vector<2x16x1xf32>
    %268 = vector.broadcast %267 : vector<2x16x1xf32> to vector<2x16x16xf32>
    %269 = arith.divf %265, %268 : vector<2x16x16xf32>
    %270 = vector.extract_strided_slice %214 {offsets = [0, 0, 16], sizes = [2, 16, 8], strides = [1, 1, 1]} : vector<2x16x32xf32> to vector<2x16x8xf32>
    "tpu.trace_start"() <{level = 10 : i32, message = "nqk,nkd->nqd"}> : () -> ()
    %cst_79 = arith.constant dense<0.000000e+00> : vector<2x16x8xf32>
    %271 = tpu.matmul %269, %270, %cst_79 {dimension_numbers = #tpu.dot_dimension_numbers<[2], [1], [1], [2], [0, 0, 0, 1, 1, 2], [0], [0]>} : vector<2x16x16xf32>, vector<2x16x8xf32>, vector<2x16x8xf32> -> vector<2x16x8xf32>
    "tpu.trace_stop"() : () -> ()
    %272 = vector.shape_cast %271 : vector<2x16x8xf32> to vector<32x8xf32>
    %273 = vector.extract_strided_slice %191 {offsets = [16, 0], sizes = [8, 32], strides = [1, 1]} : vector<32x32xf32> to vector<8x32xf32>
    %cst_80 = arith.constant dense<0.000000e+00> : vector<32x32xf32>
    %274 = tpu.matmul %272, %273, %cst_80 {dimension_numbers = #tpu.dot_dimension_numbers<[1], [0], [0], [1], [0, 0, 1, 1], [], []>} : vector<32x8xf32>, vector<8x32xf32>, vector<32x32xf32> -> vector<32x32xf32>
    %275 = arith.addf %255, %274 : vector<32x32xf32>
    %276 = vector.extract_strided_slice %212 {offsets = [0, 0, 24], sizes = [2, 16, 8], strides = [1, 1, 1]} : vector<2x16x32xf32> to vector<2x16x8xf32>
    %277 = vector.extract_strided_slice %213 {offsets = [0, 0, 24], sizes = [2, 16, 8], strides = [1, 1, 1]} : vector<2x16x32xf32> to vector<2x16x8xf32>
    "tpu.trace_start"() <{level = 10 : i32, message = "nqd,nkd->nqk"}> : () -> ()
    %cst_81 = arith.constant dense<0.000000e+00> : vector<2x16x16xf32>
    %278 = tpu.matmul %276, %277, %cst_81 {dimension_numbers = #tpu.dot_dimension_numbers<[2], [2], [1], [1], [0, 0, 0, 1, 1, 1], [0], [0]>} : vector<2x16x8xf32>, vector<2x16x8xf32>, vector<2x16x16xf32> -> vector<2x16x16xf32>
    "tpu.trace_stop"() : () -> ()
    %cst_82 = arith.constant 0.353553385 : f32
    %279 = vector.broadcast %cst_82 : f32 to vector<2x16x16xf32>
    %280 = arith.mulf %278, %279 : vector<2x16x16xf32>
    %cst_83 = arith.constant dense<0xFF800000> : vector<2x16xf32>
    %281 = vector.multi_reduction <maximumf>, %280, %cst_83 [2] : vector<2x16x16xf32> to vector<2x16xf32>
    %282 = vector.shape_cast %281 : vector<2x16xf32> to vector<2x16x1xf32>
    %283 = vector.broadcast %282 : vector<2x16x1xf32> to vector<2x16x16xf32>
    %284 = arith.subf %280, %283 : vector<2x16x16xf32>
    %285 = math.exp %284 : vector<2x16x16xf32>
    %cst_84 = arith.constant dense<0.000000e+00> : vector<2x16xf32>
    %286 = vector.multi_reduction <add>, %285, %cst_84 [2] : vector<2x16x16xf32> to vector<2x16xf32>
    %287 = vector.shape_cast %286 : vector<2x16xf32> to vector<2x16x1xf32>
    %288 = vector.broadcast %287 : vector<2x16x1xf32> to vector<2x16x16xf32>
    %289 = arith.divf %285, %288 : vector<2x16x16xf32>
    %290 = vector.extract_strided_slice %214 {offsets = [0, 0, 24], sizes = [2, 16, 8], strides = [1, 1, 1]} : vector<2x16x32xf32> to vector<2x16x8xf32>
    "tpu.trace_start"() <{level = 10 : i32, message = "nqk,nkd->nqd"}> : () -> ()
    %cst_85 = arith.constant dense<0.000000e+00> : vector<2x16x8xf32>
    %291 = tpu.matmul %289, %290, %cst_85 {dimension_numbers = #tpu.dot_dimension_numbers<[2], [1], [1], [2], [0, 0, 0, 1, 1, 2], [0], [0]>} : vector<2x16x16xf32>, vector<2x16x8xf32>, vector<2x16x8xf32> -> vector<2x16x8xf32>
    "tpu.trace_stop"() : () -> ()
    %292 = vector.shape_cast %291 : vector<2x16x8xf32> to vector<32x8xf32>
    %293 = vector.extract_strided_slice %191 {offsets = [24, 0], sizes = [8, 32], strides = [1, 1]} : vector<32x32xf32> to vector<8x32xf32>
    %cst_86 = arith.constant dense<0.000000e+00> : vector<32x32xf32>
    %294 = tpu.matmul %292, %293, %cst_86 {dimension_numbers = #tpu.dot_dimension_numbers<[1], [0], [0], [1], [0, 0, 1, 1], [], []>} : vector<32x8xf32>, vector<8x32xf32>, vector<32x32xf32> -> vector<32x32xf32>
    %295 = arith.addf %275, %294 : vector<32x32xf32>
    %296 = vector.broadcast %194 : vector<1x32xf32> to vector<32x32xf32>
    %297 = arith.addf %295, %296 : vector<32x32xf32>
    %298 = arith.addf %177, %297 : vector<32x32xf32>
    %cst_87 = arith.constant dense<0.000000e+00> : vector<32xf32>
    %299 = vector.multi_reduction <add>, %298, %cst_87 [1] : vector<32x32xf32> to vector<32xf32>
    %300 = vector.shape_cast %299 : vector<32xf32> to vector<32x1xf32>
    %cst_88 = arith.constant 3.200000e+01 : f32
    %301 = vector.broadcast %cst_88 : f32 to vector<32x1xf32>
    %302 = arith.divf %300, %301 : vector<32x1xf32>
    %303 = vector.broadcast %302 : vector<32x1xf32> to vector<32x32xf32>
    %304 = arith.subf %298, %303 : vector<32x32xf32>
    %305 = arith.mulf %304, %304 : vector<32x32xf32>
    %cst_89 = arith.constant dense<0.000000e+00> : vector<32xf32>
    %306 = vector.multi_reduction <add>, %305, %cst_89 [1] : vector<32x32xf32> to vector<32xf32>
    %307 = vector.shape_cast %306 : vector<32xf32> to vector<32x1xf32>
    %cst_90 = arith.constant 3.200000e+01 : f32
    %308 = vector.broadcast %cst_90 : f32 to vector<32x1xf32>
    %309 = arith.divf %307, %308 : vector<32x1xf32>
    %310 = vector.broadcast %302 : vector<32x1xf32> to vector<32x32xf32>
    %311 = arith.subf %298, %310 : vector<32x32xf32>
    %cst_91 = arith.constant 9.99999974E-6 : f32
    %312 = vector.broadcast %cst_91 : f32 to vector<32x1xf32>
    %313 = arith.addf %309, %312 : vector<32x1xf32>
    %314 = math.rsqrt %313 : vector<32x1xf32>
    %315 = vector.broadcast %314 : vector<32x1xf32> to vector<32x32xf32>
    %316 = arith.mulf %311, %315 : vector<32x32xf32>
    %317 = vector.broadcast %195 : vector<1x32xf32> to vector<32x32xf32>
    %318 = arith.mulf %316, %317 : vector<32x32xf32>
    %319 = vector.broadcast %196 : vector<1x32xf32> to vector<32x32xf32>
    %320 = arith.addf %318, %319 : vector<32x32xf32>
    %cst_92 = arith.constant dense<0.000000e+00> : vector<32x64xf32>
    %321 = tpu.matmul %320, %192, %cst_92 {dimension_numbers = #tpu.dot_dimension_numbers<[1], [0], [0], [1], [0, 0, 1, 1], [], []>} : vector<32x32xf32>, vector<32x64xf32>, vector<32x64xf32> -> vector<32x64xf32>
    %322 = vector.broadcast %197 : vector<1x64xf32> to vector<32x64xf32>
    %323 = arith.addf %321, %322 : vector<32x64xf32>
    %cst_93 = arith.constant 0.000000e+00 : f32
    %324 = vector.broadcast %cst_93 : f32 to vector<32x64xf32>
    %325 = arith.maximumf %323, %324 : vector<32x64xf32>
    %cst_94 = arith.constant dense<0.000000e+00> : vector<32x32xf32>
    %326 = tpu.matmul %325, %186, %cst_94 {dimension_numbers = #tpu.dot_dimension_numbers<[1], [0], [0], [1], [0, 0, 1, 1], [], []>} : vector<32x64xf32>, vector<64x32xf32>, vector<32x32xf32> -> vector<32x32xf32>
    %327 = vector.broadcast %198 : vector<1x32xf32> to vector<32x32xf32>
    %328 = arith.addf %326, %327 : vector<32x32xf32>
    %329 = arith.addf %320, %328 : vector<32x32xf32>
    %cst_95 = arith.constant dense<0.000000e+00> : vector<32xf32>
    %330 = vector.multi_reduction <add>, %329, %cst_95 [1] : vector<32x32xf32> to vector<32xf32>
    %331 = vector.shape_cast %330 : vector<32xf32> to vector<32x1xf32>
    %cst_96 = arith.constant 3.200000e+01 : f32
    %332 = vector.broadcast %cst_96 : f32 to vector<32x1xf32>
    %333 = arith.divf %331, %332 : vector<32x1xf32>
    %334 = vector.broadcast %333 : vector<32x1xf32> to vector<32x32xf32>
    %335 = arith.subf %329, %334 : vector<32x32xf32>
    %336 = arith.mulf %335, %335 : vector<32x32xf32>
    %cst_97 = arith.constant dense<0.000000e+00> : vector<32xf32>
    %337 = vector.multi_reduction <add>, %336, %cst_97 [1] : vector<32x32xf32> to vector<32xf32>
    %338 = vector.shape_cast %337 : vector<32xf32> to vector<32x1xf32>
    %cst_98 = arith.constant 3.200000e+01 : f32
    %339 = vector.broadcast %cst_98 : f32 to vector<32x1xf32>
    %340 = arith.divf %338, %339 : vector<32x1xf32>
    %341 = vector.broadcast %333 : vector<32x1xf32> to vector<32x32xf32>
    %342 = arith.subf %329, %341 : vector<32x32xf32>
    %cst_99 = arith.constant 9.99999974E-6 : f32
    %343 = vector.broadcast %cst_99 : f32 to vector<32x1xf32>
    %344 = arith.addf %340, %343 : vector<32x1xf32>
    %345 = math.rsqrt %344 : vector<32x1xf32>
    %346 = vector.broadcast %345 : vector<32x1xf32> to vector<32x32xf32>
    %347 = arith.mulf %342, %346 : vector<32x32xf32>
    %348 = vector.broadcast %199 : vector<1x32xf32> to vector<32x32xf32>
    %349 = arith.mulf %347, %348 : vector<32x32xf32>
    %350 = vector.broadcast %200 : vector<1x32xf32> to vector<32x32xf32>
    %351 = arith.addf %349, %350 : vector<32x32xf32>
    %c2_i32 = arith.constant 2 : i32
    %352 = vector.shape_cast %351 : vector<32x32xf32> to vector<2x16x32xf32>
    %c0_100 = arith.constant 0 : index
    %c0_101 = arith.constant 0 : index
    %c0_102 = arith.constant 0 : index
    %353 = vector.load %arg7[%c0_100, %c0_101, %c0_102] : memref<2x16x32xf32, #tpu.memory_space<vmem>>, vector<2x16x32xf32>
    tpu.vector_store %arg7[%c0_100, %c0_101, %c0_102], %352 {strides = array<i32>} : memref<2x16x32xf32, #tpu.memory_space<vmem>>, vector<2x16x32xf32>,
    return
  }
  func.func @transform_0(%arg0: i32) -> (i32, i32, i32) {
    %c0_i32 = arith.constant 0 : i32
    %c0_i32_0 = arith.constant 0 : i32
    %c0_i32_1 = arith.constant 0 : i32
    return %arg0, %c0_i32, %c0_i32_0 : i32, i32, i32
  }
  func.func @transform_1(%arg0: i32) -> (i32, i32, i32) {
    %c0_i32 = arith.constant 0 : i32
    %c0_i32_0 = arith.constant 0 : i32
    %c0_i32_1 = arith.constant 0 : i32
    return %arg0, %c0_i32, %c0_i32_0 : i32, i32, i32
  }
  func.func @transform_2(%arg0: i32) -> (i32, i32, i32) {
    %c0_i32 = arith.constant 0 : i32
    %c0_i32_0 = arith.constant 0 : i32
    %c0_i32_1 = arith.constant 0 : i32
    %c0_i32_2 = arith.constant 0 : i32
    return %c0_i32, %c0_i32_0, %c0_i32_1 : i32, i32, i32
  }
  func.func @transform_3(%arg0: i32) -> (i32, i32, i32) {
    %c0_i32 = arith.constant 0 : i32
    %c0_i32_0 = arith.constant 0 : i32
    %c0_i32_1 = arith.constant 0 : i32
    %c0_i32_2 = arith.constant 0 : i32
    return %c0_i32, %c0_i32_0, %c0_i32_1 : i32, i32, i32
  }
  func.func @transform_4(%arg0: i32) -> (i32, i32, i32) {
    %c0_i32 = arith.constant 0 : i32
    %c0_i32_0 = arith.constant 0 : i32
    %c0_i32_1 = arith.constant 0 : i32
    %c0_i32_2 = arith.constant 0 : i32
    return %c0_i32, %c0_i32_0, %c0_i32_1 : i32, i32, i32
  }
  func.func @transform_5(%arg0: i32) -> (i32, i32, i32) {
    %c0_i32 = arith.constant 0 : i32
    %c0_i32_0 = arith.constant 0 : i32
    %c0_i32_1 = arith.constant 0 : i32
    %c0_i32_2 = arith.constant 0 : i32
    return %c0_i32, %c0_i32_0, %c0_i32_1 : i32, i32, i32
  }
  func.func @transform_6(%arg0: i32) -> (i32, i32, i32) {
    %c0_i32 = arith.constant 0 : i32
    %c0_i32_0 = arith.constant 0 : i32
    %c0_i32_1 = arith.constant 0 : i32
    return %arg0, %c0_i32, %c0_i32_0 : i32, i32, i32
  }
}

</mosaic_0001>

<bundles_post_ra>
// kernel: tpu_custom_call.1
= control target key start
LH: loop header
LB: loop body
LE: loop exit
PB: predicated region body
PF: predicated region fallthrough
CT: control target
= control target key end

     0   :  { %vm54_vm0 = vcmask 261120   ;;  %vm152_vm1 = vcmask 64512   ;;  %s7592_s0 = inlined_call_operand.vmem [shape: f32[2,16,32], index: 0, kind: input, shape index: {}]   ;;  %s7593_s1 = inlined_call_operand.vmem [shape: f32[2,16,8], index: 1, kind: input, shape index: {}]   ;;  %s7594_s2 = inlined_call_operand.vmem [shape: f32[2,32,192], index: 2, kind: input, shape index: {}]   ;;  %s7595_s3 = inlined_call_operand.vmem [shape: f32[2,8,64], index: 3, kind: input, shape index: {}]   ;;  %s7596_s4 = inlined_call_operand.vmem [shape: f32[2,64,32], index: 4, kind: input, shape index: {}]   ;;  %s7597_s5 = inlined_call_operand.vmem [shape: f32[2,8,96], index: 5, kind: input, shape index: {}]   ;;  %s7598_s6 = inlined_call_operand.hbm [shape: f32[2,16,32], index: 6, kind: output, shape index: {}]  }
   0x1   :  { %v6747_v0 = vld [vmem:[%s7594_s2] sm:$0xff]  ;;  %v6752_v1 = vld [vmem:[%s7594_s2 + $0x10] sm:$0xff]  ;;  %v29_v9 = vld [vmem:[%s7593_s1 + $0x8] sm:$0xff] }
   0x2   :  { %v6757_v2 = vld [vmem:[%s7594_s2 + $0x20] sm:$0xff]  ;;  %v6077_v3 = vpack.c.bf16 %v6752_v1, %v6747_v0  ;;  %v6764_v4 = vld [vmem:[%s7594_s2 + $0x30] sm:$0xff] }
   0x3   :  { %v24_v5 = vld [vmem:[%s7592_s0] sm:$0xff]  ;;  %v6081_v7 = vpack.c.bf16 %v6764_v4, %v6757_v2  ;;  %v30_v10 = vld [vmem:[%s7593_s1 + $0x10] sm:$0xff] }
   0x4   :  { %v40_v6 = vld [vmem:[%s7595_s3] sm:$0xff]  ;;  %5681 = vmatprep.mubr.msk.f32.mxu0 %vm54_vm0, %v24_v5  ;;  %6078 = vmatprep.subr.bf16.mxu0 %v6077_v3 }
   0x5   :  { %5687 = vmatprep.subr.mxu1 %v40_v6  ;;  %v28_v8 = vld [vmem:[%s7593_s1] sm:$0xff]  ;;  %6080 = vmatpush3.bf16.msra.mxu0 %v6077_v3 }
   0x6   :  { %5688 = vmatpush3.msra.mxu1 %v40_v6  ;;  %5689 = vmatprep.mubr.msk.f32.mxu1 %vm152_vm1, %v28_v8 }
   0x7   :  { %11 = vsyncpa [#allocation3], 0  ;;  %6082 = vmatprep.subr.bf16.mxu0 %v6081_v7  ;;  %5690 = vmatmul.mubr.msk.f32.vlgmr.msra.gmra.mrb[0].mxu1 %vm152_vm1, %v29_v9  ;;  %v31_v11 = vld [vmem:[%s7593_s1 + $0x18] sm:$0xff]  ;;  %v25_v12 = vld [vmem:[%s7592_s0 + $0x8] sm:$0xff]  ;;  %v50_v15 = vlaneseq  ;;  %s6694_s25 = smov 96   ;;  %vm436_vm3 = vcmask 130048  }
   0x8   :  { %5692 = vmatprep.mubr.msk.f32.mxu1 %vm152_vm1, %v30_v10  ;;  %v26_v13 = vld [vmem:[%s7592_s0 + $0x10] sm:$0xff]  ;;  %v27_v14 = vld [vmem:[%s7592_s0 + $0x18] sm:$0xff]  ;;  %v6809_v18 = vld [vmem:[%s7597_s5] sm:$0xff]  ;;  %s6695_s26 = smov 64   ;;  %s6696_s27 = smov 88   ;;  %vm2473_vm4 = vcmask 523264  }
   0x9   :  { %6084 = vmatpush3.bf16.msra.mxu0 %v6081_v7  ;;  %v6803_v16 = vshrl.u32 %v50_v15, 7  ;;  %vm6844_vm2 = vmpackc.low %vm152_vm1, %vm152_vm1  ;;  %s6697_s28 = smov 120   ;;  %s6698_s29 = smov 56  }
   0xa   :  { %s6699_s30 = smov 32   ;;  %s6700_s7 = smov 80  }
   0xb   :  { %5693 = vmatmul.mubr.msk.f32.gmra.mrb[2].mxu1 %vm152_vm1, %v31_v11  ;;  %v52_v17 = vsub.s32 0, %v6803_v16  ;;  %s6701_s8 = smov 112   ;;  %s6702_s9 = smov 48  }
   0xc   :  { %5682 = vmatmul.mubr.msk.f32.vlgmr.msra.gmra.mrb[0].mxu0 %vm54_vm0, %v25_v12  ;;  %s6703_s10 = smov 72   ;;  %s6704_s11 = smov 104  }
   0xd   :  { %5684 = vmatprep.mubr.msk.f32.mxu0 %vm54_vm0, %v26_v13  ;;  %v53_v21 = vrot.slane %v6809_v18, %v52_v17  ;;  %s6705_s12 = smov 40  }
  0x10   :  { %5685 = vmatmul.mubr.msk.f32.gmra.mrb[2].mxu0 %vm54_vm0, %v27_v14 }
  0xda   :  { %v5691_v19 = vpop.f32.mrb[0].mxu1 }
  0xdb   :  { %v231_v20 = vpop.f32.mrb[1].mxu1 }
  0xde   :  { %v5694_v22 = vpop.f32.mrb[2].mxu1 }
  0xdf   :  { %v241_v23 = vpop.f32.mrb[3].mxu1  ;;  %v5683_v24 = vpop.f32.mrb[0].mxu0 }
  0xe0   :  { %v139_v25 = vadd.f32 %v5683_v24, %v53_v21  ;;  %v133_v26 = vpop.f32.mrb[1].mxu0 }
  0xe1   :  { %v134_v27 = vadd.f32 %v133_v26, %v53_v21 }
  0xe2   :  { %v6814_v28 = vadd.f32 %v5691_v19, %v139_v25 }
  0xe3   :  { %v6816_v29 = vadd.f32 %v231_v20, %v134_v27  ;;  %v5686_v30 = vpop.f32.mrb[2].mxu0  ;;  %v6818_v31 = vpack.i.bf16 %v139_v25, %v134_v27 }
  0xe4   :  { %v149_v32 = vadd.f32 %v5686_v30, %v53_v21  ;;  %v143_v33 = vpop.f32.mrb[3].mxu0 }
  0xe5   :  { %v144_v34 = vadd.f32 %v143_v33, %v53_v21  ;;  %5699 = vmatprep.mubr.msk.f32.mxu1 %vm152_vm1, %v6816_v29  ;;  %v6824_v35 = vpack.i.bf16 %v6814_v28, %v6816_v29 }
  0xe6   :  { %v6826_v36 = vadd.f32 %v5694_v22, %v149_v32 }
  0xe7   :  { %v6828_v37 = vadd.f32 %v241_v23, %v144_v34  ;;  %6341 = vrot.lane.b32.xlu0 %v6824_v35, %s6694_s25  ;;  %v6832_v38 = vpack.i.bf16 %v149_v32, %v144_v34 }
  0xe9   :  { %v6836_v39 = vpack.i.bf16 %v6826_v36, %v6828_v37  ;;  %5706 = vmatprep.mubr.msk.f32.mxu0 %vm152_vm1, %v6828_v37 }
  0xeb   :  { %6346 = vrot.lane.b32.xlu0 %v6836_v39, %s6694_s25 }
 0x159   :  { %v6342_v40 = vpop.permute.xlu0 %6341 }
 0x15a   :  { %v6344_v41 = vunpack.i.h.bf16 %v6342_v40  ;;  %v6343_v42 = vunpack.i.l.bf16 %v6342_v40 }
 0x15c   :  { %v6085_v44 = vpack.c.bf16 %v6344_v41, %v6343_v42 }
 0x15d   :  { %v6347_v45 = vpop.permute.xlu0 %6346 }
 0x15e   :  { %v6349_v46 = vunpack.i.h.bf16 %v6347_v45  ;;  %v6348_v47 = vunpack.i.l.bf16 %v6347_v45  ;;  %6087 = vmatprep.subr.msk.bf16.mxu1 %vm6844_vm2, %v6085_v44 }
 0x15f   :  { %6090 = vmatpush3.bf16.xpose.msk.msra.mxu1 %vm6844_vm2, %v6085_v44 }
 0x160   :  { %v6091_v48 = vpack.c.bf16 %v6349_v46, %v6348_v47 }
 0x162   :  { %6093 = vmatprep.subr.msk.bf16.mxu0 %vm6844_vm2, %v6091_v48 }
 0x163   :  { %6096 = vmatpush3.bf16.xpose.msk.msra.mxu0 %vm6844_vm2, %v6091_v48 }
 0x166   :  { %5700 = vmatmul.mubr.msk.f32.vlgmr.msra.gmra.mrb[4].mxu1 %vm152_vm1, %v6814_v28 }
 0x16a   :  { %5707 = vmatmul.mubr.msk.f32.vlgmr.msra.gmra.mrb[4].mxu0 %vm152_vm1, %v6826_v36 }
 0x239   :  { %v5701_v49 = vpop.f32.mrb[4].mxu1 }
 0x23a   :  { %v334_v50 = vpop.f32.mrb[5].mxu1  ;;  %v433_v52 = vmul.f32 0.35355338, %v5701_v49 }
 0x23b   :  { %v432_v51 = vmul.f32 0.35355338, %v334_v50 }
 0x23c   :  { %v440_v59 = vsel %vm436_vm3, %v433_v52, -inf }
 0x23d   :  { %v5708_v53 = vpop.f32.mrb[4].mxu0  ;;  %v437_v54 = vsel %vm436_vm3, %v432_v51, -inf }
 0x23e   :  { %v423_v55 = vpop.f32.mrb[5].mxu0  ;;  %438 = vmax.xlane.f32.xlu1 %v437_v54  ;;  %v435_v57 = vmul.f32 0.35355338, %v5708_v53 }
 0x23f   :  { %v434_v56 = vmul.f32 0.35355338, %v423_v55 }
 0x240   :  { %v446_v60 = vsel %vm436_vm3, %v435_v57, -inf }
 0x241   :  { %v443_v58 = vsel %vm436_vm3, %v434_v56, -inf }
 0x242   :  { %444 = vmax.xlane.f32.xlu0 %v443_v58  ;;  %441 = vmax.xlane.f32.xlu1 %v440_v59 }
 0x246   :  { %447 = vmax.xlane.f32.xlu1 %v446_v60 }
 0x257   :  { %6351 = vrot.lane.b32.xlu1 %v6818_v31, %s6695_s26 }
 0x258   :  { %6356 = vrot.lane.b32.xlu0 %v6832_v38, %s6695_s26 }
 0x25b   :  { %6361 = vrot.lane.b32.xlu1 %v6824_v35, %s6696_s27 }
 0x25c   :  { %750 = vrot.lane.b32.xlu0 %v6828_v37, %s6697_s28 }
 0x25f   :  { %6366 = vrot.lane.b32.xlu1 %v6836_v39, %s6696_s27 }
 0x263   :  { %659 = vrot.lane.b32.xlu1 %v6816_v29, %s6697_s28 }
 0x267   :  { %661 = vrot.lane.b32.xlu1 %v6814_v28, %s6697_s28 }
 0x2cb   :  { %v439_v61 = vpop.xlane.xlu1 %438 }
 0x2cc   :  { %v449_v62 = vsub.f32 %v432_v51, %v439_v61 }
 0x2ce   :  { %v453_v7 = vmul.f32 1.442695, %v449_v62 }
 0x2cf   :  { %v445_v63 = vpop.xlane.xlu0 %444  ;;  %v442_v3 = vpop.xlane.xlu1 %441 }
 0x2d0   :  { %v450_v5 = vsub.f32 %v433_v52, %v442_v3  ;;  %v451_v11 = vsub.f32 %v434_v56, %v445_v63 }
 0x2d2   :  { %v455_v6 = vmul.f32 1.442695, %v450_v5  ;;  %v457_v22 = vmul.f32 1.442695, %v451_v11 }
 0x2d3   :  { %v448_v8 = vpop.xlane.xlu1 %447  ;;  %v6357_v10 = vpop.permute.xlu0 %6356 }
 0x2d4   :  { %v452_v9 = vsub.f32 %v435_v57, %v448_v8  ;;  %6500 = vpow2.f32 %v455_v6  ;;  %v6359_v14 = vunpack.i.h.bf16 %v6357_v10  ;;  %v6358_v15 = vunpack.i.l.bf16 %v6357_v10 }
 0x2d5   :  { %6502 = vpow2.f32 %v453_v7 }
 0x2d6   :  { %v459_v12 = vmul.f32 1.442695, %v452_v9  ;;  %v6101_v26 = vpack.c.bf16 %v6359_v14, %v6358_v15 }
 0x2d7   :  { %v6352_v13 = vpop.permute.xlu1 %6351  ;;  %v751_v63 = vpop.permute.xlu0 %750 }
 0x2d8   :  { %v6354_v19 = vunpack.i.h.bf16 %v6352_v13  ;;  %v6353_v20 = vunpack.i.l.bf16 %v6352_v13  ;;  %6504 = vpow2.f32 %v459_v12 }
 0x2d9   :  { %6506 = vpow2.f32 %v457_v22 }
 0x2da   :  { %v6097_v21 = vpack.c.bf16 %v6354_v19, %v6353_v20 }
 0x2db   :  { %v6362_v23 = vpop.permute.xlu1 %6361 }
 0x2dc   :  { %v6364_v24 = vunpack.i.h.bf16 %v6362_v23  ;;  %v6363_v25 = vunpack.i.l.bf16 %v6362_v23  ;;  %6098 = vmatprep.subr.bf16.mxu1 %v6097_v21 }
 0x2dd   :  { %6100 = vmatpush3.bf16.msra.mxu1 %v6097_v21 }
 0x2de   :  { %v6105_v27 = vpack.c.bf16 %v6364_v24, %v6363_v25  ;;  %6102 = vmatprep.subr.bf16.mxu1 %v6101_v26  ;;  %v6501_v30 = vpop.eup %6500 }
 0x2df   :  { %v6367_v32 = vpop.permute.xlu1 %6366  ;;  %v464_v33 = vsel %vm436_vm3, %v6501_v30, 0.0  ;;  %v6503_v34 = vpop.eup %6502 }
 0x2e0   :  { %6107 = vmatprep.subr.msk.bf16.mxu0 %vm6844_vm2, %v6105_v27  ;;  %465 = vadd.xlane.f32.xlu1 %v464_v33  ;;  %v461_v41 = vsel %vm436_vm3, %v6503_v34, 0.0  ;;  %v6369_v54 = vunpack.i.h.bf16 %v6367_v32  ;;  %v6368_v55 = vunpack.i.l.bf16 %v6367_v32 }
 0x2e1   :  { %6110 = vmatpush3.bf16.xpose.msk.msra.mxu0 %vm6844_vm2, %v6105_v27 }
 0x2e2   :  { %v6505_v42 = vpop.eup %6504  ;;  %v6111_v58 = vpack.c.bf16 %v6369_v54, %v6368_v55 }
 0x2e3   :  { %v660_v40 = vpop.permute.xlu1 %659  ;;  %v470_v45 = vsel %vm436_vm3, %v6505_v42, 0.0  ;;  %v6507_v46 = vpop.eup %6506 }
 0x2e4   :  { %5727 = vmatprep.mubr.msk.f32.mxu0 %vm152_vm1, %v660_v40  ;;  %462 = vadd.xlane.f32.xlu1 %v461_v41  ;;  %v467_v47 = vsel %vm436_vm3, %v6507_v46, 0.0 }
 0x2e7   :  { %v662_v44 = vpop.permute.xlu1 %661 }
 0x2e8   :  { %5728 = vmatmul.mubr.msk.f32.vlgmr.msra.gmra.mrb[6].mxu0 %vm152_vm1, %v662_v44  ;;  %471 = vadd.xlane.f32.xlu1 %v470_v45 }
 0x2ec   :  { %468 = vadd.xlane.f32.xlu1 %v467_v47 }
 0x2fd   :  { %752 = vrot.lane.b32.xlu1 %v6826_v36, %s6697_s28 }
 0x36d   :  { %v466_v48 = vpop.xlane.xlu1 %465 }
 0x36e   :  { %6508 = vrcp.f32 %v466_v48 }
 0x371   :  { %v463_v49 = vpop.xlane.xlu1 %462 }
 0x372   :  { %6510 = vrcp.f32 %v463_v49 }
 0x375   :  { %v472_v50 = vpop.xlane.xlu1 %471 }
 0x376   :  { %6512 = vrcp.f32 %v472_v50 }
 0x378   :  { %v6509_v52 = vpop.eup %6508 }
 0x379   :  { %v469_v51 = vpop.xlane.xlu1 %468  ;;  %v476_v57 = vmul.f32 %v6509_v52, %v6501_v30 }
 0x37a   :  { %6514 = vrcp.f32 %v469_v51 }
 0x37c   :  { %v6511_v53 = vpop.eup %6510 }
 0x37d   :  { %v474_v56 = vmul.f32 %v6511_v53, %v6503_v34  ;;  %v753_v3 = vpop.permute.xlu1 %752 }
 0x37f   :  { %5713 = vmatprep.mubr.msk.f32.mxu1 %vm436_vm3, %v474_v56 }
 0x380   :  { %5714 = vmatmul.mubr.msk.f32.vlgmr.msra.gmra.mrb[6].mxu1 %vm436_vm3, %v476_v57  ;;  %v6513_v59 = vpop.eup %6512 }
 0x381   :  { %6104 = vmatpush3.bf16.msra.mxu1 %v6101_v26  ;;  %v480_v62 = vmul.f32 %v6513_v59, %v6505_v42 }
 0x382   :  { %6113 = vmatprep.subr.msk.bf16.mxu1 %vm6844_vm2, %v6111_v58 }
 0x384   :  { %v6515_v60 = vpop.eup %6514 }
 0x385   :  { %v478_v61 = vmul.f32 %v6515_v60, %v6507_v46 }
 0x387   :  { %5720 = vmatprep.mubr.msk.f32.mxu1 %vm436_vm3, %v478_v61 }
 0x388   :  { %5721 = vmatmul.mubr.msk.f32.vlgmr.msra.gmra.mrb[8].mxu1 %vm436_vm3, %v480_v62 }
 0x389   :  { %5734 = vmatprep.mubr.msk.f32.mxu1 %vm152_vm1, %v751_v63 }
 0x38a   :  { %6116 = vmatpush3.bf16.xpose.msk.msra.mxu1 %vm6844_vm2, %v6111_v58 }
 0x391   :  { %5735 = vmatmul.mubr.msk.f32.vlgmr.msra.gmra.mrb[10].mxu1 %vm152_vm1, %v753_v3 }
 0x3bb   :  { %v5729_v5 = vpop.f32.mrb[6].mxu0 }
 0x3bc   :  { %v842_v6 = vmul.f32 0.35355338, %v5729_v5  ;;  %v741_v7 = vpop.f32.mrb[7].mxu0 }
 0x3bd   :  { %v841_v8 = vmul.f32 0.35355338, %v741_v7 }
 0x3be   :  { %v848_v9 = vsel %vm436_vm3, %v842_v6, -inf }
 0x3bf   :  { %849 = vmax.xlane.f32.xlu1 %v848_v9  ;;  %v845_v10 = vsel %vm436_vm3, %v841_v8, -inf }
 0x3c0   :  { %846 = vmax.xlane.f32.xlu0 %v845_v10 }
 0x44c   :  { %v850_v19 = vpop.xlane.xlu1 %849 }
 0x44d   :  { %v847_v11 = vpop.xlane.xlu0 %846  ;;  %v858_v21 = vsub.f32 %v842_v6, %v850_v19 }
 0x44e   :  { %v857_v12 = vsub.f32 %v841_v8, %v847_v11 }
 0x44f   :  { %v863_v25 = vmul.f32 1.442695, %v858_v21 }
 0x450   :  { %v861_v13 = vmul.f32 1.442695, %v857_v12 }
 0x452   :  { %6516 = vpow2.f32 %v861_v13 }
 0x453   :  { %v6902_v14 = vpop.f32.mrb[6].mxu1  ;;  %6518 = vpow2.f32 %v863_v25 }
 0x454   :  { %v6904_v15 = vpop.f32.mrb[7].mxu1 }
 0x45b   :  { %v6906_v22 = vpop.f32.mrb[8].mxu1 }
 0x45c   :  { %v6517_v20 = vpop.eup %6516  ;;  %v6908_v23 = vpop.f32.mrb[9].mxu1 }
 0x45d   :  { %v869_v24 = vsel %vm436_vm3, %v6517_v20, 0.0  ;;  %v6519_v40 = vpop.eup %6518 }
 0x45e   :  { %870 = vadd.xlane.f32.xlu1 %v869_v24  ;;  %v872_v41 = vsel %vm436_vm3, %v6519_v40, 0.0 }
 0x464   :  { %v5736_v26 = vpop.f32.mrb[10].mxu1 }
 0x465   :  { %v832_v27 = vpop.f32.mrb[11].mxu1  ;;  %v844_v32 = vmul.f32 0.35355338, %v5736_v26 }
 0x466   :  { %v843_v30 = vmul.f32 0.35355338, %v832_v27 }
 0x467   :  { %v854_v34 = vsel %vm436_vm3, %v844_v32, -inf }
 0x468   :  { %v851_v33 = vsel %vm436_vm3, %v843_v30, -inf }
 0x469   :  { %852 = vmax.xlane.f32.xlu0 %v851_v33 }
 0x46d   :  { %855 = vmax.xlane.f32.xlu0 %v854_v34 }
 0x471   :  { %873 = vadd.xlane.f32.xlu0 %v872_v41 }
 0x4eb   :  { %v871_v42 = vpop.xlane.xlu1 %870 }
 0x4ec   :  { %6520 = vrcp.f32 %v871_v42 }
 0x4f6   :  { %v6521_v44 = vpop.eup %6520  ;;  %v853_v45 = vpop.xlane.xlu0 %852 }
 0x4f7   :  { %v882_v46 = vmul.f32 %v6521_v44, %v6517_v20  ;;  %v859_v47 = vsub.f32 %v843_v30, %v853_v45 }
 0x4f9   :  { %5741 = vmatprep.mubr.msk.f32.mxu0 %vm436_vm3, %v882_v46  ;;  %v865_v48 = vmul.f32 1.442695, %v859_v47 }
 0x4fa   :  { %v856_v49 = vpop.xlane.xlu0 %855 }
 0x4fb   :  { %6522 = vpow2.f32 %v865_v48  ;;  %v860_v50 = vsub.f32 %v844_v32, %v856_v49 }
 0x4fd   :  { %v867_v51 = vmul.f32 1.442695, %v860_v50 }
 0x4ff   :  { %6524 = vpow2.f32 %v867_v51 }
 0x505   :  { %v6523_v52 = vpop.eup %6522 }
 0x506   :  { %v875_v53 = vsel %vm436_vm3, %v6523_v52, 0.0 }
 0x507   :  { %876 = vadd.xlane.f32.xlu1 %v875_v53 }
 0x509   :  { %v6525_v54 = vpop.eup %6524 }
 0x50a   :  { %v878_v55 = vsel %vm436_vm3, %v6525_v54, 0.0 }
 0x50b   :  { %879 = vadd.xlane.f32.xlu0 %v878_v55 }
 0x518   :  { %6371 = vrot.lane.b32.xlu1 %v6818_v31, %s6698_s29 }
 0x51c   :  { %1064 = vrot.lane.b32.xlu1 %v6752_v1, %s6699_s30  ;;  %v874_v1 = vpop.xlane.xlu0 %873 }
 0x51d   :  { %6526 = vrcp.f32 %v874_v1 }
 0x520   :  { %6381 = vrot.lane.b32.xlu1 %v6824_v35, %s6700_s7 }
 0x521   :  { %6376 = vrot.lane.b32.xlu0 %v6832_v38, %s6698_s29 }
 0x524   :  { %1265 = vrot.lane.b32.xlu1 %v6816_v29, %s6701_s8 }
 0x525   :  { %6386 = vrot.lane.b32.xlu0 %v6836_v39, %s6700_s7 }
 0x527   :  { %v6527_v62 = vpop.eup %6526 }
 0x528   :  { %1356 = vrot.lane.b32.xlu1 %v6828_v37, %s6701_s8  ;;  %v884_v8 = vmul.f32 %v6527_v62, %v6519_v40 }
 0x529   :  { %1267 = vrot.lane.b32.xlu0 %v6814_v28, %s6701_s8 }
 0x52d   :  { %1358 = vrot.lane.b32.xlu0 %v6826_v36, %s6701_s8 }
 0x594   :  { %v877_v56 = vpop.xlane.xlu1 %876 }
 0x595   :  { %6528 = vrcp.f32 %v877_v56 }
 0x598   :  { %v6372_v57 = vpop.permute.xlu1 %6371  ;;  %v880_v58 = vpop.xlane.xlu0 %879 }
 0x599   :  { %v6374_v59 = vunpack.i.h.bf16 %v6372_v57  ;;  %v6373_v60 = vunpack.i.l.bf16 %v6372_v57  ;;  %6530 = vrcp.f32 %v880_v58 }
 0x59b   :  { %v6117_v61 = vpack.c.bf16 %v6374_v59, %v6373_v60 }
 0x59c   :  { %v1065_v63 = vpop.permute.xlu1 %1064  ;;  %v6377_v3 = vpop.permute.xlu0 %6376 }
 0x59d   :  { %v6379_v5 = vunpack.i.h.bf16 %v6377_v3  ;;  %v6378_v6 = vunpack.i.l.bf16 %v6377_v3  ;;  %6118 = vmatprep.subr.bf16.mxu0 %v6117_v61 }
 0x59e   :  { %6120 = vmatpush3.bf16.msra.mxu0 %v6117_v61 }
 0x59f   :  { %v6529_v7 = vpop.eup %6528  ;;  %v6121_v9 = vpack.c.bf16 %v6379_v5, %v6378_v6 }
 0x5a0   :  { %v6382_v10 = vpop.permute.xlu1 %6381  ;;  %v886_v11 = vmul.f32 %v6529_v7, %v6523_v52  ;;  %v6387_v24 = vpop.permute.xlu0 %6386 }
 0x5a1   :  { %5742 = vmatmul.mubr.msk.f32.vlgmr.msra.gmra.mrb[8].mxu0 %vm436_vm3, %v884_v8  ;;  %6122 = vmatprep.subr.bf16.mxu1 %v6121_v9  ;;  %v6384_v12 = vunpack.i.h.bf16 %v6382_v10  ;;  %v6383_v13 = vunpack.i.l.bf16 %v6382_v10  ;;  %v6389_v25 = vunpack.i.h.bf16 %v6387_v24  ;;  %v6388_v26 = vunpack.i.l.bf16 %v6387_v24 }
 0x5a2   :  { %6124 = vmatpush3.bf16.msra.mxu1 %v6121_v9  ;;  %5748 = vmatprep.mubr.msk.f32.mxu1 %vm436_vm3, %v886_v11 }
 0x5a3   :  { %v6531_v19 = vpop.eup %6530  ;;  %5761 = vmatprep.mubr.msk.f32.mxu0 %vm152_vm1, %v6904_v15  ;;  %5751 = vmatprep.subr.mxu1 %v1065_v63  ;;  %v6125_v21 = vpack.c.bf16 %v6384_v12, %v6383_v13  ;;  %v6131_v32 = vpack.c.bf16 %v6389_v25, %v6388_v26 }
 0x5a4   :  { %v888_v20 = vmul.f32 %v6531_v19, %v6525_v54  ;;  %v1266_v33 = vpop.permute.xlu1 %1265  ;;  %v1268_v40 = vpop.permute.xlu0 %1267 }
 0x5a6   :  { %5749 = vmatmul.mubr.msk.f32.vlgmr.msra.gmra.mrb[12].mxu1 %vm436_vm3, %v888_v20 }
 0x5a7   :  { %5752 = vmatpush3.msra.mxu1 %v1065_v63 }
 0x5a8   :  { %6127 = vmatprep.subr.msk.bf16.mxu1 %vm6844_vm2, %v6125_v21  ;;  %v1357_v41 = vpop.permute.xlu1 %1356  ;;  %v1359_v42 = vpop.permute.xlu0 %1358 }
 0x674   :  { %v5743_v27 = vpop.f32.mrb[8].mxu0 }
 0x675   :  { %v967_v30 = vpop.f32.mrb[9].mxu0 }
 0x676   :  { %5753 = vmatprep.mubr.msk.f32.mxu1 %vm152_vm1, %v967_v30 }
 0x677   :  { %5754 = vmatmul.mubr.msk.f32.vlgmr.msra.gmra.mrb[14].mxu1 %vm152_vm1, %v5743_v27 }
 0x678   :  { %6130 = vmatpush3.bf16.xpose.msk.msra.mxu1 %vm6844_vm2, %v6125_v21 }
 0x679   :  { %6133 = vmatprep.subr.msk.bf16.mxu1 %vm6844_vm2, %v6131_v32  ;;  %v5750_v15 = vpop.f32.mrb[12].mxu1 }
 0x67a   :  { %v1054_v34 = vpop.f32.mrb[13].mxu1 }
 0x67b   :  { %5756 = vmatprep.mubr.msk.f32.mxu1 %vm152_vm1, %v1054_v34 }
 0x67c   :  { %5757 = vmatmul.mubr.msk.f32.gmra.mrb[16].mxu1 %vm152_vm1, %v5750_v15 }
 0x67d   :  { %5771 = vmatprep.mubr.msk.f32.mxu1 %vm152_vm1, %v1266_v33 }
 0x680   :  { %5772 = vmatmul.mubr.msk.f32.vlgmr.msra.gmra.mrb[18].mxu1 %vm152_vm1, %v1268_v40 }
 0x681   :  { %6136 = vmatpush3.bf16.xpose.msk.msra.mxu1 %vm6844_vm2, %v6131_v32  ;;  %5778 = vmatprep.mubr.msk.f32.mxu1 %vm152_vm1, %v1357_v41 }
 0x688   :  { %5779 = vmatmul.mubr.msk.f32.vlgmr.msra.gmra.mrb[20].mxu1 %vm152_vm1, %v1359_v42 }
 0x74a   :  { %v6956_v44 = vpop.f32.mrb[14].mxu1 }
 0x74b   :  { %v6958_v45 = vpop.f32.mrb[15].mxu1 }
 0x74f   :  { %v6960_v46 = vpop.f32.mrb[16].mxu1 }
 0x750   :  { %v6962_v47 = vpop.f32.mrb[17].mxu1 }
 0x753   :  { %v5773_v48 = vpop.f32.mrb[18].mxu1 }
 0x754   :  { %v1448_v49 = vmul.f32 0.35355338, %v5773_v48  ;;  %v1347_v50 = vpop.f32.mrb[19].mxu1 }
 0x755   :  { %v1447_v51 = vmul.f32 0.35355338, %v1347_v50 }
 0x756   :  { %v1454_v52 = vsel %vm436_vm3, %v1448_v49, -inf }
 0x757   :  { %1455 = vmax.xlane.f32.xlu0 %v1454_v52  ;;  %v1451_v53 = vsel %vm436_vm3, %v1447_v51, -inf }
 0x758   :  { %1452 = vmax.xlane.f32.xlu1 %v1451_v53 }
 0x75b   :  { %v5780_v54 = vpop.f32.mrb[20].mxu1 }
 0x75c   :  { %v1450_v55 = vmul.f32 0.35355338, %v5780_v54  ;;  %v1438_v1 = vpop.f32.mrb[21].mxu1 }
 0x75d   :  { %v1449_v56 = vmul.f32 0.35355338, %v1438_v1 }
 0x75e   :  { %v1460_v57 = vsel %vm436_vm3, %v1450_v55, -inf }
 0x75f   :  { %1461 = vmax.xlane.f32.xlu1 %v1460_v57  ;;  %v1457_v58 = vsel %vm436_vm3, %v1449_v56, -inf }
 0x760   :  { %1458 = vmax.xlane.f32.xlu0 %v1457_v58 }
 0x7e4   :  { %v1456_v59 = vpop.xlane.xlu0 %1455 }
 0x7e5   :  { %v1464_v60 = vsub.f32 %v1448_v49, %v1456_v59  ;;  %v1453_v61 = vpop.xlane.xlu1 %1452 }
 0x7e6   :  { %v1463_v62 = vsub.f32 %v1447_v51, %v1453_v61 }
 0x7e7   :  { %v1469_v63 = vmul.f32 1.442695, %v1464_v60 }
 0x7e8   :  { %v1467_v3 = vmul.f32 1.442695, %v1463_v62 }
 0x7e9   :  { %6532 = vpow2.f32 %v1469_v63 }
 0x7ea   :  { %6534 = vpow2.f32 %v1467_v3 }
 0x7ec   :  { %v1462_v5 = vpop.xlane.xlu1 %1461 }
 0x7ed   :  { %v1466_v6 = vsub.f32 %v1450_v55, %v1462_v5  ;;  %v1459_v7 = vpop.xlane.xlu0 %1458 }
 0x7ee   :  { %v1465_v8 = vsub.f32 %v1449_v56, %v1459_v7 }
 0x7ef   :  { %v1473_v9 = vmul.f32 1.442695, %v1466_v6 }
 0x7f0   :  { %v1471_v10 = vmul.f32 1.442695, %v1465_v8 }
 0x7f1   :  { %6536 = vpow2.f32 %v1473_v9 }
 0x7f2   :  { %6538 = vpow2.f32 %v1471_v10 }
 0x7f3   :  { %v6968_v11 = vpop.eup %6532 }
 0x7f4   :  { %v6535_v12 = vpop.eup %6534  ;;  %v1478_v13 = vsel %vm436_vm3, %v6968_v11, 0.0 }
 0x7f5   :  { %1479 = vadd.xlane.f32.xlu1 %v1478_v13  ;;  %v1475_v19 = vsel %vm436_vm3, %v6535_v12, 0.0 }
 0x7f6   :  { %1476 = vadd.xlane.f32.xlu0 %v1475_v19 }
 0x7fb   :  { %v6973_v20 = vpop.eup %6536 }
 0x7fc   :  { %v6539_v21 = vpop.eup %6538  ;;  %v1484_v24 = vsel %vm436_vm3, %v6973_v20, 0.0 }
 0x7fd   :  { %1485 = vadd.xlane.f32.xlu1 %v1484_v24  ;;  %v1481_v25 = vsel %vm436_vm3, %v6539_v21, 0.0 }
 0x7fe   :  { %1482 = vadd.xlane.f32.xlu0 %v1481_v25 }
 0x80e   :  { %6391 = vrot.lane.b32.xlu1 %v6818_v31, %s6702_s9 }
 0x812   :  { %6396 = vrot.lane.b32.xlu1 %v6832_v38, %s6702_s9 }
 0x814   :  { %1165 = vrot.lane.b32.xlu0 %v6747_v0, %s6699_s30 }
 0x816   :  { %6401 = vrot.lane.b32.xlu1 %v6824_v35, %s6703_s10 }
 0x818   :  { %1670 = vrot.lane.b32.xlu0 %v6757_v2, %s6699_s30 }
 0x81a   :  { %1774 = vrot.lane.b32.xlu1 %v6816_v29, %s6704_s11 }
 0x81c   :  { %6406 = vrot.lane.b32.xlu0 %v6836_v39, %s6703_s10 }
 0x81e   :  { %1865 = vrot.lane.b32.xlu1 %v6828_v37, %s6704_s11 }
 0x820   :  { %1776 = vrot.lane.b32.xlu0 %v6814_v28, %s6704_s11 }
 0x824   :  { %1867 = vrot.lane.b32.xlu0 %v6826_v36, %s6704_s11 }
 0x882   :  { %v1480_v35 = vpop.xlane.xlu1 %1479 }
 0x883   :  { %v1477_v0 = vpop.xlane.xlu0 %1476 }
 0x884   :  { %6540 = vrcp.f32 %v1477_v0 }
 0x885   :  { %6542 = vrcp.f32 %v1480_v35 }
 0x88a   :  { %v1486_v2 = vpop.xlane.xlu1 %1485 }
 0x88b   :  { %6544 = vrcp.f32 %v1486_v2  ;;  %v1483_v26 = vpop.xlane.xlu0 %1482 }
 0x88c   :  { %6546 = vrcp.f32 %v1483_v26 }
 0x88e   :  { %v6392_v29 = vpop.permute.xlu1 %6391  ;;  %v6541_v32 = vpop.eup %6540 }
 0x88f   :  { %v6394_v27 = vunpack.i.h.bf16 %v6392_v29  ;;  %v6393_v39 = vunpack.i.l.bf16 %v6392_v29  ;;  %v1166_v30 = vpop.permute.xlu0 %1165  ;;  %v6543_v34 = vpop.eup %6542  ;;  %v1488_v41 = vmul.f32 %v6541_v32, %v6535_v12 }
 0x890   :  { %5759 = vmatprep.subr.mxu0 %v1166_v30  ;;  %v1490_v52 = vmul.f32 %v6543_v34, %v6968_v11 }
 0x891   :  { %5760 = vmatpush3.msra.mxu0 %v1166_v30  ;;  %v6137_v37 = vpack.c.bf16 %v6394_v27, %v6393_v39 }
 0x892   :  { %v6397_v28 = vpop.permute.xlu1 %6396  ;;  %5762 = vmatmul.mubr.msk.f32.vlgmr.msra.gmra.mrb[10].mxu0 %vm152_vm1, %v6902_v14 }
 0x893   :  { %v6399_v36 = vunpack.i.h.bf16 %v6397_v28  ;;  %v6398_v15 = vunpack.i.l.bf16 %v6397_v28  ;;  %5764 = vmatprep.mubr.msk.f32.mxu0 %vm152_vm1, %v6908_v23  ;;  %6138 = vmatprep.subr.bf16.mxu0 %v6137_v37  ;;  %v1671_v33 = vpop.permute.xlu0 %1670 }
 0x894   :  { %6140 = vmatpush3.bf16.msra.mxu0 %v6137_v37 }
 0x895   :  { %v6545_v40 = vpop.eup %6544  ;;  %v6141_v42 = vpack.c.bf16 %v6399_v36, %v6398_v15  ;;  %5795 = vmatprep.subr.mxu0 %v1671_v33 }
 0x896   :  { %v6547_v48 = vpop.eup %6546  ;;  %v6402_v49 = vpop.permute.xlu1 %6401  ;;  %5765 = vmatmul.mubr.msk.f32.gmra.mrb[12].mxu0 %vm152_vm1, %v6906_v22  ;;  %v1494_v1 = vmul.f32 %v6545_v40, %v6973_v20 }
 0x897   :  { %v6404_v50 = vunpack.i.h.bf16 %v6402_v49  ;;  %v6403_v14 = vunpack.i.l.bf16 %v6402_v49  ;;  %5785 = vmatprep.mubr.msk.f32.mxu0 %vm436_vm3, %v1488_v41  ;;  %6142 = vmatprep.subr.bf16.mxu1 %v6141_v42  ;;  %v6407_v51 = vpop.permute.xlu0 %6406  ;;  %v1492_v23 = vmul.f32 %v6547_v48, %v6539_v21 }
 0x898   :  { %v6409_v53 = vunpack.i.h.bf16 %v6407_v51  ;;  %v6408_v54 = vunpack.i.l.bf16 %v6407_v51  ;;  %6144 = vmatpush3.bf16.msra.mxu1 %v6141_v42 }
 0x899   :  { %v6145_v55 = vpack.c.bf16 %v6404_v50, %v6403_v14  ;;  %5792 = vmatprep.mubr.msk.f32.mxu1 %vm436_vm3, %v1492_v23 }
 0x89a   :  { %v6151_v56 = vpack.c.bf16 %v6409_v53, %v6408_v54  ;;  %v1775_v57 = vpop.permute.xlu1 %1774  ;;  %5786 = vmatmul.mubr.msk.f32.vlgmr.msra.gmra.mrb[14].mxu0 %vm436_vm3, %v1490_v52 }
 0x89b   :  { %5793 = vmatmul.mubr.msk.f32.vlgmr.msra.gmra.mrb[22].mxu1 %vm436_vm3, %v1494_v1  ;;  %5796 = vmatpush3.msra.mxu0 %v1671_v33  ;;  %v1777_v22 = vpop.permute.xlu0 %1776 }
 0x89c   :  { %6147 = vmatprep.subr.msk.bf16.mxu1 %vm6844_vm2, %v6145_v55  ;;  %5807 = vmatprep.mubr.msk.f32.mxu1 %vm152_vm1, %v1775_v57 }
 0x89d   :  { %6153 = vmatprep.subr.msk.bf16.mxu0 %vm6844_vm2, %v6151_v56 }
 0x89e   :  { %v1866_v62 = vpop.permute.xlu1 %1865 }
 0x89f   :  { %v1868_v63 = vpop.permute.xlu0 %1867 }
 0x8a1   :  { %6150 = vmatpush3.bf16.xpose.msk.msra.mxu1 %vm6844_vm2, %v6145_v55 }
 0x8a8   :  { %5808 = vmatmul.mubr.msk.f32.vlgmr.msra.gmra.mrb[24].mxu1 %vm152_vm1, %v1777_v22 }
 0x96d   :  { %v5787_v58 = vpop.f32.mrb[14].mxu0 }
 0x96e   :  { %v1573_v59 = vpop.f32.mrb[15].mxu0  ;;  %v5794_v60 = vpop.f32.mrb[22].mxu1 }
 0x96f   :  { %v1660_v61 = vpop.f32.mrb[23].mxu1  ;;  %5797 = vmatprep.mubr.msk.f32.mxu0 %vm152_vm1, %v1573_v59 }
 0x970   :  { %5798 = vmatmul.mubr.msk.f32.vlgmr.msra.gmra.mrb[10].mxu0 %vm152_vm1, %v5787_v58 }
 0x971   :  { %6156 = vmatpush3.bf16.xpose.msk.msra.mxu0 %vm6844_vm2, %v6151_v56  ;;  %5800 = vmatprep.mubr.msk.f32.mxu0 %vm152_vm1, %v1660_v61 }
 0x974   :  { %5801 = vmatmul.mubr.msk.f32.gmra.mrb[12].mxu0 %vm152_vm1, %v5794_v60 }
 0x975   :  { %5814 = vmatprep.mubr.msk.f32.mxu0 %vm152_vm1, %v1866_v62 }
 0x978   :  { %5815 = vmatmul.mubr.msk.f32.vlgmr.msra.gmra.mrb[16].mxu0 %vm152_vm1, %v1868_v63 }
 0x97b   :  { %v5809_v3 = vpop.f32.mrb[24].mxu1 }
 0x97c   :  { %v1957_v5 = vmul.f32 0.35355338, %v5809_v3  ;;  %v1856_v6 = vpop.f32.mrb[25].mxu1 }
 0x97d   :  { %v1956_v7 = vmul.f32 0.35355338, %v1856_v6 }
 0x97e   :  { %v1963_v8 = vsel %vm436_vm3, %v1957_v5, -inf }
 0x97f   :  { %1964 = vmax.xlane.f32.xlu0 %v1963_v8  ;;  %v1960_v9 = vsel %vm436_vm3, %v1956_v7, -inf }
 0x980   :  { %1961 = vmax.xlane.f32.xlu1 %v1960_v9 }
 0xa0c   :  { %v1965_v10 = vpop.xlane.xlu0 %1964 }
 0xa0d   :  { %v1962_v11 = vpop.xlane.xlu1 %1961  ;;  %v1973_v12 = vsub.f32 %v1957_v5, %v1965_v10  ;;  %v2285_v5 = vsub.s32 1, %v6803_v16 }
 0xa0e   :  { %v1972_v13 = vsub.f32 %v1956_v7, %v1962_v11 }
 0xa0f   :  { %v1978_v19 = vmul.f32 1.442695, %v1973_v12  ;;  %v2286_v6 = vrot.slane %v6809_v18, %v2285_v5  ;;  %v6661_v18 = vld [vmem:[%s7592_s0] sm:$0xff] }
 0xa10   :  { %v1976_v20 = vmul.f32 1.442695, %v1972_v13 }
 0xa11   :  { %6548 = vpow2.f32 %v1978_v19 }
 0xa12   :  { %6550 = vpow2.f32 %v1976_v20 }
 0xa1b   :  { %v6549_v2 = vpop.eup %6548 }
 0xa1c   :  { %v6551_v29 = vpop.eup %6550  ;;  %v1987_v27 = vsel %vm436_vm3, %v6549_v2, 0.0 }
 0xa1d   :  { %v1984_v39 = vsel %vm436_vm3, %v6551_v29, 0.0 }
 0xa4b   :  { %v5816_v21 = vpop.f32.mrb[16].mxu0 }
 0xa4c   :  { %v1959_v24 = vmul.f32 0.35355338, %v5816_v21  ;;  %v1947_v25 = vpop.f32.mrb[17].mxu0  ;;  %v6660_v21 = vld [vmem:[%s7592_s0 + $0x8] sm:$0xff] }
 0xa4d   :  { %v1958_v0 = vmul.f32 0.35355338, %v1947_v25 }
 0xa4e   :  { %v1969_v35 = vsel %vm436_vm3, %v1959_v24, -inf }
 0xa4f   :  { %1970 = vmax.xlane.f32.xlu1 %v1969_v35  ;;  %v1966_v26 = vsel %vm436_vm3, %v1958_v0, -inf }
 0xa50   :  { %1967 = vmax.xlane.f32.xlu0 %v1966_v26 }
 0xa53   :  { %1988 = vadd.xlane.f32.xlu1 %v1987_v27 }
 0xa54   :  { %1985 = vadd.xlane.f32.xlu0 %v1984_v39 }
 0xadc   :  { %v1971_v30 = vpop.xlane.xlu1 %1970 }
 0xadd   :  { %v1975_v37 = vsub.f32 %v1959_v24, %v1971_v30  ;;  %v1968_v32 = vpop.xlane.xlu0 %1967 }
 0xade   :  { %v1974_v28 = vsub.f32 %v1958_v0, %v1968_v32 }
 0xadf   :  { %v1982_v36 = vmul.f32 1.442695, %v1975_v37 }
 0xae0   :  { %v1980_v15 = vmul.f32 1.442695, %v1974_v28  ;;  %v1989_v50 = vpop.xlane.xlu1 %1988 }
 0xae1   :  { %6552 = vpow2.f32 %v1982_v36  ;;  %v1986_v33 = vpop.xlane.xlu0 %1985 }
 0xae2   :  { %6554 = vpow2.f32 %v1980_v15 }
 0xae3   :  { %6556 = vrcp.f32 %v1986_v33 }
 0xae4   :  { %6558 = vrcp.f32 %v1989_v50 }
 0xaeb   :  { %v6553_v34 = vpop.eup %6552 }
 0xaec   :  { %v6555_v40 = vpop.eup %6554  ;;  %v1993_v41 = vsel %vm436_vm3, %v6553_v34, 0.0 }
 0xaed   :  { %1994 = vadd.xlane.f32.xlu1 %v1993_v41  ;;  %v1990_v42 = vsel %vm436_vm3, %v6555_v40, 0.0  ;;  %v6557_v48 = vpop.eup %6556 }
 0xaee   :  { %1991 = vadd.xlane.f32.xlu0 %v1990_v42  ;;  %v1997_v49 = vmul.f32 %v6557_v48, %v6551_v29  ;;  %v6559_v22 = vpop.eup %6558  ;;  %v6663_v29 = vld [vmem:[%s7592_s0 + $0x18] sm:$0xff] }
 0xaef   :  { %v1999_v58 = vmul.f32 %v6559_v22, %v6549_v2  ;;  %v6662_v2 = vld [vmem:[%s7592_s0 + $0x10] sm:$0xff] }
 0xaf0   :  { %5821 = vmatprep.mubr.msk.f32.mxu1 %vm436_vm3, %v1997_v49 }
 0xafe   :  { %6416 = vrot.lane.b32.xlu1 %v6832_v38, %s6705_s12 }
 0xb02   :  { %2179 = vrot.lane.b32.xlu1 %v6764_v4, %s6699_s30 }
 0xb04   :  { %6411 = vrot.lane.b32.xlu0 %v6818_v31, %s6705_s12 }
 0xb7a   :  { %v1995_v14 = vpop.xlane.xlu1 %1994 }
 0xb7b   :  { %6560 = vrcp.f32 %v1995_v14  ;;  %v1992_v51 = vpop.xlane.xlu0 %1991 }
 0xb7c   :  { %6562 = vrcp.f32 %v1992_v51 }
 0xb7e   :  { %v6417_v23 = vpop.permute.xlu1 %6416 }
 0xb7f   :  { %v6419_v52 = vunpack.i.h.bf16 %v6417_v23  ;;  %v6418_v53 = vunpack.i.l.bf16 %v6417_v23  ;;  %v6412_v54 = vpop.permute.xlu0 %6411 }
 0xb80   :  { %v6414_v55 = vunpack.i.h.bf16 %v6412_v54  ;;  %v6413_v1 = vunpack.i.l.bf16 %v6412_v54 }
 0xb81   :  { %v6161_v56 = vpack.c.bf16 %v6419_v52, %v6418_v53 }
 0xb82   :  { %v6157_v38 = vpack.c.bf16 %v6414_v55, %v6413_v1  ;;  %v2180_v57 = vpop.permute.xlu1 %2179  ;;  %v33_v55 = vld [vmem:[%s7594_s2 + $0x8] sm:$0xff]  ;;  %v35_v1 = vld [vmem:[%s7594_s2 + $0x18] sm:$0xff] }
 0xb83   :  { %6162 = vmatprep.subr.bf16.mxu0 %v6161_v56 }
 0xb84   :  { %6158 = vmatprep.subr.bf16.mxu1 %v6157_v38  ;;  %6164 = vmatpush3.bf16.msra.mxu0 %v6161_v56  ;;  %v6165_v56 = vpack.c.bf16 %v35_v1, %v33_v55 }
 0xb85   :  { %v6561_v4 = vpop.eup %6560  ;;  %6160 = vmatpush3.bf16.msra.mxu1 %v6157_v38  ;;  %5831 = vmatprep.subr.mxu0 %v2180_v57  ;;  %v37_v38 = vld [vmem:[%s7594_s2 + $0x28] sm:$0xff] }
 0xb86   :  { %v6563_v31 = vpop.eup %6562  ;;  %v2003_v60 = vmul.f32 %v6561_v4, %v6553_v34  ;;  %6166 = vmatprep.subr.bf16.mxu1 %v6165_v56  ;;  %v41_v4 = vld [vmem:[%s7596_s4] sm:$0xff] }
 0xb87   :  { %v2001_v59 = vmul.f32 %v6563_v31, %v6555_v40  ;;  %v42_v31 = vld [vmem:[%s7596_s4 + $0x8] sm:$0xff] }
 0xb88   :  { %5822 = vmatmul.mubr.msk.f32.vlgmr.msra.gmra.mrb[26].mxu1 %vm436_vm3, %v1999_v58  ;;  %v43_v58 = vld [vmem:[%s7596_s4 + $0x10] sm:$0xff] }
 0xb89   :  { %5828 = vmatprep.mubr.msk.f32.mxu0 %vm436_vm3, %v2001_v59  ;;  %6168 = vmatpush3.bf16.msra.mxu1 %v6165_v56  ;;  %v6173_v59 = vpack.c.bf16 %v42_v31, %v41_v4 }
 0xb8a   :  { %5829 = vmatmul.mubr.msk.f32.vlgmr.msra.gmra.mrb[18].mxu0 %vm436_vm3, %v2003_v60  ;;  %v44_v60 = vld [vmem:[%s7596_s4 + $0x18] sm:$0xff] }
 0xb8b   :  { %5832 = vmatpush3.msra.mxu0 %v2180_v57  ;;  %v39_v57 = vld [vmem:[%s7594_s2 + $0x38] sm:$0xff] }
 0xb8c   :  { %v6169_v22 = vpack.c.bf16 %v39_v57, %v37_v38  ;;  %6174 = vmatprep.subr.bf16.mxu0 %v6173_v59 }
 0xb8e   :  { %6170 = vmatprep.subr.bf16.mxu1 %v6169_v22 }
 0xb8f   :  { %6172 = vmatpush3.bf16.msra.mxu1 %v6169_v22  ;;  %v2471_v22 = vsub.s32 5, %v6803_v16 }
 0xc5b   :  { %v5823_v61 = vpop.f32.mrb[26].mxu1 }
 0xc5c   :  { %v2082_v62 = vpop.f32.mrb[27].mxu1 }
 0xc5d   :  { %v5830_v63 = vpop.f32.mrb[18].mxu0  ;;  %5833 = vmatprep.mubr.msk.f32.mxu0 %vm152_vm1, %v2082_v62  ;;  %v45_v62 = vld [vmem:[%s7596_s4 + $0x20] sm:$0xff] }
 0xc5e   :  { %v2169_v3 = vpop.f32.mrb[19].mxu0  ;;  %5834 = vmatmul.mubr.msk.f32.vlgmr.msra.gmra.mrb[10].mxu0 %vm152_vm1, %v5823_v61  ;;  %v6177_v61 = vpack.c.bf16 %v44_v60, %v43_v58 }
 0xc5f   :  { %5836 = vmatprep.mubr.msk.f32.mxu0 %vm152_vm1, %v2169_v3  ;;  %6176 = vmatpush3.bf16.msra.mxu0 %v6173_v59 }
 0xc60   :  { %6178 = vmatprep.subr.bf16.mxu0 %v6177_v61 }
 0xc62   :  { %5837 = vmatmul.mubr.msk.f32.gmra.mrb[12].mxu0 %vm152_vm1, %v5830_v63  ;;  %v46_v63 = vld [vmem:[%s7596_s4 + $0x28] sm:$0xff] }
 0xc63   :  { %v6181_v3 = vpack.c.bf16 %v46_v63, %v45_v62  ;;  %6180 = vmatpush3.bf16.msra.mxu0 %v6177_v61 }
 0xc65   :  { %6182 = vmatprep.subr.bf16.mxu0 %v6181_v3 }
 0xc67   :  { %6184 = vmatpush3.bf16.msra.mxu0 %v6181_v3 }
 0xd31   :  { %v5835_v7 = vpop.f32.mrb[10].mxu0 }
 0xd32   :  { %v6301_v8 = vadd.f32 %v5835_v7, %v6956_v44  ;;  %v2260_v9 = vpop.f32.mrb[11].mxu0 }
 0xd33   :  { %v6302_v10 = vadd.f32 %v2260_v9, %v6958_v45 }
 0xd34   :  { %v2288_v11 = vadd.f32 %v6301_v8, %v2286_v6 }
 0xd35   :  { %v2287_v12 = vadd.f32 %v6302_v10, %v2286_v6  ;;  %v5838_v13 = vpop.f32.mrb[12].mxu0 }
 0xd36   :  { %v6303_v19 = vadd.f32 %v5838_v13, %v6960_v46  ;;  %v2270_v20 = vpop.f32.mrb[13].mxu0  ;;  %v2292_v24 = vadd.f32 %v6660_v21, %v2288_v11 }
 0xd37   :  { %v6304_v25 = vadd.f32 %v2270_v20, %v6962_v47  ;;  %v2291_v44 = vadd.f32 %v6661_v18, %v2287_v12  ;;  %v2358_v18 = vsub.s32 3, %v6803_v16 }
 0xd38   :  { %v2298_v45 = vsel %vm54_vm0, %v2292_v24, 0.0  ;;  %v2290_v0 = vadd.f32 %v6303_v19, %v2286_v6 }
 0xd39   :  { %v2289_v35 = vadd.f32 %v6304_v25, %v2286_v6  ;;  %2299 = vadd.xlane.f32.xlu1 %v2298_v45  ;;  %v2295_v46 = vsel %vm54_vm0, %v2291_v44, 0.0 }
 0xd3a   :  { %2296 = vadd.xlane.f32.xlu0 %v2295_v46  ;;  %v2294_v27 = vadd.f32 %v6663_v29, %v2290_v0 }
 0xd3b   :  { %v2293_v26 = vadd.f32 %v6662_v2, %v2289_v35 }
 0xd3c   :  { %v2304_v39 = vsel %vm54_vm0, %v2294_v27, 0.0 }
 0xd3d   :  { %v2301_v47 = vsel %vm54_vm0, %v2293_v26, 0.0 }
 0xd3e   :  { %2302 = vadd.xlane.f32.xlu0 %v2301_v47 }
 0xd42   :  { %2305 = vadd.xlane.f32.xlu0 %v2304_v39 }
 0xdc6   :  { %v2300_v30 = vpop.xlane.xlu1 %2299 }
 0xdc7   :  { %v2309_v37 = vmul.f32 0.03125, %v2300_v30  ;;  %v2297_v32 = vpop.xlane.xlu0 %2296 }
 0xdc8   :  { %v2308_v28 = vmul.f32 0.03125, %v2297_v32 }
 0xdc9   :  { %v7072_v36 = vsub.f32 %v2292_v24, %v2309_v37  ;;  %v2350_v24 = vsub.s32 2, %v6803_v16 }
 0xdca   :  { %v7074_v15 = vsub.f32 %v2291_v44, %v2308_v28  ;;  %v7127_v44 = vld [vmem:[%s7597_s5] sm:$0xff] }
 0xdcb   :  { %v2303_v33 = vpop.xlane.xlu0 %2302  ;;  %v2317_v34 = vmul.f32 %v7072_v36, %v7072_v36  ;;  %v2351_v45 = vrot.slane %v7127_v44, %v2350_v24  ;;  %v2472_v4 = vrot.slane %v7127_v44, %v2471_v22 }
 0xdcc   :  { %v2310_v40 = vmul.f32 0.03125, %v2303_v33  ;;  %v2316_v41 = vmul.f32 %v7074_v15, %v7074_v15 }
 0xdcd   :  { %v2323_v42 = vsel %vm54_vm0, %v2317_v34, 0.0 }
 0xdce   :  { %v7081_v48 = vsub.f32 %v2293_v26, %v2310_v40  ;;  %2324 = vadd.xlane.f32.xlu0 %v2323_v42  ;;  %v2320_v49 = vsel %vm54_vm0, %v2316_v41, 0.0  ;;  %v2359_v26 = vrot.slane %v7127_v44, %v2358_v18  ;;  %v47_v40 = vld [vmem:[%s7596_s4 + $0x30] sm:$0xff]  ;;  %v48_v41 = vld [vmem:[%s7596_s4 + $0x38] sm:$0xff] }
 0xdcf   :  { %2321 = vadd.xlane.f32.xlu1 %v2320_v49  ;;  %v2306_v50 = vpop.xlane.xlu0 %2305  ;;  %v6185_v42 = vpack.c.bf16 %v48_v41, %v47_v40  ;;  %v7184_v41 = vld [vmem:[%s7594_s2 + $0x60] sm:$0xff] }
 0xdd0   :  { %v2311_v14 = vmul.f32 0.03125, %v2306_v50  ;;  %v2318_v51 = vmul.f32 %v7081_v48, %v7081_v48 }
 0xdd1   :  { %6186 = vmatprep.subr.bf16.mxu0 %v6185_v42 }
 0xdd2   :  { %v7086_v23 = vsub.f32 %v2294_v27, %v2311_v14  ;;  %v2326_v52 = vsel %vm54_vm0, %v2318_v51, 0.0  ;;  %6188 = vmatpush3.bf16.msra.mxu0 %v6185_v42  ;;  %v7189_v42 = vld [vmem:[%s7594_s2 + $0x70] sm:$0xff] }
 0xdd3   :  { %2327 = vadd.xlane.f32.xlu1 %v2326_v52 }
 0xdd4   :  { %v2319_v53 = vmul.f32 %v7086_v23, %v7086_v23 }
 0xdd6   :  { %v2329_v54 = vsel %vm54_vm0, %v2319_v53, 0.0 }
 0xdd7   :  { %2330 = vadd.xlane.f32.xlu0 %v2329_v54 }
 0xe5b   :  { %v2325_v6 = vpop.xlane.xlu0 %2324 }
 0xe5c   :  { %v2333_v7 = vmul.f32 0.03125, %v2325_v6  ;;  %v2322_v8 = vpop.xlane.xlu1 %2321 }
 0xe5d   :  { %v2332_v9 = vmul.f32 0.03125, %v2322_v8 }
 0xe5e   :  { %v2337_v10 = vadd.f32 1e-05, %v2333_v7 }
 0xe5f   :  { %v2336_v11 = vadd.f32 1e-05, %v2332_v9 }
 0xe60   :  { %6564 = vrsqrt.f32 %v2337_v10  ;;  %v2328_v12 = vpop.xlane.xlu1 %2327 }
 0xe61   :  { %6566 = vrsqrt.f32 %v2336_v11  ;;  %v2334_v13 = vmul.f32 0.03125, %v2328_v12 }
 0xe63   :  { %v2338_v19 = vadd.f32 1e-05, %v2334_v13 }
 0xe64   :  { %v2331_v20 = vpop.xlane.xlu0 %2330 }
 0xe65   :  { %6568 = vrsqrt.f32 %v2338_v19  ;;  %v2335_v21 = vmul.f32 0.03125, %v2331_v20 }
 0xe67   :  { %v2339_v25 = vadd.f32 1e-05, %v2335_v21 }
 0xe69   :  { %6570 = vrsqrt.f32 %v2339_v25 }
 0xe6a   :  { %v6565_v0 = vpop.eup %6564 }
 0xe6b   :  { %v6567_v35 = vpop.eup %6566  ;;  %v2345_v46 = vmul.f32 %v6565_v0, %v7072_v36 }
 0xe6c   :  { %v2344_v2 = vmul.f32 %v6567_v35, %v7074_v15 }
 0xe6d   :  { %v2353_v47 = vmul.f32 %v2351_v45, %v2345_v46 }
 0xe6e   :  { %v2352_v29 = vmul.f32 %v2351_v45, %v2344_v2 }
 0xe6f   :  { %v6569_v27 = vpop.eup %6568  ;;  %v2361_v37 = vadd.f32 %v2359_v26, %v2353_v47 }
 0xe70   :  { %v2360_v39 = vadd.f32 %v2359_v26, %v2352_v29  ;;  %v2346_v30 = vmul.f32 %v6569_v27, %v7081_v48  ;;  %v2366_v48 = vsub.s32 4, %v6803_v16 }
 0xe72   :  { %5847 = vmatprep.mubr.msk.f32.mxu1 %vm54_vm0, %v2360_v39  ;;  %v2354_v32 = vmul.f32 %v2351_v45, %v2346_v30  ;;  %v2367_v49 = vrot.slane %v7127_v44, %v2366_v48 }
 0xe73   :  { %v6571_v28 = vpop.eup %6570  ;;  %5848 = vmatmul.mubr.msk.f32.vlgmr.msra.gmra.mrb[28].mxu1 %vm54_vm0, %v2361_v37 }
 0xe74   :  { %v2362_v36 = vadd.f32 %v2359_v26, %v2354_v32  ;;  %v2347_v15 = vmul.f32 %v6571_v28, %v7086_v23 }
 0xe76   :  { %5850 = vmatprep.mubr.msk.f32.mxu1 %vm54_vm0, %v2362_v36  ;;  %v2355_v33 = vmul.f32 %v2351_v45, %v2347_v15 }
 0xe78   :  { %v2363_v34 = vadd.f32 %v2359_v26, %v2355_v33  ;;  %v7172_v33 = vld [vmem:[%s7594_s2 + $0x40] sm:$0xff] }
 0xe7a   :  { %5851 = vmatmul.mubr.msk.f32.gmra.mrb[30].mxu1 %vm54_vm0, %v2363_v34 }
 0xf46   :  { %v5849_v50 = vpop.f32.mrb[28].mxu1 }
 0xf47   :  { %v2452_v14 = vadd.f32 %v5849_v50, %v2367_v49  ;;  %v2446_v51 = vpop.f32.mrb[29].mxu1  ;;  %v5349_v50 = vld [vmem:[%s7595_s3 + $0x8] sm:$0xff] }
 0xf48   :  { %v2447_v23 = vadd.f32 %v2446_v51, %v2367_v49 }
 0xf49   :  { %v2466_v53 = vmax.f32 %v2452_v14, 0.0 }
 0xf4a   :  { %v2465_v52 = vmax.f32 %v2447_v23, 0.0 }
 0xf4c   :  { %5869 = vmatprep.mubr.msk.f32.mxu0 %vm2473_vm4, %v2465_v52 }
 0xf4d   :  { %v5852_v54 = vpop.f32.mrb[30].mxu1  ;;  %5870 = vmatmul.mubr.msk.f32.vlgmr.msra.gmra.mrb[20].mxu0 %vm2473_vm4, %v2466_v53 }
 0xf4e   :  { %v2462_v55 = vadd.f32 %v5852_v54, %v2367_v49  ;;  %v2456_v1 = vpop.f32.mrb[31].mxu1 }
 0xf4f   :  { %v2457_v56 = vadd.f32 %v2456_v1, %v2367_v49  ;;  %v6193_v49 = vpack.c.bf16 %v7189_v42, %v7184_v41 }
 0xf50   :  { %v2468_v57 = vmax.f32 %v2462_v55, 0.0 }
 0xf51   :  { %v2467_v38 = vmax.f32 %v2457_v56, 0.0 }
 0xf53   :  { %5872 = vmatprep.mubr.msk.f32.mxu0 %vm2473_vm4, %v2467_v38 }
 0xf54   :  { %5873 = vmatmul.mubr.msk.f32.gmra.mrb[22].mxu0 %vm2473_vm4, %v2468_v57  ;;  %v2629_v57 = vsub.s32 6, %v6803_v16 }
0x1020   :  { %v5871_v31 = vpop.f32.mrb[20].mxu0 }
0x1021   :  { %v2558_v58 = vadd.f32 %v5871_v31, %v2472_v4  ;;  %v2552_v59 = vpop.f32.mrb[21].mxu0 }
0x1022   :  { %v2553_v60 = vadd.f32 %v2552_v59, %v2472_v4  ;;  %v2630_v59 = vrot.slane %v7127_v44, %v2629_v57 }
0x1023   :  { %v2572_v61 = vadd.f32 %v2558_v58, %v2361_v37  ;;  %v2637_v58 = vsub.s32 7, %v6803_v16 }
0x1024   :  { %v2571_v62 = vadd.f32 %v2553_v60, %v2360_v39 }
0x1025   :  { %v2578_v63 = vsel %vm54_vm0, %v2572_v61, 0.0 }
0x1026   :  { %2579 = vadd.xlane.f32.xlu0 %v2578_v63  ;;  %v2575_v3 = vsel %vm54_vm0, %v2571_v62, 0.0 }
0x1027   :  { %2576 = vadd.xlane.f32.xlu1 %v2575_v3  ;;  %v5874_v6 = vpop.f32.mrb[22].mxu0  ;;  %v2638_v3 = vrot.slane %v7127_v44, %v2637_v58 }
0x1028   :  { %v2568_v7 = vadd.f32 %v5874_v6, %v2472_v4  ;;  %v2562_v8 = vpop.f32.mrb[23].mxu0 }
0x1029   :  { %v2563_v9 = vadd.f32 %v2562_v8, %v2472_v4 }
0x102a   :  { %v2574_v10 = vadd.f32 %v2568_v7, %v2363_v34  ;;  %v7177_v34 = vld [vmem:[%s7594_s2 + $0x50] sm:$0xff] }
0x102b   :  { %v2573_v11 = vadd.f32 %v2563_v9, %v2362_v36  ;;  %v6189_v40 = vpack.c.bf16 %v7177_v34, %v7172_v33 }
0x102c   :  { %v2584_v12 = vsel %vm54_vm0, %v2574_v10, 0.0 }
0x102d   :  { %2585 = vadd.xlane.f32.xlu0 %v2584_v12  ;;  %v2581_v13 = vsel %vm54_vm0, %v2573_v11, 0.0  ;;  %6190 = vmatprep.subr.bf16.mxu1 %v6189_v40 }
0x102e   :  { %2582 = vadd.xlane.f32.xlu1 %v2581_v13  ;;  %6192 = vmatpush3.bf16.msra.mxu1 %v6189_v40 }
0x102f   :  { %6194 = vmatprep.subr.bf16.mxu1 %v6193_v49 }
0x1032   :  { %6196 = vmatpush3.bf16.msra.mxu1 %v6193_v49 }
0x1033   :  { %5889 = vmatprep.subr.mxu1 %v5349_v50 }
0x10b3   :  { %v2580_v19 = vpop.xlane.xlu0 %2579 }
0x10b4   :  { %v2588_v20 = vmul.f32 0.03125, %v2580_v19  ;;  %v2577_v21 = vpop.xlane.xlu1 %2576 }
0x10b5   :  { %v2587_v25 = vmul.f32 0.03125, %v2577_v21 }
0x10b6   :  { %v2592_v45 = vsub.f32 %v2572_v61, %v2588_v20 }
0x10b7   :  { %v2591_v0 = vsub.f32 %v2571_v62, %v2587_v25  ;;  %v6665_v25 = vld [vmem:[%s7593_s1] sm:$0xff] }
0x10b8   :  { %v2596_v35 = vmul.f32 %v2592_v45, %v2592_v45 }
0x10b9   :  { %v2595_v46 = vmul.f32 %v2591_v0, %v2591_v0 }
0x10ba   :  { %v2586_v2 = vpop.xlane.xlu0 %2585  ;;  %v2602_v26 = vsel %vm54_vm0, %v2596_v35, 0.0  ;;  %v6668_v35 = vld [vmem:[%s7593_s1 + $0x18] sm:$0xff] }
0x10bb   :  { %v2590_v47 = vmul.f32 0.03125, %v2586_v2  ;;  %v2583_v29 = vpop.xlane.xlu1 %2582  ;;  %2603 = vadd.xlane.f32.xlu0 %v2602_v26  ;;  %v2599_v27 = vsel %vm54_vm0, %v2595_v46, 0.0  ;;  %v7239_v46 = vld [vmem:[%s7597_s5 + $0x8] sm:$0xff] }
0x10bc   :  { %v2589_v39 = vmul.f32 0.03125, %v2583_v29  ;;  %2600 = vadd.xlane.f32.xlu1 %v2599_v27  ;;  %v2668_v2 = vrot.slane %v7239_v46, %v52_v17 }
0x10bd   :  { %v2594_v30 = vsub.f32 %v2574_v10, %v2590_v47 }
0x10be   :  { %v2593_v37 = vsub.f32 %v2573_v11, %v2589_v39 }
0x10bf   :  { %v2598_v32 = vmul.f32 %v2594_v30, %v2594_v30 }
0x10c0   :  { %v2597_v28 = vmul.f32 %v2593_v37, %v2593_v37 }
0x10c1   :  { %v2608_v36 = vsel %vm54_vm0, %v2598_v32, 0.0 }
0x10c2   :  { %2609 = vadd.xlane.f32.xlu0 %v2608_v36  ;;  %v2605_v15 = vsel %vm54_vm0, %v2597_v28, 0.0 }
0x10c3   :  { %2606 = vadd.xlane.f32.xlu1 %v2605_v15 }
0x1148   :  { %v2604_v14 = vpop.xlane.xlu0 %2603 }
0x1149   :  { %v2612_v51 = vmul.f32 0.03125, %v2604_v14  ;;  %v2601_v23 = vpop.xlane.xlu1 %2600 }
0x114a   :  { %v2611_v52 = vmul.f32 0.03125, %v2601_v23 }
0x114b   :  { %v2616_v53 = vadd.f32 1e-05, %v2612_v51 }
0x114c   :  { %v2615_v54 = vadd.f32 1e-05, %v2611_v52 }
0x114d   :  { %6572 = vrsqrt.f32 %v2616_v53 }
0x114e   :  { %6574 = vrsqrt.f32 %v2615_v54 }
0x114f   :  { %v2610_v55 = vpop.xlane.xlu0 %2609 }
0x1150   :  { %v2614_v1 = vmul.f32 0.03125, %v2610_v55  ;;  %v2607_v56 = vpop.xlane.xlu1 %2606 }
0x1151   :  { %v2613_v38 = vmul.f32 0.03125, %v2607_v56 }
0x1152   :  { %v2618_v4 = vadd.f32 1e-05, %v2614_v1 }
0x1153   :  { %v2617_v31 = vadd.f32 1e-05, %v2613_v38 }
0x1154   :  { %6576 = vrsqrt.f32 %v2618_v4 }
0x1155   :  { %6578 = vrsqrt.f32 %v2617_v31 }
0x1157   :  { %v6573_v60 = vpop.eup %6572 }
0x1158   :  { %v6575_v61 = vpop.eup %6574  ;;  %v2624_v62 = vmul.f32 %v6573_v60, %v2592_v45  ;;  %v6666_v45 = vld [vmem:[%s7593_s1 + $0x8] sm:$0xff] }
0x1159   :  { %v2623_v63 = vmul.f32 %v6575_v61, %v2591_v0  ;;  %v6667_v0 = vld [vmem:[%s7593_s1 + $0x10] sm:$0xff] }
0x115a   :  { %v2632_v6 = vmul.f32 %v2630_v59, %v2624_v62 }
0x115b   :  { %v2631_v7 = vmul.f32 %v2630_v59, %v2623_v63 }
0x115c   :  { %v7206_v10 = vadd.f32 %v2638_v3, %v2632_v6 }
0x115d   :  { %v7204_v8 = vadd.f32 %v2638_v3, %v2631_v7 }
0x115e   :  { %v6577_v9 = vpop.eup %6576 }
0x115f   :  { %v6579_v11 = vpop.eup %6578  ;;  %5883 = vmatprep.mubr.msk.f32.mxu1 %vm54_vm0, %v7204_v8  ;;  %v2626_v12 = vmul.f32 %v6577_v9, %v2594_v30 }
0x1160   :  { %5884 = vmatmul.mubr.msk.f32.vlgmr.msra.gmra.mrb[32].mxu1 %vm54_vm0, %v7206_v10  ;;  %v2625_v13 = vmul.f32 %v6579_v11, %v2593_v37 }
0x1161   :  { %v2634_v19 = vmul.f32 %v2630_v59, %v2626_v12  ;;  %5890 = vmatpush3.msra.mxu1 %v5349_v50 }
0x1162   :  { %v2633_v20 = vmul.f32 %v2630_v59, %v2625_v13 }
0x1163   :  { %v7214_v21 = vadd.f32 %v2638_v3, %v2634_v19 }
0x1164   :  { %v7212_v44 = vadd.f32 %v2638_v3, %v2633_v20 }
0x1166   :  { %5886 = vmatprep.mubr.msk.f32.mxu1 %vm54_vm0, %v7212_v44 }
0x1167   :  { %5887 = vmatmul.mubr.msk.f32.gmra.mrb[34].mxu1 %vm54_vm0, %v7214_v21 }
0x1168   :  { %5891 = vmatprep.mubr.msk.f32.mxu1 %vm152_vm1, %v6665_v25 }
0x116b   :  { %5892 = vmatmul.mubr.msk.f32.vlgmr.msra.gmra.mrb[36].mxu1 %vm152_vm1, %v6666_v45 }
0x116c   :  { %5894 = vmatprep.mubr.msk.f32.mxu1 %vm152_vm1, %v6667_v0 }
0x116f   :  { %5895 = vmatmul.mubr.msk.f32.gmra.mrb[38].mxu1 %vm152_vm1, %v6668_v35 }
0x1233   :  { %v5885_v26 = vpop.f32.mrb[32].mxu1 }
0x1234   :  { %v2753_v47 = vadd.f32 %v5885_v26, %v2668_v2  ;;  %v2747_v29 = vpop.f32.mrb[33].mxu1 }
0x1235   :  { %v2748_v27 = vadd.f32 %v2747_v29, %v2668_v2 }
0x1237   :  { %v7244_v39 = vpack.i.bf16 %v2753_v47, %v2748_v27 }
0x123a   :  { %v5888_v30 = vpop.f32.mrb[34].mxu1 }
0x123b   :  { %v2763_v37 = vadd.f32 %v5888_v30, %v2668_v2  ;;  %v2757_v32 = vpop.f32.mrb[35].mxu1 }
0x123c   :  { %v2758_v28 = vadd.f32 %v2757_v32, %v2668_v2 }
0x123e   :  { %v5893_v36 = vpop.f32.mrb[36].mxu1  ;;  %v7246_v15 = vpack.i.bf16 %v2763_v37, %v2758_v28 }
0x123f   :  { %v7248_v40 = vadd.f32 %v5893_v36, %v2753_v47  ;;  %v2832_v49 = vpop.f32.mrb[37].mxu1 }
0x1240   :  { %v7250_v50 = vadd.f32 %v2832_v49, %v2748_v27 }
0x1242   :  { %v5896_v14 = vpop.f32.mrb[38].mxu1  ;;  %5901 = vmatprep.mubr.msk.f32.mxu0 %vm152_vm1, %v7250_v50  ;;  %v7256_v17 = vpack.i.bf16 %v7248_v40, %v7250_v50 }
0x1243   :  { %v7258_v51 = vadd.f32 %v5896_v14, %v2763_v37  ;;  %v2842_v23 = vpop.f32.mrb[39].mxu1 }
0x1244   :  { %v7260_v52 = vadd.f32 %v2842_v23, %v2758_v28  ;;  %6426 = vrot.lane.b32.xlu0 %v7256_v17, %s6694_s25 }
0x1246   :  { %5908 = vmatprep.mubr.msk.f32.mxu1 %vm152_vm1, %v7260_v52  ;;  %v7268_v53 = vpack.i.bf16 %v7258_v51, %v7260_v52 }
0x1248   :  { %6421 = vrot.lane.b32.xlu1 %v7268_v53, %s6694_s25 }
0x12b6   :  { %v6427_v54 = vpop.permute.xlu0 %6426 }
0x12b7   :  { %v6429_v55 = vunpack.i.h.bf16 %v6427_v54  ;;  %v6428_v1 = vunpack.i.l.bf16 %v6427_v54 }
0x12b9   :  { %v6197_v56 = vpack.c.bf16 %v6429_v55, %v6428_v1 }
0x12ba   :  { %v6422_v38 = vpop.permute.xlu1 %6421 }
0x12bb   :  { %v6424_v4 = vunpack.i.h.bf16 %v6422_v38  ;;  %v6423_v31 = vunpack.i.l.bf16 %v6422_v38  ;;  %6199 = vmatprep.subr.msk.bf16.mxu0 %vm6844_vm2, %v6197_v56 }
0x12bc   :  { %6202 = vmatpush3.bf16.xpose.msk.msra.mxu0 %vm6844_vm2, %v6197_v56 }
0x12bd   :  { %v6203_v59 = vpack.c.bf16 %v6424_v4, %v6423_v31 }
0x12bf   :  { %6205 = vmatprep.subr.msk.bf16.mxu1 %vm6844_vm2, %v6203_v59 }
0x12c0   :  { %6208 = vmatpush3.bf16.xpose.msk.msra.mxu1 %vm6844_vm2, %v6203_v59 }
0x12c3   :  { %5902 = vmatmul.mubr.msk.f32.vlgmr.msra.gmra.mrb[24].mxu0 %vm152_vm1, %v7248_v40 }
0x12c7   :  { %5909 = vmatmul.mubr.msk.f32.vlgmr.msra.gmra.mrb[40].mxu1 %vm152_vm1, %v7258_v51 }
0x1396   :  { %v5903_v60 = vpop.f32.mrb[24].mxu0 }
0x1397   :  { %v2935_v61 = vpop.f32.mrb[25].mxu0  ;;  %v3034_v37 = vmul.f32 0.35355338, %v5903_v60 }
0x1398   :  { %v3033_v30 = vmul.f32 0.35355338, %v2935_v61 }
0x1399   :  { %v3040_v28 = vsel %vm436_vm3, %v3034_v37, -inf }
0x139a   :  { %v5910_v62 = vpop.f32.mrb[40].mxu1  ;;  %v3037_v32 = vsel %vm436_vm3, %v3033_v30, -inf }
0x139b   :  { %v3036_v63 = vmul.f32 0.35355338, %v5910_v62  ;;  %v3024_v3 = vpop.f32.mrb[41].mxu1 }
0x139c   :  { %v3035_v6 = vmul.f32 0.35355338, %v3024_v3 }
0x139d   :  { %v3046_v7 = vsel %vm436_vm3, %v3036_v63, -inf }
0x139e   :  { %3047 = vmax.xlane.f32.xlu0 %v3046_v7  ;;  %v3043_v9 = vsel %vm436_vm3, %v3035_v6, -inf }
0x139f   :  { %3044 = vmax.xlane.f32.xlu1 %v3043_v9 }
0x13b0   :  { %6431 = vrot.lane.b32.xlu1 %v7246_v15, %s6695_s26 }
0x13b4   :  { %3350 = vrot.lane.b32.xlu1 %v7260_v52, %s6697_s28 }
0x142b   :  { %v3048_v11 = vpop.xlane.xlu0 %3047 }
0x142c   :  { %v3052_v12 = vsub.f32 %v3036_v63, %v3048_v11  ;;  %v3045_v13 = vpop.xlane.xlu1 %3044 }
0x142d   :  { %v3051_v19 = vsub.f32 %v3035_v6, %v3045_v13 }
0x142e   :  { %v3059_v20 = vmul.f32 1.442695, %v3052_v12 }
0x142f   :  { %v3057_v25 = vmul.f32 1.442695, %v3051_v19 }
0x1430   :  { %6580 = vpow2.f32 %v3059_v20  ;;  %v6432_v45 = vpop.permute.xlu1 %6431 }
0x1431   :  { %6582 = vpow2.f32 %v3057_v25  ;;  %v6434_v0 = vunpack.i.h.bf16 %v6432_v45  ;;  %v6433_v35 = vunpack.i.l.bf16 %v6432_v45 }
0x1433   :  { %v6213_v2 = vpack.c.bf16 %v6434_v0, %v6433_v35 }
0x1434   :  { %v3351_v36 = vpop.permute.xlu1 %3350 }
0x1435   :  { %6214 = vmatprep.subr.bf16.mxu1 %v6213_v2 }
0x1436   :  { %6216 = vmatpush3.bf16.msra.mxu1 %v6213_v2 }
0x143a   :  { %v6581_v26 = vpop.eup %6580 }
0x143b   :  { %v6583_v47 = vpop.eup %6582  ;;  %v3070_v29 = vsel %vm436_vm3, %v6581_v26, 0.0 }
0x143c   :  { %3071 = vadd.xlane.f32.xlu0 %v3070_v29  ;;  %v3067_v27 = vsel %vm436_vm3, %v6583_v47, 0.0 }
0x143d   :  { %3068 = vadd.xlane.f32.xlu1 %v3067_v27 }
0x144e   :  { %3352 = vrot.lane.b32.xlu1 %v7258_v51, %s6697_s28 }
0x1452   :  { %6436 = vrot.lane.b32.xlu0 %v7268_v53, %s6696_s27 }
0x1471   :  { %3038 = vmax.xlane.f32.xlu0 %v3037_v32 }
0x1472   :  { %3041 = vmax.xlane.f32.xlu1 %v3040_v28 }
0x1483   :  { %6441 = vrot.lane.b32.xlu1 %v7244_v39, %s6695_s26 }
0x1487   :  { %3259 = vrot.lane.b32.xlu1 %v7250_v50, %s6697_s28 }
0x148b   :  { %3261 = vrot.lane.b32.xlu1 %v7248_v40, %s6697_s28 }
0x14c9   :  { %v3072_v49 = vpop.xlane.xlu0 %3071 }
0x14ca   :  { %6584 = vrcp.f32 %v3072_v49  ;;  %v3069_v14 = vpop.xlane.xlu1 %3068 }
0x14cb   :  { %6586 = vrcp.f32 %v3069_v14 }
0x14cd   :  { %v6437_v23 = vpop.permute.xlu0 %6436 }
0x14ce   :  { %v6439_v54 = vunpack.i.h.bf16 %v6437_v23  ;;  %v6438_v55 = vunpack.i.l.bf16 %v6437_v23  ;;  %v3353_v59 = vpop.permute.xlu1 %3352 }
0x14d0   :  { %v6223_v1 = vpack.c.bf16 %v6439_v54, %v6438_v55 }
0x14d2   :  { %6225 = vmatprep.subr.msk.bf16.mxu1 %vm6844_vm2, %v6223_v1 }
0x14d4   :  { %v6585_v56 = vpop.eup %6584 }
0x14d5   :  { %v6587_v38 = vpop.eup %6586  ;;  %v3080_v31 = vmul.f32 %v6585_v56, %v6581_v26 }
0x14d6   :  { %v3078_v4 = vmul.f32 %v6587_v38, %v6583_v47 }
0x14d8   :  { %5922 = vmatprep.mubr.msk.f32.mxu1 %vm436_vm3, %v3078_v4 }
0x14d9   :  { %5923 = vmatmul.mubr.msk.f32.vlgmr.msra.gmra.mrb[42].mxu1 %vm436_vm3, %v3080_v31 }
0x14da   :  { %6228 = vmatpush3.bf16.xpose.msk.msra.mxu1 %vm6844_vm2, %v6223_v1  ;;  %5936 = vmatprep.mubr.msk.f32.mxu1 %vm152_vm1, %v3351_v36 }
0x14e1   :  { %5937 = vmatmul.mubr.msk.f32.vlgmr.msra.gmra.mrb[44].mxu1 %vm152_vm1, %v3353_v59 }
0x14fe   :  { %v3039_v60 = vpop.xlane.xlu0 %3038 }
0x14ff   :  { %v3049_v61 = vsub.f32 %v3033_v30, %v3039_v60  ;;  %v3042_v62 = vpop.xlane.xlu1 %3041 }
0x1500   :  { %v3050_v63 = vsub.f32 %v3034_v37, %v3042_v62 }
0x1501   :  { %v3053_v3 = vmul.f32 1.442695, %v3049_v61 }
0x1502   :  { %v3055_v6 = vmul.f32 1.442695, %v3050_v63 }
0x1503   :  { %6588 = vpow2.f32 %v3053_v3  ;;  %v6442_v7 = vpop.permute.xlu1 %6441 }
0x1504   :  { %v6444_v9 = vunpack.i.h.bf16 %v6442_v7  ;;  %v6443_v11 = vunpack.i.l.bf16 %v6442_v7  ;;  %6590 = vpow2.f32 %v3055_v6 }
0x1506   :  { %v6209_v12 = vpack.c.bf16 %v6444_v9, %v6443_v11 }
0x1507   :  { %v3260_v36 = vpop.permute.xlu1 %3259 }
0x1508   :  { %6210 = vmatprep.subr.bf16.mxu0 %v6209_v12 }
0x1509   :  { %6212 = vmatpush3.bf16.msra.mxu0 %v6209_v12 }
0x150b   :  { %v3262_v14 = vpop.permute.xlu1 %3261 }
0x150d   :  { %v6589_v13 = vpop.eup %6588 }
0x150e   :  { %v3061_v19 = vsel %vm436_vm3, %v6589_v13, 0.0  ;;  %v6591_v20 = vpop.eup %6590 }
0x150f   :  { %3062 = vadd.xlane.f32.xlu0 %v3061_v19  ;;  %v3064_v25 = vsel %vm436_vm3, %v6591_v20, 0.0 }
0x1513   :  { %3065 = vadd.xlane.f32.xlu0 %v3064_v25 }
0x1529   :  { %6446 = vrot.lane.b32.xlu0 %v7256_v17, %s6696_s27 }
0x159c   :  { %v3063_v45 = vpop.xlane.xlu0 %3062 }
0x159d   :  { %6592 = vrcp.f32 %v3063_v45 }
0x15a0   :  { %v3066_v0 = vpop.xlane.xlu0 %3065 }
0x15a1   :  { %6594 = vrcp.f32 %v3066_v0 }
0x15a4   :  { %v6447_v35 = vpop.permute.xlu0 %6446 }
0x15a5   :  { %v6449_v2 = vunpack.i.h.bf16 %v6447_v35  ;;  %v6448_v26 = vunpack.i.l.bf16 %v6447_v35 }
0x15a7   :  { %v6593_v47 = vpop.eup %6592  ;;  %v6217_v29 = vpack.c.bf16 %v6449_v2, %v6448_v26 }
0x15a8   :  { %v3074_v27 = vmul.f32 %v6593_v47, %v6589_v13 }
0x15a9   :  { %6219 = vmatprep.subr.msk.bf16.mxu0 %vm6844_vm2, %v6217_v29 }
0x15aa   :  { %5915 = vmatprep.mubr.msk.f32.mxu0 %vm436_vm3, %v3074_v27 }
0x15ab   :  { %v6595_v30 = vpop.eup %6594 }
0x15ac   :  { %v3076_v37 = vmul.f32 %v6595_v30, %v6591_v20  ;;  %v7319_v32 = vpop.f32.mrb[42].mxu1 }
0x15ad   :  { %v7321_v28 = vpop.f32.mrb[43].mxu1 }
0x15ae   :  { %5916 = vmatmul.mubr.msk.f32.vlgmr.msra.gmra.mrb[26].mxu0 %vm436_vm3, %v3076_v37 }
0x15af   :  { %6222 = vmatpush3.bf16.xpose.msk.msra.mxu0 %vm6844_vm2, %v6217_v29  ;;  %5929 = vmatprep.mubr.msk.f32.mxu0 %vm152_vm1, %v3260_v36 }
0x15b4   :  { %v5938_v49 = vpop.f32.mrb[44].mxu1 }
0x15b5   :  { %v3444_v23 = vmul.f32 0.35355338, %v5938_v49  ;;  %v3432_v54 = vpop.f32.mrb[45].mxu1 }
0x15b6   :  { %v3443_v55 = vmul.f32 0.35355338, %v3432_v54  ;;  %5930 = vmatmul.mubr.msk.f32.vlgmr.msra.gmra.mrb[28].mxu0 %vm152_vm1, %v3262_v14 }
0x15b7   :  { %v3454_v1 = vsel %vm436_vm3, %v3444_v23, -inf }
0x15b8   :  { %3455 = vmax.xlane.f32.xlu1 %v3454_v1  ;;  %v3451_v56 = vsel %vm436_vm3, %v3443_v55, -inf }
0x15b9   :  { %3452 = vmax.xlane.f32.xlu0 %v3451_v56 }
0x15c9   :  { %6451 = vrot.lane.b32.xlu1 %v7246_v15, %s6698_s29 }
0x15cd   :  { %6461 = vrot.lane.b32.xlu1 %v7268_v53, %s6700_s7 }
0x15d1   :  { %3865 = vrot.lane.b32.xlu1 %v7250_v50, %s6701_s8 }
0x15d5   :  { %3956 = vrot.lane.b32.xlu1 %v7260_v52, %s6701_s8 }
0x1645   :  { %v3456_v38 = vpop.xlane.xlu1 %3455 }
0x1646   :  { %v3460_v4 = vsub.f32 %v3444_v23, %v3456_v38  ;;  %v3453_v31 = vpop.xlane.xlu0 %3452 }
0x1647   :  { %v3459_v59 = vsub.f32 %v3443_v55, %v3453_v31 }
0x1648   :  { %v3467_v60 = vmul.f32 1.442695, %v3460_v4 }
0x1649   :  { %v3465_v61 = vmul.f32 1.442695, %v3459_v59  ;;  %v6452_v62 = vpop.permute.xlu1 %6451 }
0x164a   :  { %6596 = vpow2.f32 %v3467_v60  ;;  %v6454_v63 = vunpack.i.h.bf16 %v6452_v62  ;;  %v6453_v3 = vunpack.i.l.bf16 %v6452_v62 }
0x164b   :  { %6598 = vpow2.f32 %v3465_v61 }
0x164c   :  { %v6233_v6 = vpack.c.bf16 %v6454_v63, %v6453_v3 }
0x164d   :  { %v6462_v36 = vpop.permute.xlu1 %6461 }
0x164e   :  { %6234 = vmatprep.subr.bf16.mxu1 %v6233_v6  ;;  %v6464_v23 = vunpack.i.h.bf16 %v6462_v36  ;;  %v6463_v54 = vunpack.i.l.bf16 %v6462_v36 }
0x164f   :  { %6236 = vmatpush3.bf16.msra.mxu1 %v6233_v6 }
0x1650   :  { %v6243_v56 = vpack.c.bf16 %v6464_v23, %v6463_v54 }
0x1651   :  { %v3866_v38 = vpop.permute.xlu1 %3865 }
0x1654   :  { %v6597_v7 = vpop.eup %6596 }
0x1655   :  { %v3478_v9 = vsel %vm436_vm3, %v6597_v7, 0.0  ;;  %v6599_v11 = vpop.eup %6598  ;;  %v3957_v31 = vpop.permute.xlu1 %3956 }
0x1656   :  { %3479 = vadd.xlane.f32.xlu0 %v3478_v9  ;;  %v3475_v12 = vsel %vm436_vm3, %v6599_v11, 0.0 }
0x165a   :  { %3476 = vadd.xlane.f32.xlu0 %v3475_v12 }
0x1670   :  { %6456 = vrot.lane.b32.xlu0 %v7256_v17, %s6700_s7 }
0x1674   :  { %3867 = vrot.lane.b32.xlu0 %v7248_v40, %s6701_s8 }
0x1678   :  { %3958 = vrot.lane.b32.xlu0 %v7258_v51, %s6701_s8 }
0x1681   :  { %v7346_v13 = vpop.f32.mrb[26].mxu0 }
0x1682   :  { %v7348_v19 = vpop.f32.mrb[27].mxu0 }
0x1689   :  { %v5931_v20 = vpop.f32.mrb[28].mxu0 }
0x168a   :  { %v3341_v25 = vpop.f32.mrb[29].mxu0  ;;  %v3442_v35 = vmul.f32 0.35355338, %v5931_v20 }
0x168b   :  { %v3441_v45 = vmul.f32 0.35355338, %v3341_v25 }
0x168c   :  { %v3448_v2 = vsel %vm436_vm3, %v3442_v35, -inf }
0x168d   :  { %v3445_v0 = vsel %vm436_vm3, %v3441_v45, -inf }
0x168e   :  { %3446 = vmax.xlane.f32.xlu1 %v3445_v0 }
0x1697   :  { %3449 = vmax.xlane.f32.xlu0 %v3448_v2 }
0x16e3   :  { %v3480_v26 = vpop.xlane.xlu0 %3479 }
0x16e4   :  { %6600 = vrcp.f32 %v3480_v26 }
0x16e7   :  { %v3477_v47 = vpop.xlane.xlu0 %3476 }
0x16e8   :  { %6602 = vrcp.f32 %v3477_v47 }
0x16eb   :  { %v6457_v29 = vpop.permute.xlu0 %6456 }
0x16ec   :  { %v6459_v27 = vunpack.i.h.bf16 %v6457_v29  ;;  %v6458_v30 = vunpack.i.l.bf16 %v6457_v29 }
0x16ee   :  { %v6237_v37 = vpack.c.bf16 %v6459_v27, %v6458_v30  ;;  %v6601_v49 = vpop.eup %6600 }
0x16ef   :  { %v3488_v1 = vmul.f32 %v6601_v49, %v6597_v7  ;;  %v3868_v4 = vpop.permute.xlu0 %3867 }
0x16f0   :  { %6239 = vmatprep.subr.msk.bf16.mxu1 %vm6844_vm2, %v6237_v37 }
0x16f2   :  { %v6603_v14 = vpop.eup %6602 }
0x16f3   :  { %v3486_v55 = vmul.f32 %v6603_v14, %v6599_v11  ;;  %v3959_v59 = vpop.permute.xlu0 %3958 }
0x16f5   :  { %5950 = vmatprep.mubr.msk.f32.mxu1 %vm436_vm3, %v3486_v55 }
0x16f6   :  { %5951 = vmatmul.mubr.msk.f32.vlgmr.msra.gmra.mrb[46].mxu1 %vm436_vm3, %v3488_v1 }
0x16f7   :  { %6242 = vmatpush3.bf16.xpose.msk.msra.mxu1 %vm6844_vm2, %v6237_v37  ;;  %5973 = vmatprep.mubr.msk.f32.mxu1 %vm152_vm1, %v3866_v38 }
0x16f8   :  { %6245 = vmatprep.subr.msk.bf16.mxu1 %vm6844_vm2, %v6243_v56 }
0x16fe   :  { %5974 = vmatmul.mubr.msk.f32.vlgmr.msra.gmra.mrb[48].mxu1 %vm152_vm1, %v3868_v4 }
0x16ff   :  { %6248 = vmatpush3.bf16.xpose.msk.msra.mxu1 %vm6844_vm2, %v6243_v56  ;;  %5980 = vmatprep.mubr.msk.f32.mxu1 %vm152_vm1, %v3957_v31 }
0x1706   :  { %5981 = vmatmul.mubr.msk.f32.vlgmr.msra.gmra.mrb[50].mxu1 %vm152_vm1, %v3959_v59 }
0x171b   :  { %v3447_v60 = vpop.xlane.xlu1 %3446 }
0x171c   :  { %v3457_v61 = vsub.f32 %v3441_v45, %v3447_v60 }
0x171e   :  { %v3461_v62 = vmul.f32 1.442695, %v3457_v61 }
0x1720   :  { %6604 = vpow2.f32 %v3461_v62 }
0x1724   :  { %v3450_v63 = vpop.xlane.xlu0 %3449 }
0x1725   :  { %v3458_v3 = vsub.f32 %v3442_v35, %v3450_v63 }
0x1727   :  { %v3463_v6 = vmul.f32 1.442695, %v3458_v3 }
0x1729   :  { %6606 = vpow2.f32 %v3463_v6 }
0x172a   :  { %v6605_v7 = vpop.eup %6604 }
0x172b   :  { %v3469_v9 = vsel %vm436_vm3, %v6605_v7, 0.0 }
0x172c   :  { %3470 = vadd.xlane.f32.xlu0 %v3469_v9 }
0x1733   :  { %v6607_v11 = vpop.eup %6606 }
0x1734   :  { %v3472_v12 = vsel %vm436_vm3, %v6607_v11, 0.0 }
0x1735   :  { %3473 = vadd.xlane.f32.xlu1 %v3472_v12 }
0x1742   :  { %6466 = vrot.lane.b32.xlu0 %v7244_v39, %s6698_s29 }
0x17b9   :  { %v3471_v20 = vpop.xlane.xlu0 %3470 }
0x17ba   :  { %6608 = vrcp.f32 %v3471_v20 }
0x17bd   :  { %v6467_v25 = vpop.permute.xlu0 %6466 }
0x17be   :  { %v6469_v45 = vunpack.i.h.bf16 %v6467_v25  ;;  %v6468_v0 = vunpack.i.l.bf16 %v6467_v25 }
0x17c0   :  { %v6229_v2 = vpack.c.bf16 %v6469_v45, %v6468_v0 }
0x17c2   :  { %v3474_v35 = vpop.xlane.xlu1 %3473  ;;  %6230 = vmatprep.subr.bf16.mxu0 %v6229_v2 }
0x17c3   :  { %6610 = vrcp.f32 %v3474_v35  ;;  %6232 = vmatpush3.bf16.msra.mxu0 %v6229_v2 }
0x17c4   :  { %v6609_v26 = vpop.eup %6608 }
0x17c5   :  { %v3482_v47 = vmul.f32 %v6609_v26, %v6605_v7 }
0x17c7   :  { %5943 = vmatprep.mubr.msk.f32.mxu0 %vm436_vm3, %v3482_v47 }
0x17c9   :  { %v7371_v29 = vpop.f32.mrb[46].mxu1 }
0x17ca   :  { %v7373_v27 = vpop.f32.mrb[47].mxu1 }
0x17cd   :  { %v6611_v30 = vpop.eup %6610 }
0x17ce   :  { %v3484_v37 = vmul.f32 %v6611_v30, %v6607_v11 }
0x17d0   :  { %5944 = vmatmul.mubr.msk.f32.vlgmr.msra.gmra.mrb[30].mxu0 %vm436_vm3, %v3484_v37 }
0x17d1   :  { %v5975_v36 = vpop.f32.mrb[48].mxu1 }
0x17d2   :  { %v4048_v49 = vmul.f32 0.35355338, %v5975_v36  ;;  %v3947_v14 = vpop.f32.mrb[49].mxu1 }
0x17d3   :  { %v4047_v23 = vmul.f32 0.35355338, %v3947_v14 }
0x17d4   :  { %v4054_v54 = vsel %vm436_vm3, %v4048_v49, -inf }
0x17d5   :  { %4055 = vmax.xlane.f32.xlu1 %v4054_v54  ;;  %v4051_v55 = vsel %vm436_vm3, %v4047_v23, -inf }
0x17d9   :  { %4052 = vmax.xlane.f32.xlu1 %v4051_v55  ;;  %v5982_v1 = vpop.f32.mrb[50].mxu1 }
0x17da   :  { %v4038_v56 = vpop.f32.mrb[51].mxu1  ;;  %v4050_v4 = vmul.f32 0.35355338, %v5982_v1 }
0x17db   :  { %v4049_v38 = vmul.f32 0.35355338, %v4038_v56 }
0x17dc   :  { %v4060_v59 = vsel %vm436_vm3, %v4050_v4, -inf }
0x17dd   :  { %v4057_v31 = vsel %vm436_vm3, %v4049_v38, -inf }
0x17de   :  { %4058 = vmax.xlane.f32.xlu1 %v4057_v31 }
0x17e2   :  { %4061 = vmax.xlane.f32.xlu1 %v4060_v59 }
0x17f3   :  { %3664 = vrot.lane.b32.xlu1 %v7177_v34, %s6699_s30 }
0x17f7   :  { %3765 = vrot.lane.b32.xlu1 %v7172_v33, %s6699_s30 }
0x1862   :  { %v4056_v60 = vpop.xlane.xlu1 %4055 }
0x1863   :  { %v4064_v61 = vsub.f32 %v4048_v49, %v4056_v60 }
0x1865   :  { %v4069_v62 = vmul.f32 1.442695, %v4064_v61 }
0x1866   :  { %v4053_v63 = vpop.xlane.xlu1 %4052 }
0x1867   :  { %6612 = vpow2.f32 %v4069_v62  ;;  %v4063_v3 = vsub.f32 %v4047_v23, %v4053_v63 }
0x1869   :  { %v4067_v6 = vmul.f32 1.442695, %v4063_v3 }
0x186b   :  { %6614 = vpow2.f32 %v4067_v6  ;;  %v4059_v7 = vpop.xlane.xlu1 %4058 }
0x186c   :  { %v4065_v9 = vsub.f32 %v4049_v38, %v4059_v7 }
0x186e   :  { %v4071_v11 = vmul.f32 1.442695, %v4065_v9 }
0x186f   :  { %v4062_v12 = vpop.xlane.xlu1 %4061 }
0x1870   :  { %6616 = vpow2.f32 %v4071_v11  ;;  %v4066_v20 = vsub.f32 %v4050_v4, %v4062_v12 }
0x1871   :  { %v7384_v25 = vpop.eup %6612 }
0x1872   :  { %v4073_v34 = vmul.f32 1.442695, %v4066_v20  ;;  %v4078_v33 = vsel %vm436_vm3, %v7384_v25, 0.0 }
0x1873   :  { %4079 = vadd.xlane.f32.xlu1 %v4078_v33  ;;  %v3665_v45 = vpop.permute.xlu1 %3664 }
0x1874   :  { %6618 = vpow2.f32 %v4073_v34  ;;  %5953 = vmatprep.subr.mxu0 %v3665_v45 }
0x1875   :  { %v6615_v0 = vpop.eup %6614  ;;  %5954 = vmatpush3.msra.mxu0 %v3665_v45 }
0x1876   :  { %v4075_v2 = vsel %vm436_vm3, %v6615_v0, 0.0 }
0x1877   :  { %4076 = vadd.xlane.f32.xlu1 %v4075_v2  ;;  %v3766_v35 = vpop.permute.xlu1 %3765 }
0x1878   :  { %5961 = vmatprep.subr.mxu0 %v3766_v35 }
0x187a   :  { %v6617_v26 = vpop.eup %6616 }
0x187b   :  { %v4081_v47 = vsel %vm436_vm3, %v6617_v26, 0.0 }
0x187c   :  { %4082 = vadd.xlane.f32.xlu0 %v4081_v47 }
0x187e   :  { %v6619_v30 = vpop.eup %6618 }
0x187f   :  { %v4084_v37 = vsel %vm436_vm3, %v6619_v30, 0.0 }
0x1880   :  { %4085 = vadd.xlane.f32.xlu1 %v4084_v37 }
0x1891   :  { %6471 = vrot.lane.b32.xlu1 %v7244_v39, %s6702_s9 }
0x1892   :  { %6476 = vrot.lane.b32.xlu0 %v7246_v15, %s6702_s9 }
0x1895   :  { %4270 = vrot.lane.b32.xlu1 %v7184_v41, %s6699_s30 }
0x1896   :  { %4467 = vrot.lane.b32.xlu0 %v7258_v51, %s6704_s11 }
0x1899   :  { %6481 = vrot.lane.b32.xlu1 %v7256_v17, %s6703_s10 }
0x189d   :  { %6486 = vrot.lane.b32.xlu1 %v7268_v53, %s6703_s10 }
0x18a1   :  { %4374 = vrot.lane.b32.xlu1 %v7250_v50, %s6704_s11 }
0x18a3   :  { %v5945_v36 = vpop.f32.mrb[30].mxu0 }
0x18a4   :  { %v3567_v49 = vpop.f32.mrb[31].mxu0 }
0x18a5   :  { %4376 = vrot.lane.b32.xlu1 %v7248_v40, %s6704_s11  ;;  %5955 = vmatprep.mubr.msk.f32.mxu0 %vm152_vm1, %v3567_v49 }
0x18a6   :  { %5956 = vmatmul.mubr.msk.f32.vlgmr.msra.gmra.mrb[32].mxu0 %vm152_vm1, %v5945_v36 }
0x18a7   :  { %5958 = vmatprep.mubr.msk.f32.mxu0 %vm152_vm1, %v7373_v27  ;;  %5962 = vmatpush3.msra.mxu0 %v3766_v35 }
0x18a9   :  { %4465 = vrot.lane.b32.xlu1 %v7260_v52, %s6704_s11 }
0x18aa   :  { %5959 = vmatmul.mubr.msk.f32.gmra.mrb[34].mxu0 %vm152_vm1, %v7371_v29 }
0x18ab   :  { %5963 = vmatprep.mubr.msk.f32.mxu0 %vm152_vm1, %v7348_v19 }
0x18ae   :  { %5964 = vmatmul.mubr.msk.f32.vlgmr.msra.gmra.mrb[32].mxu0 %vm152_vm1, %v7346_v13 }
0x18af   :  { %5966 = vmatprep.mubr.msk.f32.mxu0 %vm152_vm1, %v7321_v28 }
0x18b2   :  { %5967 = vmatmul.mubr.msk.f32.gmra.mrb[34].mxu0 %vm152_vm1, %v7319_v32 }
0x1900   :  { %v4080_v41 = vpop.xlane.xlu1 %4079 }
0x1904   :  { %v4077_v40 = vpop.xlane.xlu1 %4076 }
0x1905   :  { %6620 = vrcp.f32 %v4077_v40 }
0x1909   :  { %v4083_v50 = vpop.xlane.xlu0 %4082 }
0x190a   :  { %6622 = vrcp.f32 %v4083_v50 }
0x190b   :  { %6624 = vrcp.f32 %v4080_v41 }
0x190d   :  { %v6477_v17 = vpop.permute.xlu0 %6476  ;;  %v4086_v51 = vpop.xlane.xlu1 %4085 }
0x190e   :  { %v6479_v52 = vunpack.i.h.bf16 %v6477_v17  ;;  %v6478_v53 = vunpack.i.l.bf16 %v6477_v17  ;;  %6626 = vrcp.f32 %v4086_v51 }
0x190f   :  { %v6621_v19 = vpop.eup %6620 }
0x1910   :  { %v6253_v29 = vpack.c.bf16 %v6479_v52, %v6478_v53  ;;  %v4088_v13 = vmul.f32 %v6621_v19, %v6615_v0 }
0x1911   :  { %v6472_v27 = vpop.permute.xlu1 %6471  ;;  %v4468_v33 = vpop.permute.xlu0 %4467 }
0x1912   :  { %v6474_v14 = vunpack.i.h.bf16 %v6472_v27  ;;  %v6473_v28 = vunpack.i.l.bf16 %v6472_v27  ;;  %5987 = vmatprep.mubr.msk.f32.mxu0 %vm436_vm3, %v4088_v13  ;;  %6254 = vmatprep.subr.bf16.mxu1 %v6253_v29 }
0x1913   :  { %6256 = vmatpush3.bf16.msra.mxu1 %v6253_v29 }
0x1914   :  { %v6623_v32 = vpop.eup %6622  ;;  %v6249_v23 = vpack.c.bf16 %v6474_v14, %v6473_v28 }
0x1915   :  { %v6625_v54 = vpop.eup %6624  ;;  %v4271_v55 = vpop.permute.xlu1 %4270  ;;  %v4092_v1 = vmul.f32 %v6623_v32, %v6617_v26 }
0x1916   :  { %6250 = vmatprep.subr.bf16.mxu0 %v6249_v23  ;;  %v4090_v38 = vmul.f32 %v6625_v54, %v7384_v25 }
0x1917   :  { %6252 = vmatpush3.bf16.msra.mxu0 %v6249_v23  ;;  %5994 = vmatprep.mubr.msk.f32.mxu1 %vm436_vm3, %v4092_v1 }
0x1918   :  { %v6627_v56 = vpop.eup %6626  ;;  %5997 = vmatprep.subr.mxu0 %v4271_v55 }
0x1919   :  { %v4094_v4 = vmul.f32 %v6627_v56, %v6619_v30  ;;  %v6482_v31 = vpop.permute.xlu1 %6481 }
0x191a   :  { %v6484_v59 = vunpack.i.h.bf16 %v6482_v31  ;;  %v6483_v60 = vunpack.i.l.bf16 %v6482_v31  ;;  %5988 = vmatmul.mubr.msk.f32.vlgmr.msra.gmra.mrb[36].mxu0 %vm436_vm3, %v4090_v38 }
0x191b   :  { %5995 = vmatmul.mubr.msk.f32.vlgmr.msra.gmra.mrb[52].mxu1 %vm436_vm3, %v4094_v4  ;;  %5998 = vmatpush3.msra.mxu0 %v4271_v55 }
0x191c   :  { %v6257_v61 = vpack.c.bf16 %v6484_v59, %v6483_v60 }
0x191d   :  { %v6487_v62 = vpop.permute.xlu1 %6486 }
0x191e   :  { %v6489_v63 = vunpack.i.h.bf16 %v6487_v62  ;;  %v6488_v3 = vunpack.i.l.bf16 %v6487_v62  ;;  %6259 = vmatprep.subr.msk.bf16.mxu1 %vm6844_vm2, %v6257_v61 }
0x191f   :  { %6262 = vmatpush3.bf16.xpose.msk.msra.mxu1 %vm6844_vm2, %v6257_v61 }
0x1920   :  { %v6263_v6 = vpack.c.bf16 %v6489_v63, %v6488_v3 }
0x1921   :  { %v4375_v7 = vpop.permute.xlu1 %4374 }
0x1922   :  { %6009 = vmatprep.mubr.msk.f32.mxu1 %vm152_vm1, %v4375_v7  ;;  %6265 = vmatprep.subr.msk.bf16.mxu0 %vm6844_vm2, %v6263_v6 }
0x1925   :  { %v4377_v9 = vpop.permute.xlu1 %4376 }
0x1926   :  { %6010 = vmatmul.mubr.msk.f32.vlgmr.msra.gmra.mrb[54].mxu1 %vm152_vm1, %v4377_v9 }
0x1929   :  { %v4466_v34 = vpop.permute.xlu1 %4465 }
0x19ed   :  { %v5989_v11 = vpop.f32.mrb[36].mxu0 }
0x19ee   :  { %v4173_v12 = vpop.f32.mrb[37].mxu0  ;;  %v5996_v20 = vpop.f32.mrb[52].mxu1 }
0x19ef   :  { %v4260_v25 = vpop.f32.mrb[53].mxu1  ;;  %5999 = vmatprep.mubr.msk.f32.mxu0 %vm152_vm1, %v4173_v12 }
0x19f0   :  { %6000 = vmatmul.mubr.msk.f32.vlgmr.msra.gmra.mrb[32].mxu0 %vm152_vm1, %v5989_v11 }
0x19f1   :  { %6268 = vmatpush3.bf16.xpose.msk.msra.mxu0 %vm6844_vm2, %v6263_v6  ;;  %6002 = vmatprep.mubr.msk.f32.mxu0 %vm152_vm1, %v4260_v25 }
0x19f4   :  { %6003 = vmatmul.mubr.msk.f32.gmra.mrb[34].mxu0 %vm152_vm1, %v5996_v20 }
0x19f5   :  { %6016 = vmatprep.mubr.msk.f32.mxu0 %vm152_vm1, %v4466_v34 }
0x19f8   :  { %6017 = vmatmul.mubr.msk.f32.vlgmr.msra.gmra.mrb[38].mxu0 %vm152_vm1, %v4468_v33 }
0x19f9   :  { %v6011_v45 = vpop.f32.mrb[54].mxu1 }
0x19fa   :  { %v4557_v0 = vmul.f32 0.35355338, %v6011_v45  ;;  %v4456_v2 = vpop.f32.mrb[55].mxu1 }
0x19fb   :  { %v4556_v35 = vmul.f32 0.35355338, %v4456_v2 }
0x19fc   :  { %v4563_v26 = vsel %vm436_vm3, %v4557_v0, -inf }
0x19fd   :  { %4564 = vmax.xlane.f32.xlu0 %v4563_v26  ;;  %v4560_v43 = vsel %vm436_vm3, %v4556_v35, -inf }
0x19fe   :  { %4561 = vmax.xlane.f32.xlu1 %v4560_v43 }
0x1a8a   :  { %v4565_v41 = vpop.xlane.xlu0 %4564 }
0x1a8b   :  { %v4562_v47 = vpop.xlane.xlu1 %4561  ;;  %v4573_v40 = vsub.f32 %v4557_v0, %v4565_v41 }
0x1a8c   :  { %v4572_v30 = vsub.f32 %v4556_v35, %v4562_v47  ;;  %v4886_v47 = vrot.slane %v7239_v46, %v2285_v5 }
0x1a8d   :  { %v4578_v50 = vmul.f32 1.442695, %v4573_v40 }
0x1a8e   :  { %v4576_v37 = vmul.f32 1.442695, %v4572_v30 }
0x1a90   :  { %6628 = vpow2.f32 %v4576_v37 }
0x1a91   :  { %6630 = vpow2.f32 %v4578_v50 }
0x1a9a   :  { %v6629_v36 = vpop.eup %6628 }
0x1a9b   :  { %v4584_v49 = vsel %vm436_vm3, %v6629_v36, 0.0  ;;  %v6631_v13 = vpop.eup %6630 }
0x1a9c   :  { %4585 = vadd.xlane.f32.xlu1 %v4584_v49  ;;  %v4587_v27 = vsel %vm436_vm3, %v6631_v13, 0.0 }
0x1acb   :  { %v6018_v17 = vpop.f32.mrb[38].mxu0 }
0x1acc   :  { %v4547_v51 = vpop.f32.mrb[39].mxu0  ;;  %v4559_v53 = vmul.f32 0.35355338, %v6018_v17 }
0x1acd   :  { %v4558_v52 = vmul.f32 0.35355338, %v4547_v51 }
0x1ace   :  { %v4569_v29 = vsel %vm436_vm3, %v4559_v53, -inf }
0x1acf   :  { %v4566_v19 = vsel %vm436_vm3, %v4558_v52, -inf }
0x1ad0   :  { %4567 = vmax.xlane.f32.xlu0 %v4566_v19 }
0x1ad4   :  { %4570 = vmax.xlane.f32.xlu0 %v4569_v29 }
0x1ad8   :  { %4588 = vadd.xlane.f32.xlu0 %v4587_v27 }
0x1b29   :  { %v4586_v14 = vpop.xlane.xlu1 %4585 }
0x1b2a   :  { %6632 = vrcp.f32 %v4586_v14 }
0x1b34   :  { %v6633_v28 = vpop.eup %6632 }
0x1b35   :  { %v4597_v32 = vmul.f32 %v6633_v28, %v6629_v36 }
0x1b37   :  { %6023 = vmatprep.mubr.msk.f32.mxu1 %vm436_vm3, %v4597_v32 }
0x1b5d   :  { %v4568_v23 = vpop.xlane.xlu0 %4567 }
0x1b5e   :  { %v4574_v54 = vsub.f32 %v4558_v52, %v4568_v23 }
0x1b60   :  { %v4580_v55 = vmul.f32 1.442695, %v4574_v54 }
0x1b61   :  { %v4571_v1 = vpop.xlane.xlu0 %4570 }
0x1b62   :  { %6634 = vpow2.f32 %v4580_v55  ;;  %v4575_v56 = vsub.f32 %v4559_v53, %v4571_v1 }
0x1b64   :  { %v4582_v38 = vmul.f32 1.442695, %v4575_v56 }
0x1b65   :  { %v4589_v61 = vpop.xlane.xlu0 %4588 }
0x1b66   :  { %6636 = vpow2.f32 %v4582_v38 }
0x1b67   :  { %6638 = vrcp.f32 %v4589_v61 }
0x1b6c   :  { %v6635_v4 = vpop.eup %6634 }
0x1b6d   :  { %v4590_v31 = vsel %vm436_vm3, %v6635_v4, 0.0 }
0x1b6e   :  { %4591 = vadd.xlane.f32.xlu1 %v4590_v31 }
0x1b70   :  { %v6637_v59 = vpop.eup %6636 }
0x1b71   :  { %v4593_v60 = vsel %vm436_vm3, %v6637_v59, 0.0  ;;  %v6639_v11 = vpop.eup %6638 }
0x1b72   :  { %4594 = vadd.xlane.f32.xlu0 %v4593_v60  ;;  %v4599_v25 = vmul.f32 %v6639_v11, %v6631_v13 }
0x1b7f   :  { %6491 = vrot.lane.b32.xlu1 %v7244_v39, %s6705_s12 }
0x1b83   :  { %4779 = vrot.lane.b32.xlu1 %v7189_v42, %s6699_s30 }
0x1b88   :  { %6496 = vrot.lane.b32.xlu0 %v7246_v15, %s6705_s12 }
0x1bfb   :  { %v4592_v62 = vpop.xlane.xlu1 %4591 }
0x1bfc   :  { %6640 = vrcp.f32 %v4592_v62 }
0x1bff   :  { %v6492_v63 = vpop.permute.xlu1 %6491  ;;  %v4595_v3 = vpop.xlane.xlu0 %4594 }
0x1c00   :  { %v6494_v6 = vunpack.i.h.bf16 %v6492_v63  ;;  %v6493_v7 = vunpack.i.l.bf16 %v6492_v63  ;;  %6642 = vrcp.f32 %v4595_v3  ;;  %v5342_v63 = vld [vmem:[%s7594_s2 + $0x48] sm:$0xff]  ;;  %v5344_v3 = vld [vmem:[%s7594_s2 + $0x58] sm:$0xff] }
0x1c02   :  { %v6269_v9 = vpack.c.bf16 %v6494_v6, %v6493_v7  ;;  %v6277_v6 = vpack.c.bf16 %v5344_v3, %v5342_v63  ;;  %v5346_v7 = vld [vmem:[%s7594_s2 + $0x68] sm:$0xff] }
0x1c03   :  { %v6497_v12 = vpop.permute.xlu0 %6496  ;;  %v4780_v33 = vpop.permute.xlu1 %4779 }
0x1c04   :  { %v6499_v20 = vunpack.i.h.bf16 %v6497_v12  ;;  %v6498_v39 = vunpack.i.l.bf16 %v6497_v12  ;;  %6270 = vmatprep.subr.bf16.mxu1 %v6269_v9  ;;  %v5350_v12 = vld [vmem:[%s7596_s4 + $0x40] sm:$0xff] }
0x1c05   :  { %6272 = vmatpush3.bf16.msra.mxu1 %v6269_v9  ;;  %v5348_v9 = vld [vmem:[%s7594_s2 + $0x78] sm:$0xff] }
0x1c06   :  { %v6641_v42 = vpop.eup %6640  ;;  %v6273_v34 = vpack.c.bf16 %v6499_v20, %v6498_v39  ;;  %6278 = vmatprep.subr.bf16.mxu1 %v6277_v6  ;;  %v6281_v11 = vpack.c.bf16 %v5348_v9, %v5346_v7  ;;  %v5351_v20 = vld [vmem:[%s7596_s4 + $0x48] sm:$0xff]  ;;  %v5352_v39 = vld [vmem:[%s7596_s4 + $0x50] sm:$0xff] }
0x1c07   :  { %v4601_v15 = vmul.f32 %v6641_v42, %v6635_v4  ;;  %v6285_v42 = vpack.c.bf16 %v5351_v20, %v5350_v12 }
0x1c08   :  { %6024 = vmatmul.mubr.msk.f32.vlgmr.msra.gmra.mrb[56].mxu1 %vm436_vm3, %v4599_v25  ;;  %6274 = vmatprep.subr.bf16.mxu0 %v6273_v34  ;;  %v5353_v25 = vld [vmem:[%s7596_s4 + $0x58] sm:$0xff] }
0x1c09   :  { %6276 = vmatpush3.bf16.msra.mxu0 %v6273_v34  ;;  %6030 = vmatprep.mubr.msk.f32.mxu0 %vm436_vm3, %v4601_v15  ;;  %v6289_v34 = vpack.c.bf16 %v5353_v25, %v5352_v39  ;;  %v5354_v15 = vld [vmem:[%s7596_s4 + $0x60] sm:$0xff] }
0x1c0a   :  { %v6643_v45 = vpop.eup %6642  ;;  %6033 = vmatprep.subr.mxu0 %v4780_v33  ;;  %6280 = vmatpush3.bf16.msra.mxu1 %v6277_v6 }
0x1c0b   :  { %v4603_v0 = vmul.f32 %v6643_v45, %v6637_v59  ;;  %6282 = vmatprep.subr.bf16.mxu1 %v6281_v11 }
0x1c0d   :  { %6031 = vmatmul.mubr.msk.f32.vlgmr.msra.gmra.mrb[40].mxu0 %vm436_vm3, %v4603_v0 }
0x1c0e   :  { %6034 = vmatpush3.msra.mxu0 %v4780_v33  ;;  %6284 = vmatpush3.bf16.msra.mxu1 %v6281_v11  ;;  %v5355_v33 = vld [vmem:[%s7596_s4 + $0x68] sm:$0xff] }
0x1c0f   :  { %6286 = vmatprep.subr.bf16.mxu0 %v6285_v42  ;;  %v6293_v45 = vpack.c.bf16 %v5355_v33, %v5354_v15 }
0x1cdb   :  { %v6025_v2 = vpop.f32.mrb[56].mxu1 }
0x1cdc   :  { %v4682_v35 = vpop.f32.mrb[57].mxu1 }
0x1cdd   :  { %6035 = vmatprep.mubr.msk.f32.mxu0 %vm152_vm1, %v4682_v35 }
0x1cde   :  { %6036 = vmatmul.mubr.msk.f32.vlgmr.msra.gmra.mrb[32].mxu0 %vm152_vm1, %v6025_v2 }
0x1cdf   :  { %6288 = vmatpush3.bf16.msra.mxu0 %v6285_v42 }
0x1ce0   :  { %v6032_v26 = vpop.f32.mrb[40].mxu0  ;;  %6290 = vmatprep.subr.bf16.mxu0 %v6289_v34 }
0x1ce1   :  { %v4769_v43 = vpop.f32.mrb[41].mxu0 }
0x1ce2   :  { %6038 = vmatprep.mubr.msk.f32.mxu0 %vm152_vm1, %v4769_v43 }
0x1ce3   :  { %6039 = vmatmul.mubr.msk.f32.gmra.mrb[34].mxu0 %vm152_vm1, %v6032_v26 }
0x1ce4   :  { %6292 = vmatpush3.bf16.msra.mxu0 %v6289_v34 }
0x1ce5   :  { %6294 = vmatprep.subr.bf16.mxu0 %v6293_v45 }
0x1ce8   :  { %6296 = vmatpush3.bf16.msra.mxu0 %v6293_v45 }
0x1db1   :  { %v6037_v30 = vpop.f32.mrb[32].mxu0 }
0x1db2   :  { %v4888_v37 = vadd.f32 %v6037_v30, %v4886_v47  ;;  %v4860_v36 = vpop.f32.mrb[33].mxu0 }
0x1db3   :  { %v4887_v49 = vadd.f32 %v4886_v47, %v4860_v36 }
0x1db4   :  { %v4892_v41 = vadd.f32 %v4888_v37, %v7206_v10 }
0x1db5   :  { %v4891_v40 = vadd.f32 %v4887_v49, %v7204_v8 }
0x1db6   :  { %v6040_v50 = vpop.f32.mrb[34].mxu0  ;;  %v4898_v17 = vsel %vm54_vm0, %v4892_v41, 0.0 }
0x1db7   :  { %v4890_v51 = vadd.f32 %v6040_v50, %v4886_v47  ;;  %4899 = vadd.xlane.f32.xlu0 %v4898_v17  ;;  %v4870_v52 = vpop.f32.mrb[35].mxu0  ;;  %v4895_v53 = vsel %vm54_vm0, %v4891_v40, 0.0  ;;  %v7530_v50 = vld [vmem:[%s7597_s5 + $0x8] sm:$0xff] }
0x1db8   :  { %v4889_v19 = vadd.f32 %v4886_v47, %v4870_v52  ;;  %4896 = vadd.xlane.f32.xlu1 %v4895_v53  ;;  %v4950_v17 = vrot.slane %v7530_v50, %v2350_v24 }
0x1db9   :  { %v4894_v5 = vadd.f32 %v4890_v51, %v7214_v21 }
0x1dba   :  { %v4893_v46 = vadd.f32 %v4889_v19, %v7212_v44 }
0x1dbb   :  { %v4904_v29 = vsel %vm54_vm0, %v4894_v5, 0.0 }
0x1dbc   :  { %4905 = vadd.xlane.f32.xlu1 %v4904_v29  ;;  %v4901_v10 = vsel %vm54_vm0, %v4893_v46, 0.0 }
0x1dbd   :  { %4902 = vadd.xlane.f32.xlu0 %v4901_v10 }
0x1e44   :  { %v4900_v8 = vpop.xlane.xlu0 %4899 }
0x1e45   :  { %v4908_v13 = vmul.f32 0.03125, %v4900_v8  ;;  %v4897_v27 = vpop.xlane.xlu1 %4896 }
0x1e46   :  { %v4907_v14 = vmul.f32 0.03125, %v4897_v27 }
0x1e47   :  { %v7477_v28 = vsub.f32 %v4892_v41, %v4908_v13 }
0x1e48   :  { %v7479_v32 = vsub.f32 %v4891_v40, %v4907_v14 }
0x1e49   :  { %v4906_v23 = vpop.xlane.xlu1 %4905  ;;  %v4916_v21 = vmul.f32 %v7477_v28, %v7477_v28 }
0x1e4a   :  { %v4910_v54 = vmul.f32 0.03125, %v4906_v23  ;;  %v4903_v44 = vpop.xlane.xlu0 %4902  ;;  %v4915_v55 = vmul.f32 %v7479_v32, %v7479_v32 }
0x1e4b   :  { %v4909_v1 = vmul.f32 0.03125, %v4903_v44  ;;  %v4922_v56 = vsel %vm54_vm0, %v4916_v21, 0.0 }
0x1e4c   :  { %v7486_v38 = vsub.f32 %v4894_v5, %v4910_v54  ;;  %4923 = vadd.xlane.f32.xlu1 %v4922_v56  ;;  %v4919_v4 = vsel %vm54_vm0, %v4915_v55, 0.0  ;;  %v4958_v5 = vrot.slane %v7530_v50, %v2358_v18  ;;  %v5356_v18 = vld [vmem:[%s7596_s4 + $0x70] sm:$0xff]  ;;  %v5357_v54 = vld [vmem:[%s7596_s4 + $0x78] sm:$0xff]  ;;  %v4966_v55 = vrot.slane %v7530_v50, %v2366_v48  ;;  %s6706_s4 = smov [#allocation2]  }
0x1e4d   :  { %v7489_v31 = vsub.f32 %v4893_v46, %v4909_v1  ;;  %4920 = vadd.xlane.f32.xlu0 %v4919_v4  ;;  %v6297_v44 = vpack.c.bf16 %v5357_v54, %v5356_v18  ;;  %v5071_v48 = vrot.slane %v7530_v50, %v2471_v22  ;;  %s5250_s23 = sshll.u32 %s6706_s4, 4  ;;  %s5251_s23 = int_to_ptr.vmem [resolvable:$true] %s5250_s23 }
0x1e4e   :  { %v4918_v59 = vmul.f32 %v7486_v38, %v7486_v38  ;;  %s6670_s24 = scalar_lea.vmem %s5251_s23, 512  ;;  %p6675_p1 = scmp.lt.s32.totalorder %s5251_s23, %s5251_s23 }
0x1e4f   :  { %v4917_v60 = vmul.f32 %v7489_v31, %v7489_v31  ;;  %6298 = vmatprep.subr.bf16.mxu0 %v6297_v44  ;;  %p6671_p0 = scmp.ne.s32.totalorder %s5251_s23, %s6670_s24  ;;  %p6676_p2 = scmp.lt.s32.totalorder %s6670_s24, %s6670_s24 }
0x1e50   :  { %v4928_v61 = vsel %vm54_vm0, %v4918_v59, 0.0  ;;  %6300 = vmatpush3.bf16.msra.mxu0 %v6297_v44 }
0x1e51   :  { %4929 = vadd.xlane.f32.xlu1 %v4928_v61  ;;  %v4925_v62 = vsel %vm54_vm0, %v4917_v60, 0.0  ;;  %p6677_p3 = por %p6676_p2, %p6675_p1 }
0x1e52   :  { %4926 = vadd.xlane.f32.xlu0 %v4925_v62 }
0x1e53   :  { %p6678_p4 = pnand %p6677_p3, %p6671_p0 }
0x1ed9   :  { %v4924_v0 = vpop.xlane.xlu1 %4923 }
0x1eda   :  { %v4932_v2 = vmul.f32 0.03125, %v4924_v0  ;;  %v4921_v35 = vpop.xlane.xlu0 %4920 }
0x1edb   :  { %v4931_v26 = vmul.f32 0.03125, %v4921_v35 }
0x1edc   :  { %v4936_v43 = vadd.f32 1e-05, %v4932_v2 }
0x1edd   :  { %v4935_v47 = vadd.f32 1e-05, %v4931_v26 }
0x1ede   :  { %6644 = vrsqrt.f32 %v4936_v43  ;;  %v4930_v30 = vpop.xlane.xlu1 %4929 }
0x1edf   :  { %6646 = vrsqrt.f32 %v4935_v47  ;;  %v4934_v37 = vmul.f32 0.03125, %v4930_v30  ;;  %v4927_v36 = vpop.xlane.xlu0 %4926 }
0x1ee0   :  { %v4933_v49 = vmul.f32 0.03125, %v4927_v36 }
0x1ee1   :  { %v4938_v41 = vadd.f32 1e-05, %v4934_v37 }
0x1ee2   :  { %v4937_v40 = vadd.f32 1e-05, %v4933_v49 }
0x1ee3   :  { %6648 = vrsqrt.f32 %v4938_v41 }
0x1ee4   :  { %6650 = vrsqrt.f32 %v4937_v40 }
0x1ee8   :  { %v6645_v51 = vpop.eup %6644 }
0x1ee9   :  { %v6647_v52 = vpop.eup %6646  ;;  %v4944_v53 = vmul.f32 %v6645_v51, %v7477_v28 }
0x1eea   :  { %v4943_v19 = vmul.f32 %v6647_v52, %v7479_v32 }
0x1eeb   :  { %v4952_v46 = vmul.f32 %v4950_v17, %v4944_v53 }
0x1eec   :  { %v4951_v29 = vmul.f32 %v4950_v17, %v4943_v19 }
0x1eed   :  { %v6649_v10 = vpop.eup %6648  ;;  %v4960_v14 = vadd.f32 %v4958_v5, %v4952_v46 }
0x1eee   :  { %v6651_v8 = vpop.eup %6650  ;;  %v4959_v13 = vadd.f32 %v4958_v5, %v4951_v29  ;;  %v4946_v27 = vmul.f32 %v6649_v10, %v7486_v38 }
0x1eef   :  { %v4945_v24 = vmul.f32 %v6651_v8, %v7489_v31 }
0x1ef0   :  { %6049 = vmatprep.mubr.msk.f32.mxu1 %vm54_vm0, %v4959_v13  ;;  %v4954_v23 = vmul.f32 %v4950_v17, %v4946_v27 }
0x1ef1   :  { %6050 = vmatmul.mubr.msk.f32.vlgmr.msra.gmra.mrb[58].mxu1 %vm54_vm0, %v4960_v14  ;;  %v4953_v28 = vmul.f32 %v4950_v17, %v4945_v24 }
0x1ef2   :  { %v4962_v21 = vadd.f32 %v4958_v5, %v4954_v23 }
0x1ef3   :  { %v4961_v32 = vadd.f32 %v4958_v5, %v4953_v28 }
0x1ef5   :  { %6052 = vmatprep.mubr.msk.f32.mxu1 %vm54_vm0, %v4961_v32 }
0x1ef6   :  { %6053 = vmatmul.mubr.msk.f32.gmra.mrb[60].mxu1 %vm54_vm0, %v4962_v21 }
0x1fc4   :  { %v6051_v1 = vpop.f32.mrb[58].mxu1 }
0x1fc5   :  { %v5051_v56 = vadd.f32 %v6051_v1, %v4966_v55  ;;  %v5045_v38 = vpop.f32.mrb[59].mxu1 }
0x1fc6   :  { %v5046_v4 = vadd.f32 %v5045_v38, %v4966_v55 }
0x1fc7   :  { %v5065_v59 = vmax.f32 %v5051_v56, 0.0  ;;  %v5228_v56 = vrot.slane %v7530_v50, %v2629_v57 }
0x1fc8   :  { %v5064_v31 = vmax.f32 %v5046_v4, 0.0 }
0x1fc9   :  { %v6054_v60 = vpop.f32.mrb[60].mxu1 }
0x1fca   :  { %v5061_v61 = vadd.f32 %v6054_v60, %v4966_v55  ;;  %v5055_v62 = vpop.f32.mrb[61].mxu1  ;;  %6071 = vmatprep.mubr.msk.f32.mxu0 %vm2473_vm4, %v5064_v31  ;;  %v5236_v31 = vrot.slane %v7530_v50, %v2637_v58 }
0x1fcb   :  { %v5056_v63 = vadd.f32 %v5055_v62, %v4966_v55  ;;  %6072 = vmatmul.mubr.msk.f32.vlgmr.msra.gmra.mrb[42].mxu0 %vm2473_vm4, %v5065_v59 }
0x1fcc   :  { %v5067_v6 = vmax.f32 %v5061_v61, 0.0 }
0x1fcd   :  { %v5066_v3 = vmax.f32 %v5056_v63, 0.0 }
0x1fcf   :  { %6074 = vmatprep.mubr.msk.f32.mxu0 %vm2473_vm4, %v5066_v3 }
0x1fd0   :  { %6075 = vmatmul.mubr.msk.f32.gmra.mrb[44].mxu0 %vm2473_vm4, %v5067_v6 }
0x209e   :  { %v6073_v7 = vpop.f32.mrb[42].mxu0 }
0x209f   :  { %v5156_v9 = vadd.f32 %v6073_v7, %v5071_v48  ;;  %v5150_v11 = vpop.f32.mrb[43].mxu0 }
0x20a0   :  { %v5151_v12 = vadd.f32 %v5150_v11, %v5071_v48 }
0x20a1   :  { %v5170_v20 = vadd.f32 %v5156_v9, %v4960_v14 }
0x20a2   :  { %v5169_v39 = vadd.f32 %v5151_v12, %v4959_v13 }
0x20a3   :  { %v6076_v42 = vpop.f32.mrb[44].mxu0  ;;  %v5176_v25 = vsel %vm54_vm0, %v5170_v20, 0.0 }
0x20a4   :  { %v5166_v34 = vadd.f32 %v6076_v42, %v5071_v48  ;;  %5177 = vadd.xlane.f32.xlu1 %v5176_v25  ;;  %v5160_v15 = vpop.f32.mrb[45].mxu0  ;;  %v5173_v33 = vsel %vm54_vm0, %v5169_v39, 0.0 }
0x20a5   :  { %v5161_v45 = vadd.f32 %v5160_v15, %v5071_v48  ;;  %5174 = vadd.xlane.f32.xlu0 %v5173_v33 }
0x20a6   :  { %v5172_v0 = vadd.f32 %v5166_v34, %v4962_v21 }
0x20a7   :  { %v5171_v2 = vadd.f32 %v5161_v45, %v4961_v32 }
0x20a8   :  { %v5182_v22 = vsel %vm54_vm0, %v5172_v0, 0.0 }
0x20a9   :  { %5183 = vadd.xlane.f32.xlu1 %v5182_v22  ;;  %v5179_v35 = vsel %vm54_vm0, %v5171_v2, 0.0 }
0x20aa   :  { %5180 = vadd.xlane.f32.xlu0 %v5179_v35 }
0x2131   :  { %v5178_v26 = vpop.xlane.xlu1 %5177 }
0x2132   :  { %v5186_v43 = vmul.f32 0.03125, %v5178_v26  ;;  %v5175_v47 = vpop.xlane.xlu0 %5174 }
0x2133   :  { %v5185_v30 = vmul.f32 0.03125, %v5175_v47 }
0x2134   :  { %v5190_v37 = vsub.f32 %v5170_v20, %v5186_v43 }
0x2135   :  { %v5189_v36 = vsub.f32 %v5169_v39, %v5185_v30 }
0x2136   :  { %v5184_v49 = vpop.xlane.xlu1 %5183  ;;  %v5194_v41 = vmul.f32 %v5190_v37, %v5190_v37 }
0x2137   :  { %v5188_v40 = vmul.f32 0.03125, %v5184_v49  ;;  %v5181_v17 = vpop.xlane.xlu0 %5180  ;;  %v5193_v51 = vmul.f32 %v5189_v36, %v5189_v36 }
0x2138   :  { %v5187_v52 = vmul.f32 0.03125, %v5181_v17  ;;  %v5200_v53 = vsel %vm54_vm0, %v5194_v41, 0.0 }
0x2139   :  { %v5192_v19 = vsub.f32 %v5172_v0, %v5188_v40  ;;  %5201 = vadd.xlane.f32.xlu1 %v5200_v53  ;;  %v5197_v5 = vsel %vm54_vm0, %v5193_v51, 0.0 }
0x213a   :  { %v5191_v46 = vsub.f32 %v5171_v2, %v5187_v52  ;;  %5198 = vadd.xlane.f32.xlu0 %v5197_v5 }
0x213b   :  { %v5196_v29 = vmul.f32 %v5192_v19, %v5192_v19 }
0x213c   :  { %v5195_v10 = vmul.f32 %v5191_v46, %v5191_v46 }
0x213d   :  { %v5206_v8 = vsel %vm54_vm0, %v5196_v29, 0.0 }
0x213e   :  { %5207 = vadd.xlane.f32.xlu1 %v5206_v8  ;;  %v5203_v13 = vsel %vm54_vm0, %v5195_v10, 0.0 }
0x213f   :  { %5204 = vadd.xlane.f32.xlu0 %v5203_v13 }
0x21c6   :  { %v5202_v27 = vpop.xlane.xlu1 %5201 }
0x21c7   :  { %v5210_v14 = vmul.f32 0.03125, %v5202_v27  ;;  %v5199_v24 = vpop.xlane.xlu0 %5198 }
0x21c8   :  { %v5209_v23 = vmul.f32 0.03125, %v5199_v24 }
0x21c9   :  { %v5214_v28 = vadd.f32 1e-05, %v5210_v14 }
0x21ca   :  { %v5213_v32 = vadd.f32 1e-05, %v5209_v23 }
0x21cb   :  { %6652 = vrsqrt.f32 %v5214_v28  ;;  %v5208_v21 = vpop.xlane.xlu1 %5207 }
0x21cc   :  { %6654 = vrsqrt.f32 %v5213_v32  ;;  %v5212_v18 = vmul.f32 0.03125, %v5208_v21  ;;  %v5205_v54 = vpop.xlane.xlu0 %5204 }
0x21cd   :  { %v5211_v44 = vmul.f32 0.03125, %v5205_v54 }
0x21ce   :  { %v5216_v55 = vadd.f32 1e-05, %v5212_v18 }
0x21cf   :  { %v5215_v1 = vadd.f32 1e-05, %v5211_v44 }
0x21d0   :  { %6656 = vrsqrt.f32 %v5216_v55 }
0x21d1   :  { %6658 = vrsqrt.f32 %v5215_v1 }
0x21d5   :  { %v6653_v38 = vpop.eup %6652 }
0x21d6   :  { %v6655_v4 = vpop.eup %6654  ;;  %v5222_v59 = vmul.f32 %v6653_v38, %v5190_v37 }
0x21d7   :  { %v5221_v60 = vmul.f32 %v6655_v4, %v5189_v36 }
0x21d8   :  { %v5230_v61 = vmul.f32 %v5228_v56, %v5222_v59 }
0x21d9   :  { %v5229_v62 = vmul.f32 %v5228_v56, %v5221_v60 }
0x21da   :  { %v6657_v63 = vpop.eup %6656  ;;  %v5238_v3 = vadd.f32 %v5236_v31, %v5230_v61 }
0x21db   :  { %v6659_v6 = vpop.eup %6658  ;;  %v5237_v48 = vadd.f32 %v5236_v31, %v5229_v62  ;;  %v5224_v7 = vmul.f32 %v6657_v63, %v5192_v19 }
0x21dc   :  { %5242 = vst.msk [vmem:[#allocation2 + $0x8] sm:$0xff] %vm54_vm0, %v5238_v3  ;;  %v5223_v9 = vmul.f32 %v6659_v6, %v5191_v46 }
0x21dd   :  { %5241 = vst.msk [vmem:[#allocation2] sm:$0xff] %vm54_vm0, %v5237_v48  ;;  %v5232_v57 = vmul.f32 %v5228_v56, %v5224_v7 }
0x21de   :  { %v5231_v16 = vmul.f32 %v5228_v56, %v5223_v9 }
0x21df   :  { %v5240_v11 = vadd.f32 %v5236_v31, %v5232_v57 }
0x21e0   :  { %v5239_v58 = vadd.f32 %v5236_v31, %v5231_v16 }
0x21e1   :  { %5244 = vst.msk [vmem:[#allocation2 + $0x18] sm:$0xff] %vm54_vm0, %v5240_v11 }
0x21e2   :  { %5243 = vst.msk [vmem:[#allocation2 + $0x10] sm:$0xff] %vm54_vm0, %v5239_v58 }
0x21e3   :  { %6681 = shalt.err (!%p6678_p4)
}
0x21e4   :  { %s6682_s25 = scalar_lea.hbm %s7598_s6, 512 }
0x21e5   :  { %p6683_p5 = scmp.ne.s32.totalorder %s7598_s6, %s6682_s25  ;;  %p6686_p6 = scmp.lt.u32.totalorder %s6682_s25, %s7598_s6 }
0x21e7   :  { %p6688_p7 = pnand %p6686_p6, %p6683_p5 }
0x21e9   :  { %6691 = shalt.err (!%p6688_p7)
}
0x21ea   :  { %s6707_s30 = smov 128   ;;  %s6708_s7 = smov 8  }
0x21eb   :  { %5256 = dma.vmem_to_hbm [thread:$0]  %s5251_s23, 512, %s7598_s6, [#allocation3], %s6707_s30, %s6707_s30, %s6708_s7  }
0x21ec   :  { %6692 = dma.done.wait [#allocation3], 512  }
0x21ed   :  { %6693 = vsyncadd [#allocation3], 4294966784 }
0x21ee   :  { %5260 = vsyncpa [#allocation3], 1 }

</bundles_post_ra>
